<compile_context>
chip_gen: v7x
topology: tpu7x:2x2x1
jax: 0.10.0
libtpu: 0.0.40
codegen_flags: <defaults>
</compile_context>

<pallas_src>
import jax
import jax.numpy as jnp
from jax.experimental import pallas as pl
from jax.experimental.pallas import tpu as pltpu


def _round_up(x, m):
    return ((x + m - 1) // m) * m


# ----------------------------------------------------------------------------
# Fused whole-network kernel
# ----------------------------------------------------------------------------
def _make_fused_kernel(num_block, H, W, C, PAD):
    HW = H * W
    f32, bf16 = jnp.float32, jnp.bfloat16

    def kernel(x_ref, w_trunk_ref, b_trunk_ref, w_head_ref, b_head_ref,
               w_fc1_ref, b_fc1_ref, w_fc2_ref, b_fc2_ref,
               p_out_ref, v_out_ref, pad_a, pad_b):
        # ---- per-tap horizontal validity masks (pad=1 halo of the 3x3 conv).
        # Vertical (dh) out-of-range taps land in the zero halo rows (PAD >= W+1)
        # so they need no mask; only dw = +/-1 taps can wrap across rows.
        r = jax.lax.broadcasted_iota(jnp.int32, (HW, 1), 0)
        ww = r % W
        mask_l = (ww >= 1).astype(f32)        # output col w-1 valid  (dw = -1)
        mask_r = (ww <= W - 2).astype(f32)    # output col w+1 valid  (dw = +1)
        taps = []
        for dh in (-1, 0, 1):
            for dw in (-1, 0, 1):
                mask = None if dw == 0 else (mask_l if dw == -1 else mask_r)
                taps.append((dh * W + dw, mask))

        def conv3x3(src_ref, idx):
            """Fused conv3x3 + folded BN: 9 shifted (HW,C)x(C,C) bf16 MXU dots."""
            acc = jnp.zeros((HW, C), f32)
            for k, (shift, mask) in enumerate(taps):
                xs = src_ref[PAD + shift:PAD + shift + HW, :]
                if mask is not None:
                    xs = xs * mask
                acc = acc + jnp.dot(xs.astype(bf16), w_trunk_ref[idx, k],
                                    preferred_element_type=f32)
            return acc + b_trunk_ref[idx]

        # Zero the halo buffers once; the interior is fully rewritten every
        # grid step and the halo rows are never written, so they stay zero.
        @pl.when(pl.program_id(0) == 0)
        def _init():
            pad_a[...] = jnp.zeros_like(pad_a)
            pad_b[...] = jnp.zeros_like(pad_b)

        pad_a[PAD:PAD + HW, :] = x_ref[0]

        # first ConvBlock: relu(bn(conv3x3(x)))
        pad_a[PAD:PAD + HW, :] = jnp.maximum(conv3x3(pad_a, 0), 0.0)

        # residue blocks: relu(bn2(conv2(relu(bn1(conv1(x)))))) + x
        for blk in range(num_block):
            pad_b[PAD:PAD + HW, :] = jnp.maximum(conv3x3(pad_a, 1 + 2 * blk), 0.0)
            out = jnp.maximum(conv3x3(pad_b, 2 + 2 * blk), 0.0)
            pad_a[PAD:PAD + HW, :] = out + pad_a[PAD:PAD + HW, :]

        act = pad_a[PAD:PAD + HW, :]                               # (HW, C) f32

        # policy & value 1x1 ConvBlocks fused into one matmul -> (HW, 2)
        head = jnp.dot(act.astype(bf16), w_head_ref[...],
                       preferred_element_type=f32) + b_head_ref[...]
        head = jnp.maximum(head, 0.0)

        # policy head: log_softmax fused as an epilogue over the HW logits
        logits = head[:, 0:1]                                      # (HW, 1)
        m = jnp.max(logits, axis=0, keepdims=True)
        s = logits - m
        lse = jnp.log(jnp.sum(jnp.exp(s), axis=0, keepdims=True))
        p_out_ref[...] = (s - lse)[None]                           # (1, HW, 1)

        # value head: fc1 -> relu -> fc2 -> tanh (column orientation, no
        # in-kernel transposes needed)
        vcol = head[:, 1:2]                                        # (HW, 1)
        h1 = jnp.dot(w_fc1_ref[...], vcol.astype(bf16),
                     preferred_element_type=f32) + b_fc1_ref[...]
        h1 = jnp.maximum(h1, 0.0)                                  # (F1, 1)
        v = jnp.sum(h1 * w_fc2_ref[...], axis=0, keepdims=True) + b_fc2_ref[...]
        v_out_ref[...] = jnp.tanh(v)[None]                         # (1, 1, 1)

    return kernel


# ----------------------------------------------------------------------------
# Trace-time weight folding / packing
# ----------------------------------------------------------------------------
def _fold_conv_bn(p, cin_pad=None, eps=1e-5):
    """Fold conv bias + BatchNorm running stats into the conv weight / bias.

    Returns (taps, bias): taps (k*k, Cin[_pad], Cout) bf16 with the BN scale
    folded into the output-channel columns, bias (1, Cout) f32.
    """
    scale = p["gamma"] / jnp.sqrt(p["var"] + eps)
    bias = p["b"] * scale + p["beta"] - p["mean"] * scale
    w = p["w"]                                    # (Cout, Cin, kh, kw)
    cout, cin, kh, kw = w.shape
    taps = jnp.transpose(w, (2, 3, 1, 0)).reshape(kh * kw, cin, cout) * scale
    if cin_pad is not None and cin_pad > cin:
        taps = jnp.pad(taps, ((0, 0), (0, cin_pad - cin), (0, 0)))
    return taps.astype(jnp.bfloat16), bias.reshape(1, cout).astype(jnp.float32)


# ----------------------------------------------------------------------------
# Forward pass (single pallas_call)
# ----------------------------------------------------------------------------
def policy_value_net_forward(params, x_nchw):
    N, cin, H, W = x_nchw.shape
    C = params["conv"]["w"].shape[0]
    HW = H * W
    PAD = _round_up(W + 1, 8)
    num_block = len(params["residues"])
    assert C >= cin

    # ---- trace-time weight packing (tiny arrays, negligible cost) ----
    w0, b0 = _fold_conv_bn(params["conv"], cin_pad=C)
    trunk_w, trunk_b = [w0], [b0]
    for rp in params["residues"]:
        for cname in ("c1", "c2"):
            wi, bi = _fold_conv_bn(rp[cname])
            trunk_w.append(wi)
            trunk_b.append(bi)
    w_trunk = jnp.stack(trunk_w)                       # (1+2B, 9, C, C) bf16
    b_trunk = jnp.stack(trunk_b)                       # (1+2B, 1, C) f32

    wp, bp = _fold_conv_bn(params["policy"]["conv"])
    wv, bv = _fold_conv_bn(params["value"]["conv"])
    w_head = jnp.concatenate([wp[0], wv[0]], axis=1)   # (C, 2) bf16
    b_head = jnp.concatenate([bp, bv], axis=1)         # (1, 2) f32

    fc1, fc2 = params["value"]["fc1"], params["value"]["fc2"]
    assert fc1["w"].shape[1] == HW
    w_fc1 = fc1["w"].astype(jnp.bfloat16)                 # (F1, HW)
    b_fc1 = fc1["b"].reshape(-1, 1).astype(jnp.float32)   # (F1, 1)
    w_fc2 = fc2["w"].reshape(-1, 1).astype(jnp.float32)   # (F1, 1)
    b_fc2 = fc2["b"].reshape(1, 1).astype(jnp.float32)    # (1, 1)

    # ---- input: NCHW -> (N, H*W, C) rows, zero channel padding to C ----
    x = jnp.transpose(x_nchw.astype(jnp.float32), (0, 2, 3, 1)).reshape(N, HW, cin)
    x = jnp.pad(x, ((0, 0), (0, 0), (0, C - cin)))

    def full_spec(a):
        nd = a.ndim
        return pl.BlockSpec(a.shape, lambda n: (0,) * nd)

    kernel = _make_fused_kernel(num_block, H, W, C, PAD)
    out_p, out_v = pl.pallas_call(
        kernel,
        grid=(N,),
        in_specs=[
            pl.BlockSpec((1, HW, C), lambda n: (n, 0, 0)),
            full_spec(w_trunk), full_spec(b_trunk),
            full_spec(w_head), full_spec(b_head),
            full_spec(w_fc1), full_spec(b_fc1),
            full_spec(w_fc2), full_spec(b_fc2),
        ],
        out_specs=(
            pl.BlockSpec((1, HW, 1), lambda n: (n, 0, 0)),
            pl.BlockSpec((1, 1, 1), lambda n: (n, 0, 0)),
        ),
        out_shape=(
            jax.ShapeDtypeStruct((N, HW, 1), jnp.float32),
            jax.ShapeDtypeStruct((N, 1, 1), jnp.float32),
        ),
        scratch_shapes=[
            pltpu.VMEM((HW + 2 * PAD, C), jnp.float32),   # trunk activation x
            pltpu.VMEM((HW + 2 * PAD, C), jnp.float32),   # res-block intermediate
        ],
        compiler_params=pltpu.CompilerParams(
            dimension_semantics=("parallel",)),
    )(x, w_trunk, b_trunk, w_head, b_head, w_fc1, b_fc1, w_fc2, b_fc2)

    return out_p.reshape(N, HW), out_v.reshape(N, 1)


# ----------------------------------------------------------------------------
# Pure-JAX f32 reference (for correctness checking only)
# ----------------------------------------------------------------------------
def _reference_forward(params, x_nchw, eps=1e-5):
    def conv_block(x, p, pad, relu=True):
        w = jnp.transpose(p["w"], (2, 3, 1, 0))            # HWIO
        y = jax.lax.conv_general_dilated(
            x, w, window_strides=(1, 1), padding=((pad, pad), (pad, pad)),
            dimension_numbers=("NHWC", "HWIO", "NHWC"))
        y = y + p["b"]
        y = (y - p["mean"]) / jnp.sqrt(p["var"] + eps) * p["gamma"] + p["beta"]
        return jnp.maximum(y, 0.0) if relu else y

    x = jnp.transpose(x_nchw.astype(jnp.float32), (0, 2, 3, 1))
    x = conv_block(x, params["conv"], pad=1)
    for rp in params["residues"]:
        out = conv_block(x, rp["c1"], pad=1)
        out = conv_block(out, rp["c2"], pad=1, relu=False)
        x = jnp.maximum(out, 0.0) + x
    N, H, W, _ = x.shape
    ph = conv_block(x, params["policy"]["conv"], pad=0).reshape(N, H * W)
    p_hat = jax.nn.log_softmax(ph, axis=1)
    vh = conv_block(x, params["value"]["conv"], pad=0).reshape(N, H * W)
    fc1, fc2 = params["value"]["fc1"], params["value"]["fc2"]
    v = jnp.maximum(vh @ fc1["w"].T + fc1["b"], 0.0)
    v = jnp.tanh(v @ fc2["w"].T + fc2["b"])
    return p_hat, v


# ----------------------------------------------------------------------------
# Parameter init (matches the PyTorch module structure)
# ----------------------------------------------------------------------------
def _conv_bn_params(key, cin, cout, k):
    k1, k2, k3, k4 = jax.random.split(key, 4)
    return {
        "w": 0.1 * jax.random.normal(k1, (cout, cin, k, k), jnp.float32),
        "b": 0.1 * jax.random.normal(k2, (cout,), jnp.float32),
        "gamma": 1.0 + 0.1 * jax.random.normal(k3, (cout,), jnp.float32),
        "beta": 0.1 * jax.random.normal(k4, (cout,), jnp.float32),
        "mean": jnp.zeros((cout,), jnp.float32),
        "var": jnp.ones((cout,), jnp.float32),
    }


def _linear_params(key, fin, fout):
    k1, k2 = jax.random.split(key)
    return {
        "w": 0.1 * jax.random.normal(k1, (fout, fin), jnp.float32),
        "b": 0.1 * jax.random.normal(k2, (fout,), jnp.float32),
    }


def init_params(key, n_feature_planes, num_channel, num_block, board_len):
    keys = jax.random.split(key, 4 + num_block)
    params = {
        "conv": _conv_bn_params(keys[0], n_feature_planes, num_channel, 3),
        "residues": [],
        "policy": {"conv": _conv_bn_params(keys[1], num_channel, 1, 1)},
        "value": {
            "conv": _conv_bn_params(keys[2], num_channel, 1, 1),
            "fc1": _linear_params(jax.random.fold_in(keys[3], 1), board_len ** 2, 128),
            "fc2": _linear_params(jax.random.fold_in(keys[3], 2), 128, 1),
        },
    }
    for i in range(num_block):
        kb = jax.random.split(keys[4 + i], 2)
        params["residues"].append({
            "c1": _conv_bn_params(kb[0], num_channel, num_channel, 3),
            "c2": _conv_bn_params(kb[1], num_channel, num_channel, 3),
        })
    return params


if __name__ == "__main__":
    # Small, forward-consistent shapes: batch=2, planes=2, board=8x8,
    # 2 residual blocks, 32 channels.
    batch, n_planes, board_len = 2, 2, 8
    num_block, num_channel = 2, 32

    key = jax.random.PRNGKey(0)
    k_par, k_inp = jax.random.split(key)
    params = init_params(k_par, n_planes, num_channel, num_block, board_len)
    x = jax.random.normal(k_inp, (batch, n_planes, board_len, board_len), jnp.float32)

    fwd = jax.jit(policy_value_net_forward)
    p_hat, value = fwd(params, x)
    jax.block_until_ready((p_hat, value))

    assert p_hat.shape == (batch, board_len ** 2)
    assert value.shape == (batch, 1)
    # log_softmax rows must sum to 1 in prob space
    assert jnp.allclose(jnp.sum(jnp.exp(p_hat), axis=1), 1.0, atol=1e-3)

    # compare against a pure-JAX f32 reference (loose tolerance: bf16 MXU inputs)
    p_ref, v_ref = _reference_forward(params, x)
    assert jnp.allclose(p_hat, p_ref, atol=5e-2, rtol=5e-2)
    assert jnp.allclose(value, v_ref, atol=5e-2, rtol=5e-2)

    print("KERNEL_OK")
</pallas_src>

<mosaic_0001>
module attributes {stable_mosaic.version = 11 : i64} {
  func.func @kernel(%arg0: i32, %arg1: memref<1x64x32xf32, #tpu.memory_space<vmem>>, %arg2: memref<5x9x32x32xbf16, #tpu.memory_space<vmem>>, %arg3: memref<5x1x32xf32, #tpu.memory_space<vmem>>, %arg4: memref<32x2xbf16, #tpu.memory_space<vmem>>, %arg5: memref<1x2xf32, #tpu.memory_space<vmem>>, %arg6: memref<128x64xbf16, #tpu.memory_space<vmem>>, %arg7: memref<128x1xf32, #tpu.memory_space<vmem>>, %arg8: memref<128x1xf32, #tpu.memory_space<vmem>>, %arg9: memref<1x1xf32, #tpu.memory_space<vmem>>, %arg10: memref<1x64x1xf32, #tpu.memory_space<vmem>>, %arg11: memref<1x1x1xf32, #tpu.memory_space<vmem>>, %arg12: memref<96x32xf32, #tpu.memory_space<vmem>>, %arg13: memref<96x32xf32, #tpu.memory_space<vmem>>) attributes {dimension_semantics = [#tpu.dimension_semantics<parallel>], iteration_bounds = array<i64: 2>, scalar_prefetch = 0 : i64, scratch_operands = 2 : i64, tpu.core_type = #tpu.core_type<tc>, window_params = [{transform_indices = @transform_0, window_bounds = array<i64: 1, 64, 32>}, {pipeline_mode = #tpu.pipeline_mode<synchronous>, transform_indices = @transform_1, window_bounds = array<i64: 5, 9, 32, 32>}, {pipeline_mode = #tpu.pipeline_mode<synchronous>, transform_indices = @transform_2, window_bounds = array<i64: 5, 1, 32>}, {pipeline_mode = #tpu.pipeline_mode<synchronous>, transform_indices = @transform_3, window_bounds = array<i64: 32, 2>}, {pipeline_mode = #tpu.pipeline_mode<synchronous>, transform_indices = @transform_4, window_bounds = array<i64: 1, 2>}, {pipeline_mode = #tpu.pipeline_mode<synchronous>, transform_indices = @transform_5, window_bounds = array<i64: 128, 64>}, {pipeline_mode = #tpu.pipeline_mode<synchronous>, transform_indices = @transform_6, window_bounds = array<i64: 128, 1>}, {pipeline_mode = #tpu.pipeline_mode<synchronous>, transform_indices = @transform_7, window_bounds = array<i64: 128, 1>}, {pipeline_mode = #tpu.pipeline_mode<synchronous>, transform_indices = @transform_8, window_bounds = array<i64: 1, 1>}, {transform_indices = @transform_9, window_bounds = array<i64: 1, 64, 1>}, {transform_indices = @transform_10, window_bounds = array<i64: 1, 1, 1>}]} {
    %0 = tpu.iota {dimensions = array<i32: 0>} : vector<64x1xi32>
    %c8_i32 = arith.constant 8 : i32
    %c0_i32 = arith.constant 0 : i32
    %1 = arith.cmpi eq, %c8_i32, %c0_i32 : i32
    %c1_i32 = arith.constant 1 : i32
    %2 = arith.select %1, %c1_i32, %c8_i32 : i32
    %3 = vector.broadcast %2 : i32 to vector<64x1xi32>
    %4 = arith.remsi %0, %3 : vector<64x1xi32>
    %c0_i32_0 = arith.constant 0 : i32
    %5 = vector.broadcast %c0_i32_0 : i32 to vector<64x1xi32>
    %6 = arith.cmpi ne, %4, %5 : vector<64x1xi32>
    %c0_i32_1 = arith.constant 0 : i32
    %7 = vector.broadcast %c0_i32_1 : i32 to vector<64x1xi32>
    %8 = arith.cmpi slt, %4, %7 : vector<64x1xi32>
    %c0_i32_2 = arith.constant 0 : i32
    %9 = arith.cmpi slt, %2, %c0_i32_2 : i32
    %10 = vector.broadcast %9 : i1 to vector<64x1xi1>
    %11 = vector.broadcast %10 : vector<64x1xi1> to vector<64x1xi1>
    %12 = arith.xori %8, %11 : vector<64x1xi1>
    %13 = arith.andi %12, %6 : vector<64x1xi1>
    %14 = vector.broadcast %2 : i32 to vector<64x1xi32>
    %15 = arith.addi %4, %14 : vector<64x1xi32>
    %16 = arith.select %13, %15, %4 : vector<64x1xi1>, vector<64x1xi32>
    %c1_i32_3 = arith.constant 1 : i32
    %17 = vector.broadcast %c1_i32_3 : i32 to vector<64x1xi32>
    %18 = arith.cmpi sge, %16, %17 : vector<64x1xi32>
    %19 = arith.extui %18 : vector<64x1xi1> to vector<64x1xi32>
    %20 = arith.sitofp %19 : vector<64x1xi32> to vector<64x1xf32>
    %c6_i32 = arith.constant 6 : i32
    %21 = vector.broadcast %c6_i32 : i32 to vector<64x1xi32>
    %22 = arith.cmpi sle, %16, %21 : vector<64x1xi32>
    %23 = arith.extui %22 : vector<64x1xi1> to vector<64x1xi32>
    %24 = arith.sitofp %23 : vector<64x1xi32> to vector<64x1xf32>
    %c0_i32_4 = arith.constant 0 : i32
    %25 = arith.cmpi eq, %arg0, %c0_i32_4 : i32
    %26 = arith.extui %25 : i1 to i32
    %c0_i32_5 = arith.constant 0 : i32
    %27 = arith.cmpi ne, %26, %c0_i32_5 : i32
    scf.if %27 {
      %cst_375 = arith.constant 0.000000e+00 : f32
      %444 = vector.broadcast %cst_375 : f32 to vector<96x32xf32>
      %c0_376 = arith.constant 0 : index
      %c0_377 = arith.constant 0 : index
      %445 = vector.load %arg12[%c0_376, %c0_377] : memref<96x32xf32, #tpu.memory_space<vmem>>, vector<96x32xf32>
      tpu.vector_store %arg12[%c0_376, %c0_377], %444 {strides = array<i32>} : memref<96x32xf32, #tpu.memory_space<vmem>>, vector<96x32xf32>,
      %cst_378 = arith.constant 0.000000e+00 : f32
      %446 = vector.broadcast %cst_378 : f32 to vector<96x32xf32>
      %c0_379 = arith.constant 0 : index
      %c0_380 = arith.constant 0 : index
      %447 = vector.load %arg13[%c0_379, %c0_380] : memref<96x32xf32, #tpu.memory_space<vmem>>, vector<96x32xf32>
      tpu.vector_store %arg13[%c0_379, %c0_380], %446 {strides = array<i32>} : memref<96x32xf32, #tpu.memory_space<vmem>>, vector<96x32xf32>,
    } else {
    }
    %c0 = arith.constant 0 : index
    %c0_6 = arith.constant 0 : index
    %c0_7 = arith.constant 0 : index
    %28 = vector.load %arg1[%c0, %c0_6, %c0_7] : memref<1x64x32xf32, #tpu.memory_space<vmem>>, vector<1x64x32xf32>
    %29 = vector.shape_cast %28 : vector<1x64x32xf32> to vector<64x32xf32>
    %c16 = arith.constant 16 : index
    %c0_8 = arith.constant 0 : index
    %30 = vector.load %arg12[%c16, %c0_8] : memref<96x32xf32, #tpu.memory_space<vmem>>, vector<64x32xf32>
    tpu.vector_store %arg12[%c16, %c0_8], %29 {strides = array<i32>} : memref<96x32xf32, #tpu.memory_space<vmem>>, vector<64x32xf32>,
    %cst = arith.constant 0.000000e+00 : f32
    %31 = vector.broadcast %cst : f32 to vector<64x32xf32>
    %c7 = arith.constant 7 : index
    %c0_9 = arith.constant 0 : index
    %32 = vector.load %arg12[%c7, %c0_9] : memref<96x32xf32, #tpu.memory_space<vmem>>, vector<64x32xf32>
    %33 = vector.broadcast %20 : vector<64x1xf32> to vector<64x32xf32>
    %34 = arith.mulf %32, %33 : vector<64x32xf32>
    %35 = arith.truncf %34 : vector<64x32xf32> to vector<64x32xbf16>
    %c0_10 = arith.constant 0 : index
    %c0_11 = arith.constant 0 : index
    %c0_12 = arith.constant 0 : index
    %c0_13 = arith.constant 0 : index
    %36 = vector.load %arg2[%c0_10, %c0_11, %c0_12, %c0_13] : memref<5x9x32x32xbf16, #tpu.memory_space<vmem>>, vector<1x1x32x32xbf16>
    %37 = vector.shape_cast %36 : vector<1x1x32x32xbf16> to vector<32x32xbf16>
    %cst_14 = arith.constant dense<0.000000e+00> : vector<64x32xf32>
    %38 = tpu.matmul %35, %37, %cst_14 {dimension_numbers = #tpu.dot_dimension_numbers<[1], [0], [0], [1], [0, 0, 1, 1], [], []>} : vector<64x32xbf16>, vector<32x32xbf16>, vector<64x32xf32> -> vector<64x32xf32>
    %39 = arith.addf %31, %38 : vector<64x32xf32>
    %c8 = arith.constant 8 : index
    %c0_15 = arith.constant 0 : index
    %40 = vector.load %arg12[%c8, %c0_15] : memref<96x32xf32, #tpu.memory_space<vmem>>, vector<64x32xf32>
    %41 = arith.truncf %40 : vector<64x32xf32> to vector<64x32xbf16>
    %c0_16 = arith.constant 0 : index
    %c1 = arith.constant 1 : index
    %c0_17 = arith.constant 0 : index
    %c0_18 = arith.constant 0 : index
    %42 = vector.load %arg2[%c0_16, %c1, %c0_17, %c0_18] : memref<5x9x32x32xbf16, #tpu.memory_space<vmem>>, vector<1x1x32x32xbf16>
    %43 = vector.shape_cast %42 : vector<1x1x32x32xbf16> to vector<32x32xbf16>
    %cst_19 = arith.constant dense<0.000000e+00> : vector<64x32xf32>
    %44 = tpu.matmul %41, %43, %cst_19 {dimension_numbers = #tpu.dot_dimension_numbers<[1], [0], [0], [1], [0, 0, 1, 1], [], []>} : vector<64x32xbf16>, vector<32x32xbf16>, vector<64x32xf32> -> vector<64x32xf32>
    %45 = arith.addf %39, %44 : vector<64x32xf32>
    %c9 = arith.constant 9 : index
    %c0_20 = arith.constant 0 : index
    %46 = vector.load %arg12[%c9, %c0_20] : memref<96x32xf32, #tpu.memory_space<vmem>>, vector<64x32xf32>
    %47 = vector.broadcast %24 : vector<64x1xf32> to vector<64x32xf32>
    %48 = arith.mulf %46, %47 : vector<64x32xf32>
    %49 = arith.truncf %48 : vector<64x32xf32> to vector<64x32xbf16>
    %c0_21 = arith.constant 0 : index
    %c2 = arith.constant 2 : index
    %c0_22 = arith.constant 0 : index
    %c0_23 = arith.constant 0 : index
    %50 = vector.load %arg2[%c0_21, %c2, %c0_22, %c0_23] : memref<5x9x32x32xbf16, #tpu.memory_space<vmem>>, vector<1x1x32x32xbf16>
    %51 = vector.shape_cast %50 : vector<1x1x32x32xbf16> to vector<32x32xbf16>
    %cst_24 = arith.constant dense<0.000000e+00> : vector<64x32xf32>
    %52 = tpu.matmul %49, %51, %cst_24 {dimension_numbers = #tpu.dot_dimension_numbers<[1], [0], [0], [1], [0, 0, 1, 1], [], []>} : vector<64x32xbf16>, vector<32x32xbf16>, vector<64x32xf32> -> vector<64x32xf32>
    %53 = arith.addf %45, %52 : vector<64x32xf32>
    %c15 = arith.constant 15 : index
    %c0_25 = arith.constant 0 : index
    %54 = vector.load %arg12[%c15, %c0_25] : memref<96x32xf32, #tpu.memory_space<vmem>>, vector<64x32xf32>
    %55 = vector.broadcast %20 : vector<64x1xf32> to vector<64x32xf32>
    %56 = arith.mulf %54, %55 : vector<64x32xf32>
    %57 = arith.truncf %56 : vector<64x32xf32> to vector<64x32xbf16>
    %c0_26 = arith.constant 0 : index
    %c3 = arith.constant 3 : index
    %c0_27 = arith.constant 0 : index
    %c0_28 = arith.constant 0 : index
    %58 = vector.load %arg2[%c0_26, %c3, %c0_27, %c0_28] : memref<5x9x32x32xbf16, #tpu.memory_space<vmem>>, vector<1x1x32x32xbf16>
    %59 = vector.shape_cast %58 : vector<1x1x32x32xbf16> to vector<32x32xbf16>
    %cst_29 = arith.constant dense<0.000000e+00> : vector<64x32xf32>
    %60 = tpu.matmul %57, %59, %cst_29 {dimension_numbers = #tpu.dot_dimension_numbers<[1], [0], [0], [1], [0, 0, 1, 1], [], []>} : vector<64x32xbf16>, vector<32x32xbf16>, vector<64x32xf32> -> vector<64x32xf32>
    %61 = arith.addf %53, %60 : vector<64x32xf32>
    %c16_30 = arith.constant 16 : index
    %c0_31 = arith.constant 0 : index
    %62 = vector.load %arg12[%c16_30, %c0_31] : memref<96x32xf32, #tpu.memory_space<vmem>>, vector<64x32xf32>
    %63 = arith.truncf %62 : vector<64x32xf32> to vector<64x32xbf16>
    %c0_32 = arith.constant 0 : index
    %c4 = arith.constant 4 : index
    %c0_33 = arith.constant 0 : index
    %c0_34 = arith.constant 0 : index
    %64 = vector.load %arg2[%c0_32, %c4, %c0_33, %c0_34] : memref<5x9x32x32xbf16, #tpu.memory_space<vmem>>, vector<1x1x32x32xbf16>
    %65 = vector.shape_cast %64 : vector<1x1x32x32xbf16> to vector<32x32xbf16>
    %cst_35 = arith.constant dense<0.000000e+00> : vector<64x32xf32>
    %66 = tpu.matmul %63, %65, %cst_35 {dimension_numbers = #tpu.dot_dimension_numbers<[1], [0], [0], [1], [0, 0, 1, 1], [], []>} : vector<64x32xbf16>, vector<32x32xbf16>, vector<64x32xf32> -> vector<64x32xf32>
    %67 = arith.addf %61, %66 : vector<64x32xf32>
    %c17 = arith.constant 17 : index
    %c0_36 = arith.constant 0 : index
    %68 = vector.load %arg12[%c17, %c0_36] : memref<96x32xf32, #tpu.memory_space<vmem>>, vector<64x32xf32>
    %69 = vector.broadcast %24 : vector<64x1xf32> to vector<64x32xf32>
    %70 = arith.mulf %68, %69 : vector<64x32xf32>
    %71 = arith.truncf %70 : vector<64x32xf32> to vector<64x32xbf16>
    %c0_37 = arith.constant 0 : index
    %c5 = arith.constant 5 : index
    %c0_38 = arith.constant 0 : index
    %c0_39 = arith.constant 0 : index
    %72 = vector.load %arg2[%c0_37, %c5, %c0_38, %c0_39] : memref<5x9x32x32xbf16, #tpu.memory_space<vmem>>, vector<1x1x32x32xbf16>
    %73 = vector.shape_cast %72 : vector<1x1x32x32xbf16> to vector<32x32xbf16>
    %cst_40 = arith.constant dense<0.000000e+00> : vector<64x32xf32>
    %74 = tpu.matmul %71, %73, %cst_40 {dimension_numbers = #tpu.dot_dimension_numbers<[1], [0], [0], [1], [0, 0, 1, 1], [], []>} : vector<64x32xbf16>, vector<32x32xbf16>, vector<64x32xf32> -> vector<64x32xf32>
    %75 = arith.addf %67, %74 : vector<64x32xf32>
    %c23 = arith.constant 23 : index
    %c0_41 = arith.constant 0 : index
    %76 = vector.load %arg12[%c23, %c0_41] : memref<96x32xf32, #tpu.memory_space<vmem>>, vector<64x32xf32>
    %77 = vector.broadcast %20 : vector<64x1xf32> to vector<64x32xf32>
    %78 = arith.mulf %76, %77 : vector<64x32xf32>
    %79 = arith.truncf %78 : vector<64x32xf32> to vector<64x32xbf16>
    %c0_42 = arith.constant 0 : index
    %c6 = arith.constant 6 : index
    %c0_43 = arith.constant 0 : index
    %c0_44 = arith.constant 0 : index
    %80 = vector.load %arg2[%c0_42, %c6, %c0_43, %c0_44] : memref<5x9x32x32xbf16, #tpu.memory_space<vmem>>, vector<1x1x32x32xbf16>
    %81 = vector.shape_cast %80 : vector<1x1x32x32xbf16> to vector<32x32xbf16>
    %cst_45 = arith.constant dense<0.000000e+00> : vector<64x32xf32>
    %82 = tpu.matmul %79, %81, %cst_45 {dimension_numbers = #tpu.dot_dimension_numbers<[1], [0], [0], [1], [0, 0, 1, 1], [], []>} : vector<64x32xbf16>, vector<32x32xbf16>, vector<64x32xf32> -> vector<64x32xf32>
    %83 = arith.addf %75, %82 : vector<64x32xf32>
    %c24 = arith.constant 24 : index
    %c0_46 = arith.constant 0 : index
    %84 = vector.load %arg12[%c24, %c0_46] : memref<96x32xf32, #tpu.memory_space<vmem>>, vector<64x32xf32>
    %85 = arith.truncf %84 : vector<64x32xf32> to vector<64x32xbf16>
    %c0_47 = arith.constant 0 : index
    %c7_48 = arith.constant 7 : index
    %c0_49 = arith.constant 0 : index
    %c0_50 = arith.constant 0 : index
    %86 = vector.load %arg2[%c0_47, %c7_48, %c0_49, %c0_50] : memref<5x9x32x32xbf16, #tpu.memory_space<vmem>>, vector<1x1x32x32xbf16>
    %87 = vector.shape_cast %86 : vector<1x1x32x32xbf16> to vector<32x32xbf16>
    %cst_51 = arith.constant dense<0.000000e+00> : vector<64x32xf32>
    %88 = tpu.matmul %85, %87, %cst_51 {dimension_numbers = #tpu.dot_dimension_numbers<[1], [0], [0], [1], [0, 0, 1, 1], [], []>} : vector<64x32xbf16>, vector<32x32xbf16>, vector<64x32xf32> -> vector<64x32xf32>
    %89 = arith.addf %83, %88 : vector<64x32xf32>
    %c25 = arith.constant 25 : index
    %c0_52 = arith.constant 0 : index
    %90 = vector.load %arg12[%c25, %c0_52] : memref<96x32xf32, #tpu.memory_space<vmem>>, vector<64x32xf32>
    %91 = vector.broadcast %24 : vector<64x1xf32> to vector<64x32xf32>
    %92 = arith.mulf %90, %91 : vector<64x32xf32>
    %93 = arith.truncf %92 : vector<64x32xf32> to vector<64x32xbf16>
    %c0_53 = arith.constant 0 : index
    %c8_54 = arith.constant 8 : index
    %c0_55 = arith.constant 0 : index
    %c0_56 = arith.constant 0 : index
    %94 = vector.load %arg2[%c0_53, %c8_54, %c0_55, %c0_56] : memref<5x9x32x32xbf16, #tpu.memory_space<vmem>>, vector<1x1x32x32xbf16>
    %95 = vector.shape_cast %94 : vector<1x1x32x32xbf16> to vector<32x32xbf16>
    %cst_57 = arith.constant dense<0.000000e+00> : vector<64x32xf32>
    %96 = tpu.matmul %93, %95, %cst_57 {dimension_numbers = #tpu.dot_dimension_numbers<[1], [0], [0], [1], [0, 0, 1, 1], [], []>} : vector<64x32xbf16>, vector<32x32xbf16>, vector<64x32xf32> -> vector<64x32xf32>
    %97 = arith.addf %89, %96 : vector<64x32xf32>
    %c0_58 = arith.constant 0 : index
    %c0_59 = arith.constant 0 : index
    %c0_60 = arith.constant 0 : index
    %98 = vector.load %arg3[%c0_58, %c0_59, %c0_60] : memref<5x1x32xf32, #tpu.memory_space<vmem>>, vector<1x1x32xf32>
    %99 = vector.shape_cast %98 : vector<1x1x32xf32> to vector<1x32xf32>
    %100 = vector.broadcast %99 : vector<1x32xf32> to vector<64x32xf32>
    %101 = arith.addf %97, %100 : vector<64x32xf32>
    %cst_61 = arith.constant 0.000000e+00 : f32
    %102 = vector.broadcast %cst_61 : f32 to vector<64x32xf32>
    %103 = arith.maximumf %101, %102 : vector<64x32xf32>
    %c16_62 = arith.constant 16 : index
    %c0_63 = arith.constant 0 : index
    %104 = vector.load %arg12[%c16_62, %c0_63] : memref<96x32xf32, #tpu.memory_space<vmem>>, vector<64x32xf32>
    tpu.vector_store %arg12[%c16_62, %c0_63], %103 {strides = array<i32>} : memref<96x32xf32, #tpu.memory_space<vmem>>, vector<64x32xf32>,
    %cst_64 = arith.constant 0.000000e+00 : f32
    %105 = vector.broadcast %cst_64 : f32 to vector<64x32xf32>
    %c7_65 = arith.constant 7 : index
    %c0_66 = arith.constant 0 : index
    %106 = vector.load %arg12[%c7_65, %c0_66] : memref<96x32xf32, #tpu.memory_space<vmem>>, vector<64x32xf32>
    %107 = vector.broadcast %20 : vector<64x1xf32> to vector<64x32xf32>
    %108 = arith.mulf %106, %107 : vector<64x32xf32>
    %109 = arith.truncf %108 : vector<64x32xf32> to vector<64x32xbf16>
    %c1_67 = arith.constant 1 : index
    %c0_68 = arith.constant 0 : index
    %c0_69 = arith.constant 0 : index
    %c0_70 = arith.constant 0 : index
    %110 = vector.load %arg2[%c1_67, %c0_68, %c0_69, %c0_70] : memref<5x9x32x32xbf16, #tpu.memory_space<vmem>>, vector<1x1x32x32xbf16>
    %111 = vector.shape_cast %110 : vector<1x1x32x32xbf16> to vector<32x32xbf16>
    %cst_71 = arith.constant dense<0.000000e+00> : vector<64x32xf32>
    %112 = tpu.matmul %109, %111, %cst_71 {dimension_numbers = #tpu.dot_dimension_numbers<[1], [0], [0], [1], [0, 0, 1, 1], [], []>} : vector<64x32xbf16>, vector<32x32xbf16>, vector<64x32xf32> -> vector<64x32xf32>
    %113 = arith.addf %105, %112 : vector<64x32xf32>
    %c8_72 = arith.constant 8 : index
    %c0_73 = arith.constant 0 : index
    %114 = vector.load %arg12[%c8_72, %c0_73] : memref<96x32xf32, #tpu.memory_space<vmem>>, vector<64x32xf32>
    %115 = arith.truncf %114 : vector<64x32xf32> to vector<64x32xbf16>
    %c1_74 = arith.constant 1 : index
    %c1_75 = arith.constant 1 : index
    %c0_76 = arith.constant 0 : index
    %c0_77 = arith.constant 0 : index
    %116 = vector.load %arg2[%c1_74, %c1_75, %c0_76, %c0_77] : memref<5x9x32x32xbf16, #tpu.memory_space<vmem>>, vector<1x1x32x32xbf16>
    %117 = vector.shape_cast %116 : vector<1x1x32x32xbf16> to vector<32x32xbf16>
    %cst_78 = arith.constant dense<0.000000e+00> : vector<64x32xf32>
    %118 = tpu.matmul %115, %117, %cst_78 {dimension_numbers = #tpu.dot_dimension_numbers<[1], [0], [0], [1], [0, 0, 1, 1], [], []>} : vector<64x32xbf16>, vector<32x32xbf16>, vector<64x32xf32> -> vector<64x32xf32>
    %119 = arith.addf %113, %118 : vector<64x32xf32>
    %c9_79 = arith.constant 9 : index
    %c0_80 = arith.constant 0 : index
    %120 = vector.load %arg12[%c9_79, %c0_80] : memref<96x32xf32, #tpu.memory_space<vmem>>, vector<64x32xf32>
    %121 = vector.broadcast %24 : vector<64x1xf32> to vector<64x32xf32>
    %122 = arith.mulf %120, %121 : vector<64x32xf32>
    %123 = arith.truncf %122 : vector<64x32xf32> to vector<64x32xbf16>
    %c1_81 = arith.constant 1 : index
    %c2_82 = arith.constant 2 : index
    %c0_83 = arith.constant 0 : index
    %c0_84 = arith.constant 0 : index
    %124 = vector.load %arg2[%c1_81, %c2_82, %c0_83, %c0_84] : memref<5x9x32x32xbf16, #tpu.memory_space<vmem>>, vector<1x1x32x32xbf16>
    %125 = vector.shape_cast %124 : vector<1x1x32x32xbf16> to vector<32x32xbf16>
    %cst_85 = arith.constant dense<0.000000e+00> : vector<64x32xf32>
    %126 = tpu.matmul %123, %125, %cst_85 {dimension_numbers = #tpu.dot_dimension_numbers<[1], [0], [0], [1], [0, 0, 1, 1], [], []>} : vector<64x32xbf16>, vector<32x32xbf16>, vector<64x32xf32> -> vector<64x32xf32>
    %127 = arith.addf %119, %126 : vector<64x32xf32>
    %c15_86 = arith.constant 15 : index
    %c0_87 = arith.constant 0 : index
    %128 = vector.load %arg12[%c15_86, %c0_87] : memref<96x32xf32, #tpu.memory_space<vmem>>, vector<64x32xf32>
    %129 = vector.broadcast %20 : vector<64x1xf32> to vector<64x32xf32>
    %130 = arith.mulf %128, %129 : vector<64x32xf32>
    %131 = arith.truncf %130 : vector<64x32xf32> to vector<64x32xbf16>
    %c1_88 = arith.constant 1 : index
    %c3_89 = arith.constant 3 : index
    %c0_90 = arith.constant 0 : index
    %c0_91 = arith.constant 0 : index
    %132 = vector.load %arg2[%c1_88, %c3_89, %c0_90, %c0_91] : memref<5x9x32x32xbf16, #tpu.memory_space<vmem>>, vector<1x1x32x32xbf16>
    %133 = vector.shape_cast %132 : vector<1x1x32x32xbf16> to vector<32x32xbf16>
    %cst_92 = arith.constant dense<0.000000e+00> : vector<64x32xf32>
    %134 = tpu.matmul %131, %133, %cst_92 {dimension_numbers = #tpu.dot_dimension_numbers<[1], [0], [0], [1], [0, 0, 1, 1], [], []>} : vector<64x32xbf16>, vector<32x32xbf16>, vector<64x32xf32> -> vector<64x32xf32>
    %135 = arith.addf %127, %134 : vector<64x32xf32>
    %c16_93 = arith.constant 16 : index
    %c0_94 = arith.constant 0 : index
    %136 = vector.load %arg12[%c16_93, %c0_94] : memref<96x32xf32, #tpu.memory_space<vmem>>, vector<64x32xf32>
    %137 = arith.truncf %136 : vector<64x32xf32> to vector<64x32xbf16>
    %c1_95 = arith.constant 1 : index
    %c4_96 = arith.constant 4 : index
    %c0_97 = arith.constant 0 : index
    %c0_98 = arith.constant 0 : index
    %138 = vector.load %arg2[%c1_95, %c4_96, %c0_97, %c0_98] : memref<5x9x32x32xbf16, #tpu.memory_space<vmem>>, vector<1x1x32x32xbf16>
    %139 = vector.shape_cast %138 : vector<1x1x32x32xbf16> to vector<32x32xbf16>
    %cst_99 = arith.constant dense<0.000000e+00> : vector<64x32xf32>
    %140 = tpu.matmul %137, %139, %cst_99 {dimension_numbers = #tpu.dot_dimension_numbers<[1], [0], [0], [1], [0, 0, 1, 1], [], []>} : vector<64x32xbf16>, vector<32x32xbf16>, vector<64x32xf32> -> vector<64x32xf32>
    %141 = arith.addf %135, %140 : vector<64x32xf32>
    %c17_100 = arith.constant 17 : index
    %c0_101 = arith.constant 0 : index
    %142 = vector.load %arg12[%c17_100, %c0_101] : memref<96x32xf32, #tpu.memory_space<vmem>>, vector<64x32xf32>
    %143 = vector.broadcast %24 : vector<64x1xf32> to vector<64x32xf32>
    %144 = arith.mulf %142, %143 : vector<64x32xf32>
    %145 = arith.truncf %144 : vector<64x32xf32> to vector<64x32xbf16>
    %c1_102 = arith.constant 1 : index
    %c5_103 = arith.constant 5 : index
    %c0_104 = arith.constant 0 : index
    %c0_105 = arith.constant 0 : index
    %146 = vector.load %arg2[%c1_102, %c5_103, %c0_104, %c0_105] : memref<5x9x32x32xbf16, #tpu.memory_space<vmem>>, vector<1x1x32x32xbf16>
    %147 = vector.shape_cast %146 : vector<1x1x32x32xbf16> to vector<32x32xbf16>
    %cst_106 = arith.constant dense<0.000000e+00> : vector<64x32xf32>
    %148 = tpu.matmul %145, %147, %cst_106 {dimension_numbers = #tpu.dot_dimension_numbers<[1], [0], [0], [1], [0, 0, 1, 1], [], []>} : vector<64x32xbf16>, vector<32x32xbf16>, vector<64x32xf32> -> vector<64x32xf32>
    %149 = arith.addf %141, %148 : vector<64x32xf32>
    %c23_107 = arith.constant 23 : index
    %c0_108 = arith.constant 0 : index
    %150 = vector.load %arg12[%c23_107, %c0_108] : memref<96x32xf32, #tpu.memory_space<vmem>>, vector<64x32xf32>
    %151 = vector.broadcast %20 : vector<64x1xf32> to vector<64x32xf32>
    %152 = arith.mulf %150, %151 : vector<64x32xf32>
    %153 = arith.truncf %152 : vector<64x32xf32> to vector<64x32xbf16>
    %c1_109 = arith.constant 1 : index
    %c6_110 = arith.constant 6 : index
    %c0_111 = arith.constant 0 : index
    %c0_112 = arith.constant 0 : index
    %154 = vector.load %arg2[%c1_109, %c6_110, %c0_111, %c0_112] : memref<5x9x32x32xbf16, #tpu.memory_space<vmem>>, vector<1x1x32x32xbf16>
    %155 = vector.shape_cast %154 : vector<1x1x32x32xbf16> to vector<32x32xbf16>
    %cst_113 = arith.constant dense<0.000000e+00> : vector<64x32xf32>
    %156 = tpu.matmul %153, %155, %cst_113 {dimension_numbers = #tpu.dot_dimension_numbers<[1], [0], [0], [1], [0, 0, 1, 1], [], []>} : vector<64x32xbf16>, vector<32x32xbf16>, vector<64x32xf32> -> vector<64x32xf32>
    %157 = arith.addf %149, %156 : vector<64x32xf32>
    %c24_114 = arith.constant 24 : index
    %c0_115 = arith.constant 0 : index
    %158 = vector.load %arg12[%c24_114, %c0_115] : memref<96x32xf32, #tpu.memory_space<vmem>>, vector<64x32xf32>
    %159 = arith.truncf %158 : vector<64x32xf32> to vector<64x32xbf16>
    %c1_116 = arith.constant 1 : index
    %c7_117 = arith.constant 7 : index
    %c0_118 = arith.constant 0 : index
    %c0_119 = arith.constant 0 : index
    %160 = vector.load %arg2[%c1_116, %c7_117, %c0_118, %c0_119] : memref<5x9x32x32xbf16, #tpu.memory_space<vmem>>, vector<1x1x32x32xbf16>
    %161 = vector.shape_cast %160 : vector<1x1x32x32xbf16> to vector<32x32xbf16>
    %cst_120 = arith.constant dense<0.000000e+00> : vector<64x32xf32>
    %162 = tpu.matmul %159, %161, %cst_120 {dimension_numbers = #tpu.dot_dimension_numbers<[1], [0], [0], [1], [0, 0, 1, 1], [], []>} : vector<64x32xbf16>, vector<32x32xbf16>, vector<64x32xf32> -> vector<64x32xf32>
    %163 = arith.addf %157, %162 : vector<64x32xf32>
    %c25_121 = arith.constant 25 : index
    %c0_122 = arith.constant 0 : index
    %164 = vector.load %arg12[%c25_121, %c0_122] : memref<96x32xf32, #tpu.memory_space<vmem>>, vector<64x32xf32>
    %165 = vector.broadcast %24 : vector<64x1xf32> to vector<64x32xf32>
    %166 = arith.mulf %164, %165 : vector<64x32xf32>
    %167 = arith.truncf %166 : vector<64x32xf32> to vector<64x32xbf16>
    %c1_123 = arith.constant 1 : index
    %c8_124 = arith.constant 8 : index
    %c0_125 = arith.constant 0 : index
    %c0_126 = arith.constant 0 : index
    %168 = vector.load %arg2[%c1_123, %c8_124, %c0_125, %c0_126] : memref<5x9x32x32xbf16, #tpu.memory_space<vmem>>, vector<1x1x32x32xbf16>
    %169 = vector.shape_cast %168 : vector<1x1x32x32xbf16> to vector<32x32xbf16>
    %cst_127 = arith.constant dense<0.000000e+00> : vector<64x32xf32>
    %170 = tpu.matmul %167, %169, %cst_127 {dimension_numbers = #tpu.dot_dimension_numbers<[1], [0], [0], [1], [0, 0, 1, 1], [], []>} : vector<64x32xbf16>, vector<32x32xbf16>, vector<64x32xf32> -> vector<64x32xf32>
    %171 = arith.addf %163, %170 : vector<64x32xf32>
    %c1_128 = arith.constant 1 : index
    %c0_129 = arith.constant 0 : index
    %c0_130 = arith.constant 0 : index
    %172 = vector.load %arg3[%c1_128, %c0_129, %c0_130] : memref<5x1x32xf32, #tpu.memory_space<vmem>>, vector<1x1x32xf32>
    %173 = vector.shape_cast %172 : vector<1x1x32xf32> to vector<1x32xf32>
    %174 = vector.broadcast %173 : vector<1x32xf32> to vector<64x32xf32>
    %175 = arith.addf %171, %174 : vector<64x32xf32>
    %cst_131 = arith.constant 0.000000e+00 : f32
    %176 = vector.broadcast %cst_131 : f32 to vector<64x32xf32>
    %177 = arith.maximumf %175, %176 : vector<64x32xf32>
    %c16_132 = arith.constant 16 : index
    %c0_133 = arith.constant 0 : index
    %178 = vector.load %arg13[%c16_132, %c0_133] : memref<96x32xf32, #tpu.memory_space<vmem>>, vector<64x32xf32>
    tpu.vector_store %arg13[%c16_132, %c0_133], %177 {strides = array<i32>} : memref<96x32xf32, #tpu.memory_space<vmem>>, vector<64x32xf32>,
    %cst_134 = arith.constant 0.000000e+00 : f32
    %179 = vector.broadcast %cst_134 : f32 to vector<64x32xf32>
    %c7_135 = arith.constant 7 : index
    %c0_136 = arith.constant 0 : index
    %180 = vector.load %arg13[%c7_135, %c0_136] : memref<96x32xf32, #tpu.memory_space<vmem>>, vector<64x32xf32>
    %181 = vector.broadcast %20 : vector<64x1xf32> to vector<64x32xf32>
    %182 = arith.mulf %180, %181 : vector<64x32xf32>
    %183 = arith.truncf %182 : vector<64x32xf32> to vector<64x32xbf16>
    %c2_137 = arith.constant 2 : index
    %c0_138 = arith.constant 0 : index
    %c0_139 = arith.constant 0 : index
    %c0_140 = arith.constant 0 : index
    %184 = vector.load %arg2[%c2_137, %c0_138, %c0_139, %c0_140] : memref<5x9x32x32xbf16, #tpu.memory_space<vmem>>, vector<1x1x32x32xbf16>
    %185 = vector.shape_cast %184 : vector<1x1x32x32xbf16> to vector<32x32xbf16>
    %cst_141 = arith.constant dense<0.000000e+00> : vector<64x32xf32>
    %186 = tpu.matmul %183, %185, %cst_141 {dimension_numbers = #tpu.dot_dimension_numbers<[1], [0], [0], [1], [0, 0, 1, 1], [], []>} : vector<64x32xbf16>, vector<32x32xbf16>, vector<64x32xf32> -> vector<64x32xf32>
    %187 = arith.addf %179, %186 : vector<64x32xf32>
    %c8_142 = arith.constant 8 : index
    %c0_143 = arith.constant 0 : index
    %188 = vector.load %arg13[%c8_142, %c0_143] : memref<96x32xf32, #tpu.memory_space<vmem>>, vector<64x32xf32>
    %189 = arith.truncf %188 : vector<64x32xf32> to vector<64x32xbf16>
    %c2_144 = arith.constant 2 : index
    %c1_145 = arith.constant 1 : index
    %c0_146 = arith.constant 0 : index
    %c0_147 = arith.constant 0 : index
    %190 = vector.load %arg2[%c2_144, %c1_145, %c0_146, %c0_147] : memref<5x9x32x32xbf16, #tpu.memory_space<vmem>>, vector<1x1x32x32xbf16>
    %191 = vector.shape_cast %190 : vector<1x1x32x32xbf16> to vector<32x32xbf16>
    %cst_148 = arith.constant dense<0.000000e+00> : vector<64x32xf32>
    %192 = tpu.matmul %189, %191, %cst_148 {dimension_numbers = #tpu.dot_dimension_numbers<[1], [0], [0], [1], [0, 0, 1, 1], [], []>} : vector<64x32xbf16>, vector<32x32xbf16>, vector<64x32xf32> -> vector<64x32xf32>
    %193 = arith.addf %187, %192 : vector<64x32xf32>
    %c9_149 = arith.constant 9 : index
    %c0_150 = arith.constant 0 : index
    %194 = vector.load %arg13[%c9_149, %c0_150] : memref<96x32xf32, #tpu.memory_space<vmem>>, vector<64x32xf32>
    %195 = vector.broadcast %24 : vector<64x1xf32> to vector<64x32xf32>
    %196 = arith.mulf %194, %195 : vector<64x32xf32>
    %197 = arith.truncf %196 : vector<64x32xf32> to vector<64x32xbf16>
    %c2_151 = arith.constant 2 : index
    %c2_152 = arith.constant 2 : index
    %c0_153 = arith.constant 0 : index
    %c0_154 = arith.constant 0 : index
    %198 = vector.load %arg2[%c2_151, %c2_152, %c0_153, %c0_154] : memref<5x9x32x32xbf16, #tpu.memory_space<vmem>>, vector<1x1x32x32xbf16>
    %199 = vector.shape_cast %198 : vector<1x1x32x32xbf16> to vector<32x32xbf16>
    %cst_155 = arith.constant dense<0.000000e+00> : vector<64x32xf32>
    %200 = tpu.matmul %197, %199, %cst_155 {dimension_numbers = #tpu.dot_dimension_numbers<[1], [0], [0], [1], [0, 0, 1, 1], [], []>} : vector<64x32xbf16>, vector<32x32xbf16>, vector<64x32xf32> -> vector<64x32xf32>
    %201 = arith.addf %193, %200 : vector<64x32xf32>
    %c15_156 = arith.constant 15 : index
    %c0_157 = arith.constant 0 : index
    %202 = vector.load %arg13[%c15_156, %c0_157] : memref<96x32xf32, #tpu.memory_space<vmem>>, vector<64x32xf32>
    %203 = vector.broadcast %20 : vector<64x1xf32> to vector<64x32xf32>
    %204 = arith.mulf %202, %203 : vector<64x32xf32>
    %205 = arith.truncf %204 : vector<64x32xf32> to vector<64x32xbf16>
    %c2_158 = arith.constant 2 : index
    %c3_159 = arith.constant 3 : index
    %c0_160 = arith.constant 0 : index
    %c0_161 = arith.constant 0 : index
    %206 = vector.load %arg2[%c2_158, %c3_159, %c0_160, %c0_161] : memref<5x9x32x32xbf16, #tpu.memory_space<vmem>>, vector<1x1x32x32xbf16>
    %207 = vector.shape_cast %206 : vector<1x1x32x32xbf16> to vector<32x32xbf16>
    %cst_162 = arith.constant dense<0.000000e+00> : vector<64x32xf32>
    %208 = tpu.matmul %205, %207, %cst_162 {dimension_numbers = #tpu.dot_dimension_numbers<[1], [0], [0], [1], [0, 0, 1, 1], [], []>} : vector<64x32xbf16>, vector<32x32xbf16>, vector<64x32xf32> -> vector<64x32xf32>
    %209 = arith.addf %201, %208 : vector<64x32xf32>
    %c16_163 = arith.constant 16 : index
    %c0_164 = arith.constant 0 : index
    %210 = vector.load %arg13[%c16_163, %c0_164] : memref<96x32xf32, #tpu.memory_space<vmem>>, vector<64x32xf32>
    %211 = arith.truncf %210 : vector<64x32xf32> to vector<64x32xbf16>
    %c2_165 = arith.constant 2 : index
    %c4_166 = arith.constant 4 : index
    %c0_167 = arith.constant 0 : index
    %c0_168 = arith.constant 0 : index
    %212 = vector.load %arg2[%c2_165, %c4_166, %c0_167, %c0_168] : memref<5x9x32x32xbf16, #tpu.memory_space<vmem>>, vector<1x1x32x32xbf16>
    %213 = vector.shape_cast %212 : vector<1x1x32x32xbf16> to vector<32x32xbf16>
    %cst_169 = arith.constant dense<0.000000e+00> : vector<64x32xf32>
    %214 = tpu.matmul %211, %213, %cst_169 {dimension_numbers = #tpu.dot_dimension_numbers<[1], [0], [0], [1], [0, 0, 1, 1], [], []>} : vector<64x32xbf16>, vector<32x32xbf16>, vector<64x32xf32> -> vector<64x32xf32>
    %215 = arith.addf %209, %214 : vector<64x32xf32>
    %c17_170 = arith.constant 17 : index
    %c0_171 = arith.constant 0 : index
    %216 = vector.load %arg13[%c17_170, %c0_171] : memref<96x32xf32, #tpu.memory_space<vmem>>, vector<64x32xf32>
    %217 = vector.broadcast %24 : vector<64x1xf32> to vector<64x32xf32>
    %218 = arith.mulf %216, %217 : vector<64x32xf32>
    %219 = arith.truncf %218 : vector<64x32xf32> to vector<64x32xbf16>
    %c2_172 = arith.constant 2 : index
    %c5_173 = arith.constant 5 : index
    %c0_174 = arith.constant 0 : index
    %c0_175 = arith.constant 0 : index
    %220 = vector.load %arg2[%c2_172, %c5_173, %c0_174, %c0_175] : memref<5x9x32x32xbf16, #tpu.memory_space<vmem>>, vector<1x1x32x32xbf16>
    %221 = vector.shape_cast %220 : vector<1x1x32x32xbf16> to vector<32x32xbf16>
    %cst_176 = arith.constant dense<0.000000e+00> : vector<64x32xf32>
    %222 = tpu.matmul %219, %221, %cst_176 {dimension_numbers = #tpu.dot_dimension_numbers<[1], [0], [0], [1], [0, 0, 1, 1], [], []>} : vector<64x32xbf16>, vector<32x32xbf16>, vector<64x32xf32> -> vector<64x32xf32>
    %223 = arith.addf %215, %222 : vector<64x32xf32>
    %c23_177 = arith.constant 23 : index
    %c0_178 = arith.constant 0 : index
    %224 = vector.load %arg13[%c23_177, %c0_178] : memref<96x32xf32, #tpu.memory_space<vmem>>, vector<64x32xf32>
    %225 = vector.broadcast %20 : vector<64x1xf32> to vector<64x32xf32>
    %226 = arith.mulf %224, %225 : vector<64x32xf32>
    %227 = arith.truncf %226 : vector<64x32xf32> to vector<64x32xbf16>
    %c2_179 = arith.constant 2 : index
    %c6_180 = arith.constant 6 : index
    %c0_181 = arith.constant 0 : index
    %c0_182 = arith.constant 0 : index
    %228 = vector.load %arg2[%c2_179, %c6_180, %c0_181, %c0_182] : memref<5x9x32x32xbf16, #tpu.memory_space<vmem>>, vector<1x1x32x32xbf16>
    %229 = vector.shape_cast %228 : vector<1x1x32x32xbf16> to vector<32x32xbf16>
    %cst_183 = arith.constant dense<0.000000e+00> : vector<64x32xf32>
    %230 = tpu.matmul %227, %229, %cst_183 {dimension_numbers = #tpu.dot_dimension_numbers<[1], [0], [0], [1], [0, 0, 1, 1], [], []>} : vector<64x32xbf16>, vector<32x32xbf16>, vector<64x32xf32> -> vector<64x32xf32>
    %231 = arith.addf %223, %230 : vector<64x32xf32>
    %c24_184 = arith.constant 24 : index
    %c0_185 = arith.constant 0 : index
    %232 = vector.load %arg13[%c24_184, %c0_185] : memref<96x32xf32, #tpu.memory_space<vmem>>, vector<64x32xf32>
    %233 = arith.truncf %232 : vector<64x32xf32> to vector<64x32xbf16>
    %c2_186 = arith.constant 2 : index
    %c7_187 = arith.constant 7 : index
    %c0_188 = arith.constant 0 : index
    %c0_189 = arith.constant 0 : index
    %234 = vector.load %arg2[%c2_186, %c7_187, %c0_188, %c0_189] : memref<5x9x32x32xbf16, #tpu.memory_space<vmem>>, vector<1x1x32x32xbf16>
    %235 = vector.shape_cast %234 : vector<1x1x32x32xbf16> to vector<32x32xbf16>
    %cst_190 = arith.constant dense<0.000000e+00> : vector<64x32xf32>
    %236 = tpu.matmul %233, %235, %cst_190 {dimension_numbers = #tpu.dot_dimension_numbers<[1], [0], [0], [1], [0, 0, 1, 1], [], []>} : vector<64x32xbf16>, vector<32x32xbf16>, vector<64x32xf32> -> vector<64x32xf32>
    %237 = arith.addf %231, %236 : vector<64x32xf32>
    %c25_191 = arith.constant 25 : index
    %c0_192 = arith.constant 0 : index
    %238 = vector.load %arg13[%c25_191, %c0_192] : memref<96x32xf32, #tpu.memory_space<vmem>>, vector<64x32xf32>
    %239 = vector.broadcast %24 : vector<64x1xf32> to vector<64x32xf32>
    %240 = arith.mulf %238, %239 : vector<64x32xf32>
    %241 = arith.truncf %240 : vector<64x32xf32> to vector<64x32xbf16>
    %c2_193 = arith.constant 2 : index
    %c8_194 = arith.constant 8 : index
    %c0_195 = arith.constant 0 : index
    %c0_196 = arith.constant 0 : index
    %242 = vector.load %arg2[%c2_193, %c8_194, %c0_195, %c0_196] : memref<5x9x32x32xbf16, #tpu.memory_space<vmem>>, vector<1x1x32x32xbf16>
    %243 = vector.shape_cast %242 : vector<1x1x32x32xbf16> to vector<32x32xbf16>
    %cst_197 = arith.constant dense<0.000000e+00> : vector<64x32xf32>
    %244 = tpu.matmul %241, %243, %cst_197 {dimension_numbers = #tpu.dot_dimension_numbers<[1], [0], [0], [1], [0, 0, 1, 1], [], []>} : vector<64x32xbf16>, vector<32x32xbf16>, vector<64x32xf32> -> vector<64x32xf32>
    %245 = arith.addf %237, %244 : vector<64x32xf32>
    %c2_198 = arith.constant 2 : index
    %c0_199 = arith.constant 0 : index
    %c0_200 = arith.constant 0 : index
    %246 = vector.load %arg3[%c2_198, %c0_199, %c0_200] : memref<5x1x32xf32, #tpu.memory_space<vmem>>, vector<1x1x32xf32>
    %247 = vector.shape_cast %246 : vector<1x1x32xf32> to vector<1x32xf32>
    %248 = vector.broadcast %247 : vector<1x32xf32> to vector<64x32xf32>
    %249 = arith.addf %245, %248 : vector<64x32xf32>
    %cst_201 = arith.constant 0.000000e+00 : f32
    %250 = vector.broadcast %cst_201 : f32 to vector<64x32xf32>
    %251 = arith.maximumf %249, %250 : vector<64x32xf32>
    %c16_202 = arith.constant 16 : index
    %c0_203 = arith.constant 0 : index
    %252 = vector.load %arg12[%c16_202, %c0_203] : memref<96x32xf32, #tpu.memory_space<vmem>>, vector<64x32xf32>
    %253 = arith.addf %251, %252 : vector<64x32xf32>
    %c16_204 = arith.constant 16 : index
    %c0_205 = arith.constant 0 : index
    %254 = vector.load %arg12[%c16_204, %c0_205] : memref<96x32xf32, #tpu.memory_space<vmem>>, vector<64x32xf32>
    tpu.vector_store %arg12[%c16_204, %c0_205], %253 {strides = array<i32>} : memref<96x32xf32, #tpu.memory_space<vmem>>, vector<64x32xf32>,
    %cst_206 = arith.constant 0.000000e+00 : f32
    %255 = vector.broadcast %cst_206 : f32 to vector<64x32xf32>
    %c7_207 = arith.constant 7 : index
    %c0_208 = arith.constant 0 : index
    %256 = vector.load %arg12[%c7_207, %c0_208] : memref<96x32xf32, #tpu.memory_space<vmem>>, vector<64x32xf32>
    %257 = vector.broadcast %20 : vector<64x1xf32> to vector<64x32xf32>
    %258 = arith.mulf %256, %257 : vector<64x32xf32>
    %259 = arith.truncf %258 : vector<64x32xf32> to vector<64x32xbf16>
    %c3_209 = arith.constant 3 : index
    %c0_210 = arith.constant 0 : index
    %c0_211 = arith.constant 0 : index
    %c0_212 = arith.constant 0 : index
    %260 = vector.load %arg2[%c3_209, %c0_210, %c0_211, %c0_212] : memref<5x9x32x32xbf16, #tpu.memory_space<vmem>>, vector<1x1x32x32xbf16>
    %261 = vector.shape_cast %260 : vector<1x1x32x32xbf16> to vector<32x32xbf16>
    %cst_213 = arith.constant dense<0.000000e+00> : vector<64x32xf32>
    %262 = tpu.matmul %259, %261, %cst_213 {dimension_numbers = #tpu.dot_dimension_numbers<[1], [0], [0], [1], [0, 0, 1, 1], [], []>} : vector<64x32xbf16>, vector<32x32xbf16>, vector<64x32xf32> -> vector<64x32xf32>
    %263 = arith.addf %255, %262 : vector<64x32xf32>
    %c8_214 = arith.constant 8 : index
    %c0_215 = arith.constant 0 : index
    %264 = vector.load %arg12[%c8_214, %c0_215] : memref<96x32xf32, #tpu.memory_space<vmem>>, vector<64x32xf32>
    %265 = arith.truncf %264 : vector<64x32xf32> to vector<64x32xbf16>
    %c3_216 = arith.constant 3 : index
    %c1_217 = arith.constant 1 : index
    %c0_218 = arith.constant 0 : index
    %c0_219 = arith.constant 0 : index
    %266 = vector.load %arg2[%c3_216, %c1_217, %c0_218, %c0_219] : memref<5x9x32x32xbf16, #tpu.memory_space<vmem>>, vector<1x1x32x32xbf16>
    %267 = vector.shape_cast %266 : vector<1x1x32x32xbf16> to vector<32x32xbf16>
    %cst_220 = arith.constant dense<0.000000e+00> : vector<64x32xf32>
    %268 = tpu.matmul %265, %267, %cst_220 {dimension_numbers = #tpu.dot_dimension_numbers<[1], [0], [0], [1], [0, 0, 1, 1], [], []>} : vector<64x32xbf16>, vector<32x32xbf16>, vector<64x32xf32> -> vector<64x32xf32>
    %269 = arith.addf %263, %268 : vector<64x32xf32>
    %c9_221 = arith.constant 9 : index
    %c0_222 = arith.constant 0 : index
    %270 = vector.load %arg12[%c9_221, %c0_222] : memref<96x32xf32, #tpu.memory_space<vmem>>, vector<64x32xf32>
    %271 = vector.broadcast %24 : vector<64x1xf32> to vector<64x32xf32>
    %272 = arith.mulf %270, %271 : vector<64x32xf32>
    %273 = arith.truncf %272 : vector<64x32xf32> to vector<64x32xbf16>
    %c3_223 = arith.constant 3 : index
    %c2_224 = arith.constant 2 : index
    %c0_225 = arith.constant 0 : index
    %c0_226 = arith.constant 0 : index
    %274 = vector.load %arg2[%c3_223, %c2_224, %c0_225, %c0_226] : memref<5x9x32x32xbf16, #tpu.memory_space<vmem>>, vector<1x1x32x32xbf16>
    %275 = vector.shape_cast %274 : vector<1x1x32x32xbf16> to vector<32x32xbf16>
    %cst_227 = arith.constant dense<0.000000e+00> : vector<64x32xf32>
    %276 = tpu.matmul %273, %275, %cst_227 {dimension_numbers = #tpu.dot_dimension_numbers<[1], [0], [0], [1], [0, 0, 1, 1], [], []>} : vector<64x32xbf16>, vector<32x32xbf16>, vector<64x32xf32> -> vector<64x32xf32>
    %277 = arith.addf %269, %276 : vector<64x32xf32>
    %c15_228 = arith.constant 15 : index
    %c0_229 = arith.constant 0 : index
    %278 = vector.load %arg12[%c15_228, %c0_229] : memref<96x32xf32, #tpu.memory_space<vmem>>, vector<64x32xf32>
    %279 = vector.broadcast %20 : vector<64x1xf32> to vector<64x32xf32>
    %280 = arith.mulf %278, %279 : vector<64x32xf32>
    %281 = arith.truncf %280 : vector<64x32xf32> to vector<64x32xbf16>
    %c3_230 = arith.constant 3 : index
    %c3_231 = arith.constant 3 : index
    %c0_232 = arith.constant 0 : index
    %c0_233 = arith.constant 0 : index
    %282 = vector.load %arg2[%c3_230, %c3_231, %c0_232, %c0_233] : memref<5x9x32x32xbf16, #tpu.memory_space<vmem>>, vector<1x1x32x32xbf16>
    %283 = vector.shape_cast %282 : vector<1x1x32x32xbf16> to vector<32x32xbf16>
    %cst_234 = arith.constant dense<0.000000e+00> : vector<64x32xf32>
    %284 = tpu.matmul %281, %283, %cst_234 {dimension_numbers = #tpu.dot_dimension_numbers<[1], [0], [0], [1], [0, 0, 1, 1], [], []>} : vector<64x32xbf16>, vector<32x32xbf16>, vector<64x32xf32> -> vector<64x32xf32>
    %285 = arith.addf %277, %284 : vector<64x32xf32>
    %c16_235 = arith.constant 16 : index
    %c0_236 = arith.constant 0 : index
    %286 = vector.load %arg12[%c16_235, %c0_236] : memref<96x32xf32, #tpu.memory_space<vmem>>, vector<64x32xf32>
    %287 = arith.truncf %286 : vector<64x32xf32> to vector<64x32xbf16>
    %c3_237 = arith.constant 3 : index
    %c4_238 = arith.constant 4 : index
    %c0_239 = arith.constant 0 : index
    %c0_240 = arith.constant 0 : index
    %288 = vector.load %arg2[%c3_237, %c4_238, %c0_239, %c0_240] : memref<5x9x32x32xbf16, #tpu.memory_space<vmem>>, vector<1x1x32x32xbf16>
    %289 = vector.shape_cast %288 : vector<1x1x32x32xbf16> to vector<32x32xbf16>
    %cst_241 = arith.constant dense<0.000000e+00> : vector<64x32xf32>
    %290 = tpu.matmul %287, %289, %cst_241 {dimension_numbers = #tpu.dot_dimension_numbers<[1], [0], [0], [1], [0, 0, 1, 1], [], []>} : vector<64x32xbf16>, vector<32x32xbf16>, vector<64x32xf32> -> vector<64x32xf32>
    %291 = arith.addf %285, %290 : vector<64x32xf32>
    %c17_242 = arith.constant 17 : index
    %c0_243 = arith.constant 0 : index
    %292 = vector.load %arg12[%c17_242, %c0_243] : memref<96x32xf32, #tpu.memory_space<vmem>>, vector<64x32xf32>
    %293 = vector.broadcast %24 : vector<64x1xf32> to vector<64x32xf32>
    %294 = arith.mulf %292, %293 : vector<64x32xf32>
    %295 = arith.truncf %294 : vector<64x32xf32> to vector<64x32xbf16>
    %c3_244 = arith.constant 3 : index
    %c5_245 = arith.constant 5 : index
    %c0_246 = arith.constant 0 : index
    %c0_247 = arith.constant 0 : index
    %296 = vector.load %arg2[%c3_244, %c5_245, %c0_246, %c0_247] : memref<5x9x32x32xbf16, #tpu.memory_space<vmem>>, vector<1x1x32x32xbf16>
    %297 = vector.shape_cast %296 : vector<1x1x32x32xbf16> to vector<32x32xbf16>
    %cst_248 = arith.constant dense<0.000000e+00> : vector<64x32xf32>
    %298 = tpu.matmul %295, %297, %cst_248 {dimension_numbers = #tpu.dot_dimension_numbers<[1], [0], [0], [1], [0, 0, 1, 1], [], []>} : vector<64x32xbf16>, vector<32x32xbf16>, vector<64x32xf32> -> vector<64x32xf32>
    %299 = arith.addf %291, %298 : vector<64x32xf32>
    %c23_249 = arith.constant 23 : index
    %c0_250 = arith.constant 0 : index
    %300 = vector.load %arg12[%c23_249, %c0_250] : memref<96x32xf32, #tpu.memory_space<vmem>>, vector<64x32xf32>
    %301 = vector.broadcast %20 : vector<64x1xf32> to vector<64x32xf32>
    %302 = arith.mulf %300, %301 : vector<64x32xf32>
    %303 = arith.truncf %302 : vector<64x32xf32> to vector<64x32xbf16>
    %c3_251 = arith.constant 3 : index
    %c6_252 = arith.constant 6 : index
    %c0_253 = arith.constant 0 : index
    %c0_254 = arith.constant 0 : index
    %304 = vector.load %arg2[%c3_251, %c6_252, %c0_253, %c0_254] : memref<5x9x32x32xbf16, #tpu.memory_space<vmem>>, vector<1x1x32x32xbf16>
    %305 = vector.shape_cast %304 : vector<1x1x32x32xbf16> to vector<32x32xbf16>
    %cst_255 = arith.constant dense<0.000000e+00> : vector<64x32xf32>
    %306 = tpu.matmul %303, %305, %cst_255 {dimension_numbers = #tpu.dot_dimension_numbers<[1], [0], [0], [1], [0, 0, 1, 1], [], []>} : vector<64x32xbf16>, vector<32x32xbf16>, vector<64x32xf32> -> vector<64x32xf32>
    %307 = arith.addf %299, %306 : vector<64x32xf32>
    %c24_256 = arith.constant 24 : index
    %c0_257 = arith.constant 0 : index
    %308 = vector.load %arg12[%c24_256, %c0_257] : memref<96x32xf32, #tpu.memory_space<vmem>>, vector<64x32xf32>
    %309 = arith.truncf %308 : vector<64x32xf32> to vector<64x32xbf16>
    %c3_258 = arith.constant 3 : index
    %c7_259 = arith.constant 7 : index
    %c0_260 = arith.constant 0 : index
    %c0_261 = arith.constant 0 : index
    %310 = vector.load %arg2[%c3_258, %c7_259, %c0_260, %c0_261] : memref<5x9x32x32xbf16, #tpu.memory_space<vmem>>, vector<1x1x32x32xbf16>
    %311 = vector.shape_cast %310 : vector<1x1x32x32xbf16> to vector<32x32xbf16>
    %cst_262 = arith.constant dense<0.000000e+00> : vector<64x32xf32>
    %312 = tpu.matmul %309, %311, %cst_262 {dimension_numbers = #tpu.dot_dimension_numbers<[1], [0], [0], [1], [0, 0, 1, 1], [], []>} : vector<64x32xbf16>, vector<32x32xbf16>, vector<64x32xf32> -> vector<64x32xf32>
    %313 = arith.addf %307, %312 : vector<64x32xf32>
    %c25_263 = arith.constant 25 : index
    %c0_264 = arith.constant 0 : index
    %314 = vector.load %arg12[%c25_263, %c0_264] : memref<96x32xf32, #tpu.memory_space<vmem>>, vector<64x32xf32>
    %315 = vector.broadcast %24 : vector<64x1xf32> to vector<64x32xf32>
    %316 = arith.mulf %314, %315 : vector<64x32xf32>
    %317 = arith.truncf %316 : vector<64x32xf32> to vector<64x32xbf16>
    %c3_265 = arith.constant 3 : index
    %c8_266 = arith.constant 8 : index
    %c0_267 = arith.constant 0 : index
    %c0_268 = arith.constant 0 : index
    %318 = vector.load %arg2[%c3_265, %c8_266, %c0_267, %c0_268] : memref<5x9x32x32xbf16, #tpu.memory_space<vmem>>, vector<1x1x32x32xbf16>
    %319 = vector.shape_cast %318 : vector<1x1x32x32xbf16> to vector<32x32xbf16>
    %cst_269 = arith.constant dense<0.000000e+00> : vector<64x32xf32>
    %320 = tpu.matmul %317, %319, %cst_269 {dimension_numbers = #tpu.dot_dimension_numbers<[1], [0], [0], [1], [0, 0, 1, 1], [], []>} : vector<64x32xbf16>, vector<32x32xbf16>, vector<64x32xf32> -> vector<64x32xf32>
    %321 = arith.addf %313, %320 : vector<64x32xf32>
    %c3_270 = arith.constant 3 : index
    %c0_271 = arith.constant 0 : index
    %c0_272 = arith.constant 0 : index
    %322 = vector.load %arg3[%c3_270, %c0_271, %c0_272] : memref<5x1x32xf32, #tpu.memory_space<vmem>>, vector<1x1x32xf32>
    %323 = vector.shape_cast %322 : vector<1x1x32xf32> to vector<1x32xf32>
    %324 = vector.broadcast %323 : vector<1x32xf32> to vector<64x32xf32>
    %325 = arith.addf %321, %324 : vector<64x32xf32>
    %cst_273 = arith.constant 0.000000e+00 : f32
    %326 = vector.broadcast %cst_273 : f32 to vector<64x32xf32>
    %327 = arith.maximumf %325, %326 : vector<64x32xf32>
    %c16_274 = arith.constant 16 : index
    %c0_275 = arith.constant 0 : index
    %328 = vector.load %arg13[%c16_274, %c0_275] : memref<96x32xf32, #tpu.memory_space<vmem>>, vector<64x32xf32>
    tpu.vector_store %arg13[%c16_274, %c0_275], %327 {strides = array<i32>} : memref<96x32xf32, #tpu.memory_space<vmem>>, vector<64x32xf32>,
    %cst_276 = arith.constant 0.000000e+00 : f32
    %329 = vector.broadcast %cst_276 : f32 to vector<64x32xf32>
    %c7_277 = arith.constant 7 : index
    %c0_278 = arith.constant 0 : index
    %330 = vector.load %arg13[%c7_277, %c0_278] : memref<96x32xf32, #tpu.memory_space<vmem>>, vector<64x32xf32>
    %331 = vector.broadcast %20 : vector<64x1xf32> to vector<64x32xf32>
    %332 = arith.mulf %330, %331 : vector<64x32xf32>
    %333 = arith.truncf %332 : vector<64x32xf32> to vector<64x32xbf16>
    %c4_279 = arith.constant 4 : index
    %c0_280 = arith.constant 0 : index
    %c0_281 = arith.constant 0 : index
    %c0_282 = arith.constant 0 : index
    %334 = vector.load %arg2[%c4_279, %c0_280, %c0_281, %c0_282] : memref<5x9x32x32xbf16, #tpu.memory_space<vmem>>, vector<1x1x32x32xbf16>
    %335 = vector.shape_cast %334 : vector<1x1x32x32xbf16> to vector<32x32xbf16>
    %cst_283 = arith.constant dense<0.000000e+00> : vector<64x32xf32>
    %336 = tpu.matmul %333, %335, %cst_283 {dimension_numbers = #tpu.dot_dimension_numbers<[1], [0], [0], [1], [0, 0, 1, 1], [], []>} : vector<64x32xbf16>, vector<32x32xbf16>, vector<64x32xf32> -> vector<64x32xf32>
    %337 = arith.addf %329, %336 : vector<64x32xf32>
    %c8_284 = arith.constant 8 : index
    %c0_285 = arith.constant 0 : index
    %338 = vector.load %arg13[%c8_284, %c0_285] : memref<96x32xf32, #tpu.memory_space<vmem>>, vector<64x32xf32>
    %339 = arith.truncf %338 : vector<64x32xf32> to vector<64x32xbf16>
    %c4_286 = arith.constant 4 : index
    %c1_287 = arith.constant 1 : index
    %c0_288 = arith.constant 0 : index
    %c0_289 = arith.constant 0 : index
    %340 = vector.load %arg2[%c4_286, %c1_287, %c0_288, %c0_289] : memref<5x9x32x32xbf16, #tpu.memory_space<vmem>>, vector<1x1x32x32xbf16>
    %341 = vector.shape_cast %340 : vector<1x1x32x32xbf16> to vector<32x32xbf16>
    %cst_290 = arith.constant dense<0.000000e+00> : vector<64x32xf32>
    %342 = tpu.matmul %339, %341, %cst_290 {dimension_numbers = #tpu.dot_dimension_numbers<[1], [0], [0], [1], [0, 0, 1, 1], [], []>} : vector<64x32xbf16>, vector<32x32xbf16>, vector<64x32xf32> -> vector<64x32xf32>
    %343 = arith.addf %337, %342 : vector<64x32xf32>
    %c9_291 = arith.constant 9 : index
    %c0_292 = arith.constant 0 : index
    %344 = vector.load %arg13[%c9_291, %c0_292] : memref<96x32xf32, #tpu.memory_space<vmem>>, vector<64x32xf32>
    %345 = vector.broadcast %24 : vector<64x1xf32> to vector<64x32xf32>
    %346 = arith.mulf %344, %345 : vector<64x32xf32>
    %347 = arith.truncf %346 : vector<64x32xf32> to vector<64x32xbf16>
    %c4_293 = arith.constant 4 : index
    %c2_294 = arith.constant 2 : index
    %c0_295 = arith.constant 0 : index
    %c0_296 = arith.constant 0 : index
    %348 = vector.load %arg2[%c4_293, %c2_294, %c0_295, %c0_296] : memref<5x9x32x32xbf16, #tpu.memory_space<vmem>>, vector<1x1x32x32xbf16>
    %349 = vector.shape_cast %348 : vector<1x1x32x32xbf16> to vector<32x32xbf16>
    %cst_297 = arith.constant dense<0.000000e+00> : vector<64x32xf32>
    %350 = tpu.matmul %347, %349, %cst_297 {dimension_numbers = #tpu.dot_dimension_numbers<[1], [0], [0], [1], [0, 0, 1, 1], [], []>} : vector<64x32xbf16>, vector<32x32xbf16>, vector<64x32xf32> -> vector<64x32xf32>
    %351 = arith.addf %343, %350 : vector<64x32xf32>
    %c15_298 = arith.constant 15 : index
    %c0_299 = arith.constant 0 : index
    %352 = vector.load %arg13[%c15_298, %c0_299] : memref<96x32xf32, #tpu.memory_space<vmem>>, vector<64x32xf32>
    %353 = vector.broadcast %20 : vector<64x1xf32> to vector<64x32xf32>
    %354 = arith.mulf %352, %353 : vector<64x32xf32>
    %355 = arith.truncf %354 : vector<64x32xf32> to vector<64x32xbf16>
    %c4_300 = arith.constant 4 : index
    %c3_301 = arith.constant 3 : index
    %c0_302 = arith.constant 0 : index
    %c0_303 = arith.constant 0 : index
    %356 = vector.load %arg2[%c4_300, %c3_301, %c0_302, %c0_303] : memref<5x9x32x32xbf16, #tpu.memory_space<vmem>>, vector<1x1x32x32xbf16>
    %357 = vector.shape_cast %356 : vector<1x1x32x32xbf16> to vector<32x32xbf16>
    %cst_304 = arith.constant dense<0.000000e+00> : vector<64x32xf32>
    %358 = tpu.matmul %355, %357, %cst_304 {dimension_numbers = #tpu.dot_dimension_numbers<[1], [0], [0], [1], [0, 0, 1, 1], [], []>} : vector<64x32xbf16>, vector<32x32xbf16>, vector<64x32xf32> -> vector<64x32xf32>
    %359 = arith.addf %351, %358 : vector<64x32xf32>
    %c16_305 = arith.constant 16 : index
    %c0_306 = arith.constant 0 : index
    %360 = vector.load %arg13[%c16_305, %c0_306] : memref<96x32xf32, #tpu.memory_space<vmem>>, vector<64x32xf32>
    %361 = arith.truncf %360 : vector<64x32xf32> to vector<64x32xbf16>
    %c4_307 = arith.constant 4 : index
    %c4_308 = arith.constant 4 : index
    %c0_309 = arith.constant 0 : index
    %c0_310 = arith.constant 0 : index
    %362 = vector.load %arg2[%c4_307, %c4_308, %c0_309, %c0_310] : memref<5x9x32x32xbf16, #tpu.memory_space<vmem>>, vector<1x1x32x32xbf16>
    %363 = vector.shape_cast %362 : vector<1x1x32x32xbf16> to vector<32x32xbf16>
    %cst_311 = arith.constant dense<0.000000e+00> : vector<64x32xf32>
    %364 = tpu.matmul %361, %363, %cst_311 {dimension_numbers = #tpu.dot_dimension_numbers<[1], [0], [0], [1], [0, 0, 1, 1], [], []>} : vector<64x32xbf16>, vector<32x32xbf16>, vector<64x32xf32> -> vector<64x32xf32>
    %365 = arith.addf %359, %364 : vector<64x32xf32>
    %c17_312 = arith.constant 17 : index
    %c0_313 = arith.constant 0 : index
    %366 = vector.load %arg13[%c17_312, %c0_313] : memref<96x32xf32, #tpu.memory_space<vmem>>, vector<64x32xf32>
    %367 = vector.broadcast %24 : vector<64x1xf32> to vector<64x32xf32>
    %368 = arith.mulf %366, %367 : vector<64x32xf32>
    %369 = arith.truncf %368 : vector<64x32xf32> to vector<64x32xbf16>
    %c4_314 = arith.constant 4 : index
    %c5_315 = arith.constant 5 : index
    %c0_316 = arith.constant 0 : index
    %c0_317 = arith.constant 0 : index
    %370 = vector.load %arg2[%c4_314, %c5_315, %c0_316, %c0_317] : memref<5x9x32x32xbf16, #tpu.memory_space<vmem>>, vector<1x1x32x32xbf16>
    %371 = vector.shape_cast %370 : vector<1x1x32x32xbf16> to vector<32x32xbf16>
    %cst_318 = arith.constant dense<0.000000e+00> : vector<64x32xf32>
    %372 = tpu.matmul %369, %371, %cst_318 {dimension_numbers = #tpu.dot_dimension_numbers<[1], [0], [0], [1], [0, 0, 1, 1], [], []>} : vector<64x32xbf16>, vector<32x32xbf16>, vector<64x32xf32> -> vector<64x32xf32>
    %373 = arith.addf %365, %372 : vector<64x32xf32>
    %c23_319 = arith.constant 23 : index
    %c0_320 = arith.constant 0 : index
    %374 = vector.load %arg13[%c23_319, %c0_320] : memref<96x32xf32, #tpu.memory_space<vmem>>, vector<64x32xf32>
    %375 = vector.broadcast %20 : vector<64x1xf32> to vector<64x32xf32>
    %376 = arith.mulf %374, %375 : vector<64x32xf32>
    %377 = arith.truncf %376 : vector<64x32xf32> to vector<64x32xbf16>
    %c4_321 = arith.constant 4 : index
    %c6_322 = arith.constant 6 : index
    %c0_323 = arith.constant 0 : index
    %c0_324 = arith.constant 0 : index
    %378 = vector.load %arg2[%c4_321, %c6_322, %c0_323, %c0_324] : memref<5x9x32x32xbf16, #tpu.memory_space<vmem>>, vector<1x1x32x32xbf16>
    %379 = vector.shape_cast %378 : vector<1x1x32x32xbf16> to vector<32x32xbf16>
    %cst_325 = arith.constant dense<0.000000e+00> : vector<64x32xf32>
    %380 = tpu.matmul %377, %379, %cst_325 {dimension_numbers = #tpu.dot_dimension_numbers<[1], [0], [0], [1], [0, 0, 1, 1], [], []>} : vector<64x32xbf16>, vector<32x32xbf16>, vector<64x32xf32> -> vector<64x32xf32>
    %381 = arith.addf %373, %380 : vector<64x32xf32>
    %c24_326 = arith.constant 24 : index
    %c0_327 = arith.constant 0 : index
    %382 = vector.load %arg13[%c24_326, %c0_327] : memref<96x32xf32, #tpu.memory_space<vmem>>, vector<64x32xf32>
    %383 = arith.truncf %382 : vector<64x32xf32> to vector<64x32xbf16>
    %c4_328 = arith.constant 4 : index
    %c7_329 = arith.constant 7 : index
    %c0_330 = arith.constant 0 : index
    %c0_331 = arith.constant 0 : index
    %384 = vector.load %arg2[%c4_328, %c7_329, %c0_330, %c0_331] : memref<5x9x32x32xbf16, #tpu.memory_space<vmem>>, vector<1x1x32x32xbf16>
    %385 = vector.shape_cast %384 : vector<1x1x32x32xbf16> to vector<32x32xbf16>
    %cst_332 = arith.constant dense<0.000000e+00> : vector<64x32xf32>
    %386 = tpu.matmul %383, %385, %cst_332 {dimension_numbers = #tpu.dot_dimension_numbers<[1], [0], [0], [1], [0, 0, 1, 1], [], []>} : vector<64x32xbf16>, vector<32x32xbf16>, vector<64x32xf32> -> vector<64x32xf32>
    %387 = arith.addf %381, %386 : vector<64x32xf32>
    %c25_333 = arith.constant 25 : index
    %c0_334 = arith.constant 0 : index
    %388 = vector.load %arg13[%c25_333, %c0_334] : memref<96x32xf32, #tpu.memory_space<vmem>>, vector<64x32xf32>
    %389 = vector.broadcast %24 : vector<64x1xf32> to vector<64x32xf32>
    %390 = arith.mulf %388, %389 : vector<64x32xf32>
    %391 = arith.truncf %390 : vector<64x32xf32> to vector<64x32xbf16>
    %c4_335 = arith.constant 4 : index
    %c8_336 = arith.constant 8 : index
    %c0_337 = arith.constant 0 : index
    %c0_338 = arith.constant 0 : index
    %392 = vector.load %arg2[%c4_335, %c8_336, %c0_337, %c0_338] : memref<5x9x32x32xbf16, #tpu.memory_space<vmem>>, vector<1x1x32x32xbf16>
    %393 = vector.shape_cast %392 : vector<1x1x32x32xbf16> to vector<32x32xbf16>
    %cst_339 = arith.constant dense<0.000000e+00> : vector<64x32xf32>
    %394 = tpu.matmul %391, %393, %cst_339 {dimension_numbers = #tpu.dot_dimension_numbers<[1], [0], [0], [1], [0, 0, 1, 1], [], []>} : vector<64x32xbf16>, vector<32x32xbf16>, vector<64x32xf32> -> vector<64x32xf32>
    %395 = arith.addf %387, %394 : vector<64x32xf32>
    %c4_340 = arith.constant 4 : index
    %c0_341 = arith.constant 0 : index
    %c0_342 = arith.constant 0 : index
    %396 = vector.load %arg3[%c4_340, %c0_341, %c0_342] : memref<5x1x32xf32, #tpu.memory_space<vmem>>, vector<1x1x32xf32>
    %397 = vector.shape_cast %396 : vector<1x1x32xf32> to vector<1x32xf32>
    %398 = vector.broadcast %397 : vector<1x32xf32> to vector<64x32xf32>
    %399 = arith.addf %395, %398 : vector<64x32xf32>
    %cst_343 = arith.constant 0.000000e+00 : f32
    %400 = vector.broadcast %cst_343 : f32 to vector<64x32xf32>
    %401 = arith.maximumf %399, %400 : vector<64x32xf32>
    %c16_344 = arith.constant 16 : index
    %c0_345 = arith.constant 0 : index
    %402 = vector.load %arg12[%c16_344, %c0_345] : memref<96x32xf32, #tpu.memory_space<vmem>>, vector<64x32xf32>
    %403 = arith.addf %401, %402 : vector<64x32xf32>
    %c16_346 = arith.constant 16 : index
    %c0_347 = arith.constant 0 : index
    %404 = vector.load %arg12[%c16_346, %c0_347] : memref<96x32xf32, #tpu.memory_space<vmem>>, vector<64x32xf32>
    tpu.vector_store %arg12[%c16_346, %c0_347], %403 {strides = array<i32>} : memref<96x32xf32, #tpu.memory_space<vmem>>, vector<64x32xf32>,
    %c16_348 = arith.constant 16 : index
    %c0_349 = arith.constant 0 : index
    %405 = vector.load %arg12[%c16_348, %c0_349] : memref<96x32xf32, #tpu.memory_space<vmem>>, vector<64x32xf32>
    %406 = arith.truncf %405 : vector<64x32xf32> to vector<64x32xbf16>
    %c0_350 = arith.constant 0 : index
    %c0_351 = arith.constant 0 : index
    %407 = vector.load %arg4[%c0_350, %c0_351] : memref<32x2xbf16, #tpu.memory_space<vmem>>, vector<32x2xbf16>
    %cst_352 = arith.constant dense<0.000000e+00> : vector<64x2xf32>
    %408 = tpu.matmul %406, %407, %cst_352 {dimension_numbers = #tpu.dot_dimension_numbers<[1], [0], [0], [1], [0, 0, 1, 1], [], []>} : vector<64x32xbf16>, vector<32x2xbf16>, vector<64x2xf32> -> vector<64x2xf32>
    %c0_353 = arith.constant 0 : index
    %c0_354 = arith.constant 0 : index
    %409 = vector.load %arg5[%c0_353, %c0_354] : memref<1x2xf32, #tpu.memory_space<vmem>>, vector<1x2xf32>
    %410 = vector.broadcast %409 : vector<1x2xf32> to vector<64x2xf32>
    %411 = arith.addf %408, %410 : vector<64x2xf32>
    %cst_355 = arith.constant 0.000000e+00 : f32
    %412 = vector.broadcast %cst_355 : f32 to vector<64x2xf32>
    %413 = arith.maximumf %411, %412 : vector<64x2xf32>
    %414 = vector.extract_strided_slice %413 {offsets = [0, 0], sizes = [64, 1], strides = [1, 1]} : vector<64x2xf32> to vector<64x1xf32>
    %cst_356 = arith.constant dense<0xFF800000> : vector<1xf32>
    %415 = vector.multi_reduction <maximumf>, %414, %cst_356 [0] : vector<64x1xf32> to vector<1xf32>
    %416 = vector.shape_cast %415 : vector<1xf32> to vector<1x1xf32>
    %417 = vector.broadcast %416 : vector<1x1xf32> to vector<64x1xf32>
    %418 = arith.subf %414, %417 : vector<64x1xf32>
    %419 = math.exp %418 : vector<64x1xf32>
    %cst_357 = arith.constant dense<0.000000e+00> : vector<1xf32>
    %420 = vector.multi_reduction <add>, %419, %cst_357 [0] : vector<64x1xf32> to vector<1xf32>
    %421 = vector.shape_cast %420 : vector<1xf32> to vector<1x1xf32>
    %422 = math.log %421 : vector<1x1xf32>
    %423 = vector.broadcast %422 : vector<1x1xf32> to vector<64x1xf32>
    %424 = arith.subf %418, %423 : vector<64x1xf32>
    %425 = vector.shape_cast %424 : vector<64x1xf32> to vector<1x64x1xf32>
    %c0_358 = arith.constant 0 : index
    %c0_359 = arith.constant 0 : index
    %c0_360 = arith.constant 0 : index
    %426 = vector.load %arg10[%c0_358, %c0_359, %c0_360] : memref<1x64x1xf32, #tpu.memory_space<vmem>>, vector<1x64x1xf32>
    tpu.vector_store %arg10[%c0_358, %c0_359, %c0_360], %425 {strides = array<i32>} : memref<1x64x1xf32, #tpu.memory_space<vmem>>, vector<1x64x1xf32>,
    %427 = vector.extract_strided_slice %413 {offsets = [0, 1], sizes = [64, 1], strides = [1, 1]} : vector<64x2xf32> to vector<64x1xf32>
    %c0_361 = arith.constant 0 : index
    %c0_362 = arith.constant 0 : index
    %428 = vector.load %arg6[%c0_361, %c0_362] : memref<128x64xbf16, #tpu.memory_space<vmem>>, vector<128x64xbf16>
    %429 = arith.truncf %427 : vector<64x1xf32> to vector<64x1xbf16>
    %cst_363 = arith.constant dense<0.000000e+00> : vector<128x1xf32>
    %430 = tpu.matmul %428, %429, %cst_363 {dimension_numbers = #tpu.dot_dimension_numbers<[1], [0], [0], [1], [0, 0, 1, 1], [], []>} : vector<128x64xbf16>, vector<64x1xbf16>, vector<128x1xf32> -> vector<128x1xf32>
    %c0_364 = arith.constant 0 : index
    %c0_365 = arith.constant 0 : index
    %431 = vector.load %arg7[%c0_364, %c0_365] : memref<128x1xf32, #tpu.memory_space<vmem>>, vector<128x1xf32>
    %432 = arith.addf %430, %431 : vector<128x1xf32>
    %cst_366 = arith.constant 0.000000e+00 : f32
    %433 = vector.broadcast %cst_366 : f32 to vector<128x1xf32>
    %434 = arith.maximumf %432, %433 : vector<128x1xf32>
    %c0_367 = arith.constant 0 : index
    %c0_368 = arith.constant 0 : index
    %435 = vector.load %arg8[%c0_367, %c0_368] : memref<128x1xf32, #tpu.memory_space<vmem>>, vector<128x1xf32>
    %436 = arith.mulf %434, %435 : vector<128x1xf32>
    %cst_369 = arith.constant dense<0.000000e+00> : vector<1xf32>
    %437 = vector.multi_reduction <add>, %436, %cst_369 [0] : vector<128x1xf32> to vector<1xf32>
    %438 = vector.shape_cast %437 : vector<1xf32> to vector<1x1xf32>
    %c0_370 = arith.constant 0 : index
    %c0_371 = arith.constant 0 : index
    %439 = vector.load %arg9[%c0_370, %c0_371] : memref<1x1xf32, #tpu.memory_space<vmem>>, vector<1x1xf32>
    %440 = arith.addf %438, %439 : vector<1x1xf32>
    %441 = math.tanh %440 : vector<1x1xf32>
    %442 = vector.shape_cast %441 : vector<1x1xf32> to vector<1x1x1xf32>
    %c0_372 = arith.constant 0 : index
    %c0_373 = arith.constant 0 : index
    %c0_374 = arith.constant 0 : index
    %443 = vector.load %arg11[%c0_372, %c0_373, %c0_374] : memref<1x1x1xf32, #tpu.memory_space<vmem>>, vector<1x1x1xf32>
    tpu.vector_store %arg11[%c0_372, %c0_373, %c0_374], %442 {strides = array<i32>} : memref<1x1x1xf32, #tpu.memory_space<vmem>>, vector<1x1x1xf32>,
    return
  }
  func.func @transform_0(%arg0: i32) -> (i32, i32, i32) {
    %c0_i32 = arith.constant 0 : i32
    %c0_i32_0 = arith.constant 0 : i32
    %c0_i32_1 = arith.constant 0 : i32
    return %arg0, %c0_i32, %c0_i32_0 : i32, i32, i32
  }
  func.func @transform_1(%arg0: i32) -> (i32, i32, i32, i32) {
    %c0_i32 = arith.constant 0 : i32
    %c0_i32_0 = arith.constant 0 : i32
    %c0_i32_1 = arith.constant 0 : i32
    %c0_i32_2 = arith.constant 0 : i32
    %c0_i32_3 = arith.constant 0 : i32
    return %c0_i32, %c0_i32_0, %c0_i32_1, %c0_i32_2 : i32, i32, i32, i32
  }
  func.func @transform_2(%arg0: i32) -> (i32, i32, i32) {
    %c0_i32 = arith.constant 0 : i32
    %c0_i32_0 = arith.constant 0 : i32
    %c0_i32_1 = arith.constant 0 : i32
    %c0_i32_2 = arith.constant 0 : i32
    return %c0_i32, %c0_i32_0, %c0_i32_1 : i32, i32, i32
  }
  func.func @transform_3(%arg0: i32) -> (i32, i32) {
    %c0_i32 = arith.constant 0 : i32
    %c0_i32_0 = arith.constant 0 : i32
    %c0_i32_1 = arith.constant 0 : i32
    return %c0_i32, %c0_i32_0 : i32, i32
  }
  func.func @transform_4(%arg0: i32) -> (i32, i32) {
    %c0_i32 = arith.constant 0 : i32
    %c0_i32_0 = arith.constant 0 : i32
    %c0_i32_1 = arith.constant 0 : i32
    return %c0_i32, %c0_i32_0 : i32, i32
  }
  func.func @transform_5(%arg0: i32) -> (i32, i32) {
    %c0_i32 = arith.constant 0 : i32
    %c0_i32_0 = arith.constant 0 : i32
    %c0_i32_1 = arith.constant 0 : i32
    return %c0_i32, %c0_i32_0 : i32, i32
  }
  func.func @transform_6(%arg0: i32) -> (i32, i32) {
    %c0_i32 = arith.constant 0 : i32
    %c0_i32_0 = arith.constant 0 : i32
    %c0_i32_1 = arith.constant 0 : i32
    return %c0_i32, %c0_i32_0 : i32, i32
  }
  func.func @transform_7(%arg0: i32) -> (i32, i32) {
    %c0_i32 = arith.constant 0 : i32
    %c0_i32_0 = arith.constant 0 : i32
    %c0_i32_1 = arith.constant 0 : i32
    return %c0_i32, %c0_i32_0 : i32, i32
  }
  func.func @transform_8(%arg0: i32) -> (i32, i32) {
    %c0_i32 = arith.constant 0 : i32
    %c0_i32_0 = arith.constant 0 : i32
    %c0_i32_1 = arith.constant 0 : i32
    return %c0_i32, %c0_i32_0 : i32, i32
  }
  func.func @transform_9(%arg0: i32) -> (i32, i32, i32) {
    %c0_i32 = arith.constant 0 : i32
    %c0_i32_0 = arith.constant 0 : i32
    %c0_i32_1 = arith.constant 0 : i32
    return %arg0, %c0_i32, %c0_i32_0 : i32, i32, i32
  }
  func.func @transform_10(%arg0: i32) -> (i32, i32, i32) {
    %c0_i32 = arith.constant 0 : i32
    %c0_i32_0 = arith.constant 0 : i32
    %c0_i32_1 = arith.constant 0 : i32
    return %arg0, %c0_i32, %c0_i32_0 : i32, i32, i32
  }
}

</mosaic_0001>

<bundles_post_ra>
// kernel: policy_value_net_forward.1
= control target key start
LH: loop header
LB: loop body
LE: loop exit
PB: predicated region body
PF: predicated region fallthrough
CT: control target
= control target key end

     0   :  { %s8532_s15 = smov 0   ;;  %s10238_s0 = inlined_call_operand.vmem [shape: f32[2,64,32], index: 0, kind: input, shape index: {}]   ;;  %s10239_s1 = inlined_call_operand.vmem [shape: bf16[5,9,32,32], index: 1, kind: input, shape index: {}]   ;;  %s10240_s2 = inlined_call_operand.vmem [shape: f32[5,1,32], index: 2, kind: input, shape index: {}]   ;;  %s10241_s3 = inlined_call_operand.vmem [shape: bf16[32,2], index: 3, kind: input, shape index: {}]   ;;  %s10242_s4 = inlined_call_operand.vmem [shape: f32[1,2], index: 4, kind: input, shape index: {}]   ;;  %s10243_s5 = inlined_call_operand.vmem [shape: bf16[128,64], index: 5, kind: input, shape index: {}]   ;;  %s10244_s6 = inlined_call_operand.vmem [shape: f32[128,1], index: 6, kind: input, shape index: {}]   ;;  %s10245_s7 = inlined_call_operand.vmem [shape: f32[128,1], index: 7, kind: input, shape index: {}]   ;;  %s10246_s8 = inlined_call_operand.<no memory space> [shape: f32[1,1], index: 8, kind: input, shape index: {}]   ;;  %s10247_s9 = inlined_call_operand.vmem [shape: f32[2,64,1], index: 9, kind: output, shape index: {0}]   ;;  %s10248_s10 = inlined_call_operand.vmem [shape: f32[2,1,1], index: 10, kind: output, shape index: {1}]  }
   0x1   :  { %v16_v0 = vstv %s10246_s8 }
   0x2   :  { %17 = vst [vmem:[#allocation4] sm:$0x1] %v16_v0 }
   0x3 LB: > { %s8538_s16 = sadd.s32 4294967295, %s8469_s15   ;;  %p6644_p0 = scmp.ge.s32.totalorder %s8469_s15, 1  ;;  %s8469_s15 = sphi %s8532_s15, %s23_s15  }
   0x4   : > { %p317_p1 = scmp.lt.s32.totalorder %s8469_s15, 3 }
   0x6   : > { %p318_p2 = pnand %p6644_p0, %p317_p1 }
   0x8   : > { %321 = sbr.rel (%p318_p2) target bundleno = 2432 (0x980), region = 56 }
   0xf   : > { %p358_p3 = scmp.lt.s32.totalorder %s8538_s16, 1  ;;  %v372_v1 = vlaneseq  ;;  %v8471_v18 = vmov 0.0   ;;  %p6665_p4 = scmp.ne.s32.totalorder %s8538_s16, 0 }
  0x10   : > { %v8472_v35 = vmov (!%p6665_p4), 0.0  }
  0x11   : > { %s8544_s8 = scalar_select %p358_p3, %s8538_s16, 1  ;;  %v373_v2 = vshrl.u32 %v372_v1, 7 }
  0x13   : > { %s7146_s17 = sshll.u32 %s8544_s8, 6  ;;  %s370_s20 = scalar_lea.vmem %s10248_s10, %s8544_s8  ;;  %v374_v3 = vadd.s32 8, %v373_v2  ;;  %v375_v4 = vadd.s32 16, %v373_v2  ;;  %v376_v5 = vadd.s32 24, %v373_v2  ;;  %v377_v6 = vadd.s32 32, %v373_v2 }
  0x14   : > { %s8554_s23 = scalar_lea.vmem %s10238_s0, %s7146_s17  ;;  %s8559_s26 = scalar_lea.vmem %s10247_s9, %s7146_s17  ;;  %v378_v7 = vadd.s32 40, %v373_v2  ;;  %v379_v8 = vadd.s32 48, %v373_v2  ;;  %v380_v9 = vadd.s32 56, %v373_v2  ;;  %v385_v10 = vand.u32 7, %v373_v2 }
  0x15   : > { %v392_v11 = vand.u32 7, %v374_v3  ;;  %v399_v12 = vand.u32 7, %v375_v4  ;;  %v406_v13 = vand.u32 7, %v376_v5  ;;  %v413_v14 = vand.u32 7, %v377_v6 }
  0x16   : > { %v420_v15 = vand.u32 7, %v378_v7  ;;  %v427_v16 = vand.u32 7, %v379_v8  ;;  %v434_v17 = vand.u32 7, %v380_v9  ;;  %vm477_vm0 = vcmp.ge.s32.totalorder %v385_v10, 1 }
  0x17   : > { %vm478_vm1 = vcmp.ge.s32.totalorder %v392_v11, 1  ;;  %vm479_vm2 = vcmp.ge.s32.totalorder %v399_v12, 1  ;;  %vm480_vm3 = vcmp.ge.s32.totalorder %v406_v13, 1  ;;  %vm481_vm4 = vcmp.ge.s32.totalorder %v413_v14, 1 }
  0x18   : > { %vm482_vm5 = vcmp.ge.s32.totalorder %v420_v15, 1  ;;  %vm483_vm6 = vcmp.ge.s32.totalorder %v427_v16, 1  ;;  %vm484_vm7 = vcmp.ge.s32.totalorder %v434_v17, 1  ;;  %v8561_v19 = vsel %vm477_vm0, 1.0, %v8471_v18  ;;  %528 = sbr.rel (%p6665_p4) target bundleno = 43 (0x2b), region = 60 }
  0x19   : > { %v8563_v20 = vsel %vm478_vm1, 1.0, %v8471_v18  ;;  %v8565_v21 = vsel %vm479_vm2, 1.0, %v8471_v18  ;;  %v8567_v22 = vsel %vm480_vm3, 1.0, %v8471_v18  ;;  %v8569_v23 = vsel %vm481_vm4, 1.0, %v8471_v18 }
  0x1a   : > { %v8571_v24 = vsel %vm482_vm5, 1.0, %v8471_v18  ;;  %v8573_v25 = vsel %vm483_vm6, 1.0, %v8471_v18  ;;  %v8575_v26 = vsel %vm484_vm7, 1.0, %v8471_v18  ;;  %vm501_vm8 = vcmp.le.s32.totalorder %v385_v10, 6 }
  0x1b   : > { %vm502_vm9 = vcmp.le.s32.totalorder %v392_v11, 6  ;;  %vm503_vm10 = vcmp.le.s32.totalorder %v399_v12, 6  ;;  %vm504_vm11 = vcmp.le.s32.totalorder %v406_v13, 6  ;;  %vm505_vm12 = vcmp.le.s32.totalorder %v413_v14, 6 }
  0x1c   : > { %vm506_vm13 = vcmp.le.s32.totalorder %v420_v15, 6  ;;  %vm507_vm14 = vcmp.le.s32.totalorder %v427_v16, 6  ;;  %vm508_vm15 = vcmp.le.s32.totalorder %v434_v17, 6  ;;  %v8577_v27 = vsel %vm501_vm8, 1.0, %v8471_v18 }
  0x1d   : > { %v8579_v28 = vsel %vm502_vm9, 1.0, %v8471_v18  ;;  %v8581_v29 = vsel %vm503_vm10, 1.0, %v8471_v18  ;;  %v8583_v30 = vsel %vm504_vm11, 1.0, %v8471_v18  ;;  %v8585_v31 = vsel %vm505_vm12, 1.0, %v8471_v18 }
  0x1e   : > { %v8587_v32 = vsel %vm506_vm13, 1.0, %v8471_v18  ;;  %v8589_v33 = vsel %vm507_vm14, 1.0, %v8471_v18  ;;  %v8591_v34 = vsel %vm508_vm15, 1.0, %v8471_v18  ;;  %vm529_vm0 = vcmask (!%p6665_p4), 261120  }
  0x1f   : > { %530 = vst.msk [vmem:[#allocation2] sm:$0xff] %vm529_vm0, %v8472_v35  ;;  %531 = vst.msk [vmem:[#allocation2 + $0x8] sm:$0xff] %vm529_vm0, %v8472_v35 }
  0x20   : > { %532 = vst.msk [vmem:[#allocation2 + $0x10] sm:$0xff] %vm529_vm0, %v8472_v35  ;;  %533 = vst.msk [vmem:[#allocation2 + $0x18] sm:$0xff] %vm529_vm0, %v8472_v35 }
  0x21   : > { %534 = vst.msk [vmem:[#allocation2 + $0x20] sm:$0xff] %vm529_vm0, %v8472_v35  ;;  %535 = vst.msk [vmem:[#allocation2 + $0x28] sm:$0xff] %vm529_vm0, %v8472_v35 }
  0x22   : > { %536 = vst.msk [vmem:[#allocation2 + $0x30] sm:$0xff] %vm529_vm0, %v8472_v35  ;;  %537 = vst.msk [vmem:[#allocation2 + $0x38] sm:$0xff] %vm529_vm0, %v8472_v35 }
  0x23   : > { %538 = vst.msk [vmem:[#allocation2 + $0x40] sm:$0xff] %vm529_vm0, %v8472_v35  ;;  %539 = vst.msk [vmem:[#allocation2 + $0x48] sm:$0xff] %vm529_vm0, %v8472_v35 }
  0x24   : > { %540 = vst.msk [vmem:[#allocation2 + $0x50] sm:$0xff] %vm529_vm0, %v8472_v35  ;;  %541 = vst.msk [vmem:[#allocation2 + $0x58] sm:$0xff] %vm529_vm0, %v8472_v35 }
  0x25   : > { %542 = vst.msk [vmem:[#allocation3] sm:$0xff] %vm529_vm0, %v8472_v35  ;;  %543 = vst.msk [vmem:[#allocation3 + $0x8] sm:$0xff] %vm529_vm0, %v8472_v35 }
  0x26   : > { %544 = vst.msk [vmem:[#allocation3 + $0x10] sm:$0xff] %vm529_vm0, %v8472_v35  ;;  %545 = vst.msk [vmem:[#allocation3 + $0x18] sm:$0xff] %vm529_vm0, %v8472_v35 }
  0x27   : > { %546 = vst.msk [vmem:[#allocation3 + $0x20] sm:$0xff] %vm529_vm0, %v8472_v35  ;;  %547 = vst.msk [vmem:[#allocation3 + $0x28] sm:$0xff] %vm529_vm0, %v8472_v35 }
  0x28   : > { %548 = vst.msk [vmem:[#allocation3 + $0x30] sm:$0xff] %vm529_vm0, %v8472_v35  ;;  %549 = vst.msk [vmem:[#allocation3 + $0x38] sm:$0xff] %vm529_vm0, %v8472_v35 }
  0x29   : > { %550 = vst.msk [vmem:[#allocation3 + $0x40] sm:$0xff] %vm529_vm0, %v8472_v35  ;;  %551 = vst.msk [vmem:[#allocation3 + $0x48] sm:$0xff] %vm529_vm0, %v8472_v35 }
  0x2a   : > { %552 = vst.msk [vmem:[#allocation3 + $0x50] sm:$0xff] %vm529_vm0, %v8472_v35  ;;  %553 = vst.msk [vmem:[#allocation3 + $0x58] sm:$0xff] %vm529_vm0, %v8472_v35 }
  0x2b PF: > { %v8343_v36 = vld [vmem:[%s10239_s1 + $0x30] sm:$0xff]   ;;  %vm562_vm1 = vcmask 261120   ;;  %v8344_v37 = vld [vmem:[%s10239_s1 + $0x38] sm:$0xff]   ;;  %v554_v38 = vld [vmem:[%s8554_s23] sm:$0xff]  ;;  %vm6171_vm2 = vcmask 7168   ;;  %s8473_s17 = smov 127  }
  0x2c   : > { %7472 = vmatprep.subr.bf16.mxu0 %v8343_v36  ;;  %v555_v39 = vld [vmem:[%s8554_s23 + $0x8] sm:$0xff]  ;;  %v556_v40 = vld [vmem:[%s8554_s23 + $0x10] sm:$0xff]  ;;  %563 = vst.msk [vmem:[#allocation2 + $0x10] sm:$0xff] %vm562_vm1, %v554_v38  ;;  %v557_v41 = vld [vmem:[%s8554_s23 + $0x18] sm:$0xff]  ;;  %vm6348_vm3 = vcmask 523264   ;;  %vm6558_vm4 = vcmask 0  }
  0x2d   : > { %7473 = vmatpush3.bf16.msra.mxu0 %v8343_v36  ;;  %564 = vst.msk [vmem:[#allocation2 + $0x18] sm:$0xff] %vm562_vm1, %v555_v39  ;;  %565 = vst.msk [vmem:[#allocation2 + $0x20] sm:$0xff] %vm562_vm1, %v556_v40  ;;  %v8345_v42 = vld [vmem:[%s10239_s1 + $0x40] sm:$0xff]   ;;  %v8346_v43 = vld [vmem:[%s10239_s1 + $0x10] sm:$0xff]  }
  0x2e   : > { %7474 = vmatprep.subr.bf16.mxu0 %v8344_v37  ;;  %566 = vst.msk [vmem:[#allocation2 + $0x28] sm:$0xff] %vm562_vm1, %v557_v41  ;;  %v558_v44 = vld [vmem:[%s8554_s23 + $0x20] sm:$0xff]  ;;  %v559_v45 = vld [vmem:[%s8554_s23 + $0x28] sm:$0xff]  ;;  %v560_v46 = vld [vmem:[%s8554_s23 + $0x30] sm:$0xff]  ;;  %7436 = vmatprep.subr.bf16.mxu1 %v8346_v43 }
  0x2f   : > { %567 = vst.msk [vmem:[#allocation2 + $0x30] sm:$0xff] %vm562_vm1, %v558_v44  ;;  %568 = vst.msk [vmem:[#allocation2 + $0x38] sm:$0xff] %vm562_vm1, %v559_v45  ;;  %v561_v47 = vld [vmem:[%s8554_s23 + $0x38] sm:$0xff]  ;;  %7437 = vmatpush3.bf16.msra.mxu1 %v8346_v43  ;;  %v8347_v9 = vld [vmem:[%s10239_s1 + $0x48] sm:$0xff]  }
  0x30   : > { %569 = vst.msk [vmem:[#allocation2 + $0x40] sm:$0xff] %vm562_vm1, %v560_v46  ;;  %570 = vst.msk [vmem:[#allocation2 + $0x48] sm:$0xff] %vm562_vm1, %v561_v47  ;;  %v8348_v48 = vld [vmem:[%s10239_s1 + $0x18] sm:$0xff]   ;;  %v8350_v12 = vld [vmem:[%s10239_s1] sm:$0xff]  }
  0x31   : > { %7475 = vmatpush3.bf16.msra.mxu0 %v8344_v37  ;;  %7438 = vmatprep.subr.bf16.mxu1 %v8348_v48  ;;  %v8349_v18 = vld [vmem:[%s10239_s1 + $0x50] sm:$0xff]   ;;  %v8352_v35 = vld [vmem:[%s10239_s1 + $0x8] sm:$0xff]  }
  0x32   : > { %7484 = vmatprep.subr.bf16.mxu0 %v8345_v42  ;;  %v8649_v49 = vld [vmem:[#allocation2 + $0x8] sm:$0xff] }
  0x33   : > { %v912_v50 = vld [vmem:[#allocation2 + $0xf] sm:$0xff]  ;;  %7439 = vmatpush3.bf16.msra.mxu1 %v8348_v48  ;;  %v571_v36 = vld [vmem:[#allocation2 + $0x7] sm:$0xff] }
  0x34   : > { %v8651_v51 = vld [vmem:[#allocation2 + $0x17] sm:$0xff]  ;;  %v8653_v52 = vld [vmem:[#allocation2 + $0x1f] sm:$0xff]  ;;  %v920_v53 = vmul.f32 %v8561_v19, %v912_v50  ;;  %7448 = vmatprep.subr.bf16.mxu1 %v8350_v12  ;;  %v580_v17 = vmul.f32 %v8563_v20, %v912_v50  ;;  %v8721_v38 = vmul.f32 %v8561_v19, %v571_v36 }
  0x35   : > { %v921_v54 = vmul.f32 %v8563_v20, %v8651_v51  ;;  %v8658_v55 = vld [vmem:[#allocation2 + $0x27] sm:$0xff]  ;;  %v922_v56 = vmul.f32 %v8565_v21, %v8653_v52  ;;  %v596_v57 = vld [vmem:[#allocation2 + $0x10] sm:$0xff]  ;;  %v597_v58 = vld [vmem:[#allocation2 + $0x18] sm:$0xff]  ;;  %v581_v43 = vmul.f32 %v8565_v21, %v8651_v51  ;;  %v582_v44 = vmul.f32 %v8567_v22, %v8653_v52 }
  0x36   : > { %v923_v59 = vmul.f32 %v8567_v22, %v8658_v55  ;;  %v603_v60 = vpack.c.bf16 %v596_v57, %v8649_v49  ;;  %v8665_v61 = vld [vmem:[#allocation2 + $0x20] sm:$0xff]  ;;  %v8667_v62 = vld [vmem:[#allocation2 + $0x28] sm:$0xff]  ;;  %v8671_v1 = vld [vmem:[#allocation2 + $0x37] sm:$0xff]  ;;  %v1042_v40 = vpack.c.bf16 %v597_v58, %v596_v57  ;;  %v587_v41 = vpack.c.bf16 %v580_v17, %v8721_v38 }
  0x37   : > { %v928_v63 = vpack.c.bf16 %v921_v54, %v920_v53  ;;  %v8669_v0 = vld [vmem:[#allocation2 + $0x2f] sm:$0xff]  ;;  %v8674_v2 = vpack.c.bf16 %v8665_v61, %v597_v58  ;;  %v925_v6 = vmul.f32 %v8571_v24, %v8671_v1  ;;  %v8682_v7 = vld [vmem:[#allocation2 + $0x3f] sm:$0xff]  ;;  %v8684_v8 = vld [vmem:[#allocation2 + $0x47] sm:$0xff]  ;;  %v583_v45 = vmul.f32 %v8569_v23, %v8658_v55 }
  0x38   : > { %v8676_v3 = vld [vmem:[#allocation2 + $0x30] sm:$0xff]  ;;  %v929_v4 = vpack.c.bf16 %v923_v59, %v922_v56  ;;  %v924_v5 = vmul.f32 %v8569_v23, %v8669_v0  ;;  %7440 = vmatprep.mubr.msk.bf16.mxu1 %vm562_vm1, %v603_v60  ;;  %v601_v11 = vld [vmem:[#allocation2 + $0x38] sm:$0xff]  ;;  %v926_v14 = vmul.f32 %v8573_v25, %v8682_v7  ;;  %v927_v15 = vmul.f32 %v8575_v26, %v8684_v8  ;;  %v8707_v16 = vld [vmem:[#allocation2 + $0x40] sm:$0xff] }
  0x39   : > { %v8692_v10 = vpack.c.bf16 %v8676_v3, %v8667_v62  ;;  %7476 = vmatprep.mubr.msk.bf16.mxu0 %vm562_vm1, %v928_v63  ;;  %7441 = vmatmul.mubr.msk.bf16.vlgmr.msra.gmra.mrb[0].mxu1 %vm562_vm1, %v8674_v2  ;;  %v8718_v37 = vpack.c.bf16 %v8707_v16, %v601_v11  ;;  %v584_v46 = vmul.f32 %v8571_v24, %v8669_v0  ;;  %v8351_v50 = vld [vmem:[%s10239_s1 + $0x58] sm:$0xff]   ;;  %v790_v57 = vld [vmem:[#allocation2 + $0x9] sm:$0xff]  ;;  %v8353_v63 = vld [vmem:[%s10239_s1 + $0x60] sm:$0xff]  }
  0x3a   : > { %7477 = vmatmul.mubr.msk.bf16.vlgmr.msra.gmra.mrb[0].mxu0 %vm562_vm1, %v929_v4  ;;  %v930_v13 = vpack.c.bf16 %v925_v6, %v924_v5  ;;  %7449 = vmatpush3.bf16.msra.mxu1 %v8350_v12  ;;  %v931_v39 = vpack.c.bf16 %v927_v15, %v926_v14  ;;  %v588_v47 = vpack.c.bf16 %v582_v44, %v581_v43  ;;  %v1148_v53 = vld [vmem:[#allocation2 + $0x11] sm:$0xff]  ;;  %v8746_v58 = vld [vmem:[#allocation2 + $0x19] sm:$0xff]  ;;  %v8356_v59 = vld [vmem:[%s10239_s1 + $0x28] sm:$0xff]  }
  0x3b   : > { %7444 = vmatprep.mubr.msk.bf16.mxu1 %vm562_vm1, %v8692_v10  ;;  %7485 = vmatpush3.bf16.msra.mxu0 %v8345_v42  ;;  %v8354_v42 = vld [vmem:[%s10239_s1 + $0x20] sm:$0xff]   ;;  %v1043_v48 = vpack.c.bf16 %v8667_v62, %v8665_v61  ;;  %v589_v54 = vpack.c.bf16 %v584_v46, %v583_v45  ;;  %v1044_v56 = vpack.c.bf16 %v601_v11, %v8676_v3  ;;  %v8751_v60 = vld [vmem:[#allocation2 + $0x48] sm:$0xff]  ;;  %v8775_v14 = vld [vmem:[#allocation2 + $0x31] sm:$0xff] }
  0x3c   : > { %7480 = vmatprep.mubr.msk.bf16.mxu0 %vm562_vm1, %v930_v13  ;;  %7486 = vmatprep.subr.bf16.mxu0 %v8347_v9  ;;  %v585_v61 = vmul.f32 %v8573_v25, %v8671_v1  ;;  %v586_v62 = vmul.f32 %v8575_v26, %v8682_v7  ;;  %v798_v3 = vmul.f32 %v8577_v27, %v790_v57  ;;  %v8771_v11 = vld [vmem:[#allocation2 + $0x29] sm:$0xff]  ;;  %v8777_v15 = vld [vmem:[#allocation2 + $0x39] sm:$0xff]  ;;  %v8799_v44 = vld [vmem:[#allocation2 + $0x41] sm:$0xff] }
  0x3d   : > { %7450 = vmatprep.subr.bf16.mxu1 %v8352_v35  ;;  %v799_v4 = vmul.f32 %v8579_v28, %v1148_v53  ;;  %v1156_v5 = vmul.f32 %v8577_v27, %v1148_v53  ;;  %v1157_v6 = vmul.f32 %v8579_v28, %v8746_v58  ;;  %v1045_v13 = vpack.c.bf16 %v8751_v60, %v8707_v16  ;;  %v8801_v45 = vld [vmem:[#allocation2 + $0x49] sm:$0xff] }
  0x3e   : > { %7451 = vmatpush3.bf16.msra.mxu1 %v8352_v35  ;;  %v590_v12 = vpack.c.bf16 %v586_v62, %v585_v61  ;;  %v800_v36 = vmul.f32 %v8581_v29, %v8746_v58  ;;  %v1161_v43 = vmul.f32 %v8587_v32, %v8777_v15  ;;  %v1162_v57 = vmul.f32 %v8589_v33, %v8799_v44  ;;  %v8357_v61 = vld [vmem:[%s10239_s1 + $0x70] sm:$0xff]  }
  0x3f   : > { %7487 = vmatpush3.bf16.msra.mxu0 %v8347_v9  ;;  %7460 = vmatprep.subr.bf16.mxu1 %v8354_v42  ;;  %v8769_v9 = vld [vmem:[#allocation2 + $0x21] sm:$0xff]  ;;  %v806_v17 = vpack.c.bf16 %v799_v4, %v798_v3  ;;  %v1278_v62 = vmul.f32 %v8561_v19, %v8651_v51  ;;  %v1279_v3 = vmul.f32 %v8563_v20, %v8653_v52 }
  0x40   : > { %7496 = vmatprep.subr.bf16.mxu0 %v8349_v18  ;;  %v1158_v35 = vmul.f32 %v8581_v29, %v8769_v9  ;;  %v801_v16 = vmul.f32 %v8583_v30, %v8769_v9  ;;  %v1282_v51 = vmul.f32 %v8569_v23, %v8671_v1  ;;  %v1283_v52 = vmul.f32 %v8571_v24, %v8682_v7  ;;  %v8359_v1 = vld [vmem:[%s10239_s1 + $0x80] sm:$0xff]  }
  0x41   : > { %7445 = vmatmul.mubr.msk.bf16.gmra.mrb[4].mxu1 %vm562_vm1, %v8718_v37 }
  0x42   : > { %7481 = vmatmul.mubr.msk.bf16.gmra.mrb[4].mxu0 %vm562_vm1, %v931_v39  ;;  %7452 = vmatprep.mubr.msk.bf16.mxu1 %vm562_vm1, %v587_v41  ;;  %v1159_v39 = vmul.f32 %v8583_v30, %v8771_v11  ;;  %v803_v41 = vmul.f32 %v8587_v32, %v8775_v14  ;;  %v807_v46 = vpack.c.bf16 %v801_v16, %v800_v36  ;;  %v8853_v36 = vld [vmem:[#allocation2 + $0x50] sm:$0xff] }
  0x43   : > { %7488 = vmatprep.mubr.msk.bf16.mxu0 %vm562_vm1, %v1042_v40  ;;  %v802_v40 = vmul.f32 %v8585_v31, %v8771_v11  ;;  %v1514_v16 = vmul.f32 %v8577_v27, %v8746_v58  ;;  %v1518_v58 = vmul.f32 %v8585_v31, %v8777_v15 }
  0x49   : > { %7453 = vmatmul.mubr.msk.bf16.vlgmr.msra.gmra.mrb[0].mxu1 %vm562_vm1, %v588_v47  ;;  %v1165_v47 = vpack.c.bf16 %v1159_v39, %v1158_v35  ;;  %v1288_v35 = vpack.c.bf16 %v1283_v52, %v1282_v51  ;;  %v1515_v39 = vmul.f32 %v8579_v28, %v8769_v9  ;;  %v1519_v9 = vmul.f32 %v8587_v32, %v8799_v44 }
  0x4a   : > { %7489 = vmatmul.mubr.msk.bf16.vlgmr.msra.gmra.mrb[0].mxu0 %vm562_vm1, %v1043_v48  ;;  %7456 = vmatprep.mubr.msk.bf16.mxu1 %vm562_vm1, %v589_v54  ;;  %v8355_v48 = vld [vmem:[%s10239_s1 + $0x68] sm:$0xff]   ;;  %v804_v54 = vmul.f32 %v8589_v33, %v8777_v15  ;;  %v8361_v15 = vld [vmem:[%s10239_s1 + $0xa0] sm:$0xff]  }
  0x4b   : > { %7497 = vmatpush3.bf16.msra.mxu0 %v8349_v18  ;;  %7492 = vmatprep.mubr.msk.bf16.mxu0 %vm562_vm1, %v1044_v56  ;;  %v1164_v18 = vpack.c.bf16 %v1157_v6, %v1156_v5  ;;  %v805_v56 = vmul.f32 %v8591_v34, %v8799_v44  ;;  %v1286_v6 = vpack.c.bf16 %v1279_v3, %v1278_v62  ;;  %v8362_v44 = vld [vmem:[%s10239_s1 + $0xa8] sm:$0xff]  }
  0x4c   : > { %7498 = vmatprep.subr.bf16.mxu0 %v8351_v50  ;;  %7461 = vmatpush3.bf16.msra.mxu1 %v8354_v42  ;;  %v1160_v42 = vmul.f32 %v8585_v31, %v8775_v14 }
  0x4d   : > { %7462 = vmatprep.subr.bf16.mxu1 %v8356_v59  ;;  %v809_v4 = vpack.c.bf16 %v805_v56, %v804_v54 }
  0x4e   : > { %v1166_v53 = vpack.c.bf16 %v1161_v43, %v1160_v42  ;;  %v1513_v42 = vld [vmem:[#allocation2 + $0x51] sm:$0xff]  ;;  %v1520_v43 = vmul.f32 %v8589_v33, %v8801_v45 }
  0x4f   : > { %7499 = vmatpush3.bf16.msra.mxu0 %v8351_v50  ;;  %v808_v50 = vpack.c.bf16 %v803_v41, %v802_v40  ;;  %v1522_v40 = vpack.c.bf16 %v1515_v39, %v1514_v16 }
  0x50   : > { %7508 = vmatprep.subr.bf16.mxu0 %v8353_v63  ;;  %7463 = vmatpush3.bf16.msra.mxu1 %v8356_v59  ;;  %v1163_v59 = vmul.f32 %v8591_v34, %v8801_v45  ;;  %v8363_v45 = vld [vmem:[%s10239_s1 + $0x90] sm:$0xff]  }
  0x51   : > { %7457 = vmatmul.mubr.msk.bf16.gmra.mrb[4].mxu1 %vm562_vm1, %v590_v12  ;;  %v1281_v12 = vmul.f32 %v8567_v22, %v8669_v0  ;;  %7544 = vmatprep.subr.bf16.mxu1 %v8361_v15 }
  0x52   : > { %7493 = vmatmul.mubr.msk.bf16.gmra.mrb[4].mxu0 %vm562_vm1, %v1045_v13  ;;  %7464 = vmatprep.mubr.msk.bf16.mxu1 %vm562_vm1, %v806_v17  ;;  %v1167_v5 = vpack.c.bf16 %v1163_v59, %v1162_v57  ;;  %v1277_v13 = vld [vmem:[#allocation2 + $0x4f] sm:$0xff] }
  0x53   : > { %7500 = vmatprep.mubr.msk.bf16.mxu0 %vm562_vm1, %v1164_v18  ;;  %v8358_v18 = vld [vmem:[%s10239_s1 + $0x78] sm:$0xff]   ;;  %v1285_v0 = vmul.f32 %v8575_v26, %v1277_v13 }
  0x59   : > { %7465 = vmatmul.mubr.msk.bf16.vlgmr.msra.gmra.mrb[0].mxu1 %vm562_vm1, %v807_v46 }
  0x5a   : > { %7501 = vmatmul.mubr.msk.bf16.vlgmr.msra.gmra.mrb[0].mxu0 %vm562_vm1, %v1165_v47  ;;  %7468 = vmatprep.mubr.msk.bf16.mxu1 %vm562_vm1, %v808_v50 }
  0x5b   : > { %7509 = vmatpush3.bf16.msra.mxu0 %v8353_v63  ;;  %7504 = vmatprep.mubr.msk.bf16.mxu0 %vm562_vm1, %v1166_v53  ;;  %v1280_v63 = vmul.f32 %v8565_v21, %v8658_v55  ;;  %v1284_v55 = vmul.f32 %v8573_v25, %v8684_v8  ;;  %v8360_v8 = vld [vmem:[%s10239_s1 + $0x88] sm:$0xff]  }
  0x5c   : > { %7510 = vmatprep.subr.bf16.mxu0 %v8355_v48  ;;  %7545 = vmatpush3.bf16.msra.mxu1 %v8361_v15 }
  0x5d   : > { %v1287_v17 = vpack.c.bf16 %v1281_v12, %v1280_v63  ;;  %v1289_v7 = vpack.c.bf16 %v1285_v0, %v1284_v55  ;;  %7546 = vmatprep.subr.bf16.mxu1 %v8362_v44 }
  0x5f   : > { %7511 = vmatpush3.bf16.msra.mxu0 %v8355_v48 }
  0x60   : > { %7520 = vmatprep.subr.bf16.mxu0 %v8357_v61  ;;  %7547 = vmatpush3.bf16.msra.mxu1 %v8362_v44 }
  0x61   : > { %7469 = vmatmul.mubr.msk.bf16.gmra.mrb[4].mxu1 %vm562_vm1, %v809_v4  ;;  %7556 = vmatprep.subr.bf16.mxu1 %v8363_v45 }
  0x62   : > { %7505 = vmatmul.mubr.msk.bf16.gmra.mrb[4].mxu0 %vm562_vm1, %v1167_v5 }
  0x63   : > { %7512 = vmatprep.mubr.msk.bf16.mxu0 %vm562_vm1, %v1286_v6 }
  0x6a   : > { %7513 = vmatmul.mubr.msk.bf16.vlgmr.msra.gmra.mrb[0].mxu0 %vm562_vm1, %v1287_v17 }
  0x6b   : > { %7521 = vmatpush3.bf16.msra.mxu0 %v8357_v61  ;;  %7516 = vmatprep.mubr.msk.bf16.mxu0 %vm562_vm1, %v1288_v35  ;;  %v6752_v61 = vld [vmem:[%s10240_s2] ss:$0 sm:$0xff] }
  0x6c   : > { %7522 = vmatprep.subr.bf16.mxu0 %v8358_v18 }
  0x6f   : > { %7523 = vmatpush3.bf16.msra.mxu0 %v8358_v18 }
  0x70   : > { %7532 = vmatprep.subr.bf16.mxu0 %v8359_v1 }
  0x72   : > { %7517 = vmatmul.mubr.msk.bf16.gmra.mrb[4].mxu0 %vm562_vm1, %v1289_v7 }
  0x73   : > { %7524 = vmatprep.mubr.msk.bf16.mxu0 %vm562_vm1, %v8674_v2  ;;  %v1403_v2 = vpack.c.bf16 %v8853_v36, %v8751_v60  ;;  %v1524_v60 = vpack.c.bf16 %v1519_v9, %v1518_v58 }
  0x7a   : > { %7525 = vmatmul.mubr.msk.bf16.vlgmr.msra.gmra.mrb[0].mxu0 %vm562_vm1, %v8692_v10  ;;  %v1516_v10 = vmul.f32 %v8581_v29, %v8771_v11  ;;  %v8879_v11 = vmul.f32 %v8591_v34, %v1513_v42 }
  0x7b   : > { %7533 = vmatpush3.bf16.msra.mxu0 %v8359_v1  ;;  %7528 = vmatprep.mubr.msk.bf16.mxu0 %vm562_vm1, %v8718_v37  ;;  %v1517_v37 = vmul.f32 %v8583_v30, %v8775_v14 }
  0x7c   : > { %7534 = vmatprep.subr.bf16.mxu0 %v8360_v8  ;;  %v1525_v14 = vpack.c.bf16 %v8879_v11, %v1520_v43 }
  0x7d   : > { %v1523_v41 = vpack.c.bf16 %v1517_v37, %v1516_v10 }
  0x7f   : > { %7535 = vmatpush3.bf16.msra.mxu0 %v8360_v8 }
  0x82   : > { %7529 = vmatmul.mubr.msk.bf16.gmra.mrb[4].mxu0 %vm562_vm1, %v1403_v2 }
  0x83   : > { %7536 = vmatprep.mubr.msk.bf16.mxu0 %vm562_vm1, %v1522_v40 }
  0x8a   : > { %7537 = vmatmul.mubr.msk.bf16.vlgmr.msra.gmra.mrb[0].mxu0 %vm562_vm1, %v1523_v41 }
  0x8b   : > { %7540 = vmatprep.mubr.msk.bf16.mxu0 %vm562_vm1, %v1524_v60 }
  0x92   : > { %7541 = vmatmul.mubr.msk.bf16.gmra.mrb[4].mxu0 %vm562_vm1, %v1525_v14 }
 0x12c   : > { %v7466_v46 = vpop.f32.mrb[0].mxu1 }
 0x12d   : > { %v873_v47 = vpop.f32.mrb[1].mxu1 }
 0x12e   : > { %v7467_v48 = vpop.f32.mrb[2].mxu1 }
 0x12f   : > { %v876_v50 = vpop.f32.mrb[3].mxu1 }
 0x134   : > { %v7470_v53 = vpop.f32.mrb[4].mxu1 }
 0x135   : > { %v889_v54 = vpop.f32.mrb[5].mxu1 }
 0x136   : > { %v7471_v56 = vpop.f32.mrb[6].mxu1 }
 0x137   : > { %v892_v57 = vpop.f32.mrb[7].mxu1 }
 0x15d   : > { %v7538_v59 = vpop.f32.mrb[0].mxu0 }
 0x15e   : > { %v8012_v62 = vadd.f32 %v7538_v59, %v7466_v46  ;;  %v1589_v3 = vpop.f32.mrb[1].mxu0 }
 0x15f   : > { %v8013_v4 = vadd.f32 %v1589_v3, %v873_v47  ;;  %v7539_v5 = vpop.f32.mrb[2].mxu0 }
 0x160   : > { %v1637_v6 = vadd.f32 %v8012_v62, %v6752_v61  ;;  %v8014_v63 = vadd.f32 %v7539_v5, %v7467_v48  ;;  %v1592_v12 = vpop.f32.mrb[3].mxu0 }
 0x161   : > { %v1635_v51 = vadd.f32 %v8013_v4, %v6752_v61  ;;  %v8015_v52 = vadd.f32 %v1592_v12, %v876_v50  ;;  %v8364_v50 = vld [vmem:[%s10239_s1 + $0x98] sm:$0xff]  }
 0x162   : > { %v1645_v13 = vmax.f32 %v1637_v6, 0.0  ;;  %v1638_v17 = vadd.f32 %v8014_v63, %v6752_v61 }
 0x163   : > { %v1643_v18 = vmax.f32 %v1635_v51, 0.0  ;;  %v1636_v35 = vadd.f32 %v8015_v52, %v6752_v61 }
 0x164   : > { %1653 = vst.msk [vmem:[#allocation2 + $0x20] sm:$0xff] %vm562_vm1, %v1645_v13  ;;  %v1646_v55 = vmax.f32 %v1638_v17, 0.0  ;;  %v8366_v17 = vld [vmem:[%s10239_s1 + $0xb8] sm:$0xff]  }
 0x165   : > { %1651 = vst.msk [vmem:[#allocation2 + $0x10] sm:$0xff] %vm562_vm1, %v1643_v18  ;;  %v1644_v0 = vmax.f32 %v1636_v35, 0.0  ;;  %v7542_v1 = vpop.f32.mrb[4].mxu0 }
 0x166   : > { %1654 = vst.msk [vmem:[#allocation2 + $0x28] sm:$0xff] %vm562_vm1, %v1646_v55  ;;  %v8016_v7 = vadd.f32 %v7542_v1, %v7470_v53  ;;  %v1605_v8 = vpop.f32.mrb[5].mxu0  ;;  %v8365_v53 = vld [vmem:[%s10239_s1 + $0xb0] sm:$0xff]  }
 0x167   : > { %1652 = vst.msk [vmem:[#allocation2 + $0x18] sm:$0xff] %vm562_vm1, %v1644_v0  ;;  %v8017_v16 = vadd.f32 %v1605_v8, %v889_v54  ;;  %v7543_v39 = vpop.f32.mrb[6].mxu0 }
 0x168   : > { %v1641_v2 = vadd.f32 %v8016_v7, %v6752_v61  ;;  %v8018_v40 = vadd.f32 %v7543_v39, %v7471_v56  ;;  %v1608_v10 = vpop.f32.mrb[7].mxu0 }
 0x169   : > { %v1639_v37 = vadd.f32 %v8017_v16, %v6752_v61  ;;  %v8019_v58 = vadd.f32 %v1608_v10, %v892_v57  ;;  %v8367_v16 = vld [vmem:[%s10239_s1 + $0xc0] sm:$0xff]  }
 0x16a   : > { %v1649_v9 = vmax.f32 %v1641_v2, 0.0  ;;  %v1642_v41 = vadd.f32 %v8018_v40, %v6752_v61 }
 0x16b   : > { %v1647_v60 = vmax.f32 %v1639_v37, 0.0  ;;  %v1640_v42 = vadd.f32 %v8019_v58, %v6752_v61  ;;  %v8909_v47 = vld [vmem:[#allocation2 + $0x20] sm:$0xff] }
 0x16c   : > { %1657 = vst.msk [vmem:[#allocation2 + $0x40] sm:$0xff] %vm562_vm1, %v1649_v9  ;;  %v1650_v43 = vmax.f32 %v1642_v41, 0.0  ;;  %v8901_v14 = vld [vmem:[#allocation2 + $0x10] sm:$0xff] }
 0x16d   : > { %1655 = vst.msk [vmem:[#allocation2 + $0x30] sm:$0xff] %vm562_vm1, %v1647_v60  ;;  %v1648_v15 = vmax.f32 %v1640_v42, 0.0  ;;  %v1692_v44 = vpack.c.bf16 %v8901_v14, %v8649_v49  ;;  %v8922_v49 = vld [vmem:[#allocation2 + $0xf] sm:$0xff]  ;;  %v8961_v51 = vld [vmem:[#allocation2 + $0x27] sm:$0xff] }
 0x16e   : > { %1658 = vst.msk [vmem:[#allocation2 + $0x48] sm:$0xff] %vm562_vm1, %v1650_v43  ;;  %v8907_v46 = vld [vmem:[#allocation2 + $0x18] sm:$0xff]  ;;  %v8927_v54 = vld [vmem:[#allocation2 + $0x28] sm:$0xff]  ;;  %v1668_v57 = vmul.f32 %v8563_v20, %v8922_v49  ;;  %v1671_v52 = vmul.f32 %v8569_v23, %v8961_v51 }
 0x16f   : > { %1656 = vst.msk [vmem:[#allocation2 + $0x38] sm:$0xff] %vm562_vm1, %v1648_v15  ;;  %7548 = vmatprep.mubr.msk.bf16.mxu1 %vm562_vm1, %v1692_v44  ;;  %v8915_v48 = vpack.c.bf16 %v8909_v47, %v8907_v46  ;;  %v8948_v4 = vld [vmem:[#allocation2 + $0x17] sm:$0xff]  ;;  %v8950_v5 = vld [vmem:[#allocation2 + $0x1f] sm:$0xff]  ;;  %v1879_v8 = vld [vmem:[#allocation2 + $0x9] sm:$0xff] }
 0x170   : > { %v1675_v3 = vpack.c.bf16 %v1668_v57, %v8721_v38  ;;  %v1669_v63 = vmul.f32 %v8565_v21, %v8948_v4  ;;  %v1670_v12 = vmul.f32 %v8567_v22, %v8950_v5  ;;  %v8975_v0 = vld [vmem:[#allocation2 + $0x11] sm:$0xff]  ;;  %v1887_v2 = vmul.f32 %v8577_v27, %v1879_v8  ;;  %v8988_v37 = vld [vmem:[#allocation2 + $0x19] sm:$0xff]  ;;  %v8990_v58 = vld [vmem:[#allocation2 + $0x21] sm:$0xff] }
 0x171   : > { %7549 = vmatmul.mubr.msk.bf16.vlgmr.msra.gmra.mrb[8].mxu1 %vm562_vm1, %v8915_v48  ;;  %v1888_v39 = vmul.f32 %v8579_v28, %v8975_v0  ;;  %v1889_v41 = vmul.f32 %v8581_v29, %v8988_v37  ;;  %v1890_v60 = vmul.f32 %v8583_v30, %v8990_v58 }
 0x172   : > { %7557 = vmatpush3.bf16.msra.mxu1 %v8363_v45  ;;  %v1676_v13 = vpack.c.bf16 %v1670_v12, %v1669_v63 }
 0x173   : > { %7558 = vmatprep.subr.bf16.mxu1 %v8364_v50  ;;  %v8939_v62 = vld [vmem:[#allocation2 + $0x40] sm:$0xff]  ;;  %v1895_v10 = vpack.c.bf16 %v1888_v39, %v1887_v2  ;;  %v1896_v44 = vpack.c.bf16 %v1890_v60, %v1889_v41  ;;  %v8370_v39 = vld [vmem:[%s10239_s1 + $0xd8] sm:$0xff]  }
 0x174   : > { %v8929_v56 = vld [vmem:[#allocation2 + $0x30] sm:$0xff]  ;;  %v8371_v60 = vld [vmem:[%s10239_s1 + $0xe0] sm:$0xff]  }
 0x175   : > { %v8935_v59 = vpack.c.bf16 %v8929_v56, %v8927_v54  ;;  %v8954_v6 = vld [vmem:[#allocation2 + $0x2f] sm:$0xff] }
 0x176   : > { %v8937_v61 = vld [vmem:[#allocation2 + $0x38] sm:$0xff]  ;;  %7559 = vmatpush3.bf16.msra.mxu1 %v8364_v50  ;;  %v1672_v38 = vmul.f32 %v8571_v24, %v8954_v6  ;;  %v9000_v42 = vld [vmem:[#allocation2 + $0x29] sm:$0xff] }
 0x177   : > { %7552 = vmatprep.mubr.msk.bf16.mxu1 %vm562_vm1, %v8935_v59  ;;  %v8945_v45 = vpack.c.bf16 %v8939_v62, %v8937_v61  ;;  %7568 = vmatprep.subr.bf16.mxu1 %v8365_v53  ;;  %v8970_v35 = vld [vmem:[#allocation2 + $0x37] sm:$0xff]  ;;  %v8972_v55 = vld [vmem:[#allocation2 + $0x3f] sm:$0xff]  ;;  %v1891_v15 = vmul.f32 %v8585_v31, %v9000_v42  ;;  %v8368_v50 = vld [vmem:[%s10239_s1 + $0xc8] sm:$0xff]  }
 0x178   : > { %v1677_v18 = vpack.c.bf16 %v1672_v38, %v1671_v52  ;;  %v1673_v1 = vmul.f32 %v8573_v25, %v8970_v35  ;;  %v1674_v7 = vmul.f32 %v8575_v26, %v8972_v55  ;;  %v8993_v9 = vld [vmem:[#allocation2 + $0x31] sm:$0xff]  ;;  %v9009_v57 = vld [vmem:[#allocation2 + $0x39] sm:$0xff]  ;;  %v2010_v52 = vmul.f32 %v8563_v20, %v8948_v4 }
 0x179   : > { %7553 = vmatmul.mubr.msk.bf16.gmra.mrb[12].mxu1 %vm562_vm1, %v8945_v45  ;;  %v1892_v43 = vmul.f32 %v8587_v32, %v8993_v9  ;;  %v1893_v63 = vmul.f32 %v8589_v33, %v9009_v57  ;;  %v8369_v38 = vld [vmem:[%s10239_s1 + $0xd0] sm:$0xff]   ;;  %v2014_v8 = vmul.f32 %v8571_v24, %v8970_v35 }
 0x17a   : > { %7560 = vmatprep.mubr.msk.bf16.mxu1 %vm562_vm1, %v1675_v3  ;;  %v1678_v40 = vpack.c.bf16 %v1674_v7, %v1673_v1  ;;  %v9011_v3 = vld [vmem:[#allocation2 + $0x41] sm:$0xff]  ;;  %v2011_v1 = vmul.f32 %v8565_v21, %v8950_v5  ;;  %v2012_v7 = vmul.f32 %v8567_v22, %v8961_v51 }
 0x17b   : > { %v1894_v12 = vmul.f32 %v8591_v34, %v9011_v3 }
 0x181   : > { %7561 = vmatmul.mubr.msk.bf16.vlgmr.msra.gmra.mrb[8].mxu1 %vm562_vm1, %v1676_v13  ;;  %v2009_v13 = vmul.f32 %v8561_v19, %v8922_v49  ;;  %v2018_v49 = vpack.c.bf16 %v2012_v7, %v2011_v1  ;;  %v8375_v7 = vld [vmem:[%s10239_s1 + $0x100] sm:$0xff]  }
 0x182   : > { %7564 = vmatprep.mubr.msk.bf16.mxu1 %vm562_vm1, %v1677_v18  ;;  %7569 = vmatpush3.bf16.msra.mxu1 %v8365_v53  ;;  %v1897_v53 = vpack.c.bf16 %v1892_v43, %v1891_v15  ;;  %v2131_v15 = vpack.c.bf16 %v8907_v46, %v8901_v14  ;;  %v8373_v14 = vld [vmem:[%s10239_s1 + $0xf0] sm:$0xff]   ;;  %v9066_v46 = vld [vmem:[#allocation2 + $0x48] sm:$0xff] }
 0x183   : > { %7570 = vmatprep.subr.bf16.mxu1 %v8366_v17  ;;  %v2017_v18 = vpack.c.bf16 %v2010_v52, %v2009_v13 }
 0x186   : > { %7571 = vmatpush3.bf16.msra.mxu1 %v8366_v17  ;;  %v1898_v17 = vpack.c.bf16 %v1894_v12, %v1893_v63  ;;  %v2248_v63 = vmul.f32 %v8583_v30, %v9000_v42  ;;  %v2249_v12 = vmul.f32 %v8585_v31, %v8993_v9 }
 0x187   : > { %7580 = vmatprep.subr.bf16.mxu1 %v8367_v16 }
 0x189   : > { %7565 = vmatmul.mubr.msk.bf16.gmra.mrb[12].mxu1 %vm562_vm1, %v1678_v40  ;;  %v9039_v40 = vld [vmem:[#allocation2 + $0x47] sm:$0xff] }
 0x18a   : > { %7572 = vmatprep.mubr.msk.bf16.mxu1 %vm562_vm1, %v1895_v10  ;;  %v2015_v10 = vmul.f32 %v8573_v25, %v8972_v55  ;;  %v2016_v41 = vmul.f32 %v8575_v26, %v9039_v40 }
 0x18c   : > { %v2020_v43 = vpack.c.bf16 %v2016_v41, %v2015_v10  ;;  %v2371_v10 = vmul.f32 %v8569_v23, %v8970_v35 }
 0x191   : > { %7573 = vmatmul.mubr.msk.bf16.vlgmr.msra.gmra.mrb[8].mxu1 %vm562_vm1, %v1896_v44  ;;  %v2132_v44 = vpack.c.bf16 %v8927_v54, %v8909_v47  ;;  %v2245_v47 = vmul.f32 %v8577_v27, %v8975_v0  ;;  %v2246_v54 = vmul.f32 %v8579_v28, %v8988_v37  ;;  %v2250_v0 = vmul.f32 %v8587_v32, %v9009_v57 }
 0x192   : > { %7576 = vmatprep.mubr.msk.bf16.mxu1 %vm562_vm1, %v1897_v53  ;;  %7581 = vmatpush3.bf16.msra.mxu1 %v8367_v16  ;;  %v2013_v16 = vmul.f32 %v8569_v23, %v8954_v6  ;;  %v2133_v53 = vpack.c.bf16 %v8937_v61, %v8929_v56  ;;  %v2134_v56 = vpack.c.bf16 %v9066_v46, %v8939_v62  ;;  %v8374_v62 = vld [vmem:[%s10239_s1 + $0xf8] sm:$0xff]  }
 0x193   : > { %7582 = vmatprep.subr.bf16.mxu1 %v8368_v50  ;;  %v2253_v61 = vpack.c.bf16 %v2246_v54, %v2245_v47  ;;  %v2255_v13 = vpack.c.bf16 %v2250_v0, %v2249_v12 }
 0x194   : > { %v2019_v2 = vpack.c.bf16 %v2014_v8, %v2013_v16  ;;  %v2367_v8 = vmul.f32 %v8561_v19, %v8948_v4  ;;  %v2368_v16 = vmul.f32 %v8563_v20, %v8950_v5  ;;  %v2372_v4 = vmul.f32 %v8571_v24, %v8972_v55 }
 0x195   : > { %v2369_v5 = vmul.f32 %v8565_v21, %v8961_v51  ;;  %v8377_v51 = vld [vmem:[%s10239_s1 + $0x110] sm:$0xff]  }
 0x196   : > { %7583 = vmatpush3.bf16.msra.mxu1 %v8368_v50  ;;  %v8372_v50 = vld [vmem:[%s10239_s1 + $0xe8] sm:$0xff]  }
 0x197   : > { %7592 = vmatprep.subr.bf16.mxu1 %v8369_v38 }
 0x199   : > { %7577 = vmatmul.mubr.msk.bf16.gmra.mrb[12].mxu1 %vm562_vm1, %v1898_v17  ;;  %v2244_v17 = vld [vmem:[#allocation2 + $0x49] sm:$0xff] }
 0x19a   : > { %7584 = vmatprep.mubr.msk.bf16.mxu1 %vm562_vm1, %v2017_v18  ;;  %v2251_v18 = vmul.f32 %v8589_v33, %v9011_v3  ;;  %v2252_v1 = vmul.f32 %v8591_v34, %v2244_v17 }
 0x1a1   : > { %7585 = vmatmul.mubr.msk.bf16.vlgmr.msra.gmra.mrb[8].mxu1 %vm562_vm1, %v2018_v49  ;;  %v2256_v49 = vpack.c.bf16 %v2252_v1, %v2251_v18 }
 0x1a2   : > { %7588 = vmatprep.mubr.msk.bf16.mxu1 %vm562_vm1, %v2019_v2  ;;  %7593 = vmatpush3.bf16.msra.mxu1 %v8369_v38  ;;  %v2247_v38 = vmul.f32 %v8581_v29, %v8990_v58  ;;  %v2370_v2 = vmul.f32 %v8567_v22, %v8954_v6  ;;  %v2373_v6 = vmul.f32 %v8573_v25, %v9039_v40 }
 0x1a3   : > { %7594 = vmatprep.subr.bf16.mxu1 %v8370_v39  ;;  %v2603_v40 = vmul.f32 %v8577_v27, %v8988_v37  ;;  %v2608_v37 = vmul.f32 %v8587_v32, %v9011_v3 }
 0x1a4   : > { %v2254_v52 = vpack.c.bf16 %v2248_v63, %v2247_v38  ;;  %v2376_v41 = vpack.c.bf16 %v2370_v2, %v2369_v5 }
 0x1a6   : > { %7595 = vmatpush3.bf16.msra.mxu1 %v8370_v39  ;;  %v2375_v39 = vpack.c.bf16 %v2368_v16, %v2367_v8 }
 0x1a7   : > { %7604 = vmatprep.subr.bf16.mxu1 %v8371_v60 }
 0x1a9   : > { %7589 = vmatmul.mubr.msk.bf16.gmra.mrb[12].mxu1 %vm562_vm1, %v2020_v43  ;;  %v2377_v43 = vpack.c.bf16 %v2372_v4, %v2371_v10  ;;  %v2774_v4 = vld [vmem:[#allocation3 + $0x8] sm:$0xff] }
 0x1aa   : > { %7596 = vmatprep.mubr.msk.bf16.mxu1 %vm562_vm1, %v2131_v15  ;;  %v2366_v15 = vld [vmem:[#allocation2 + $0x4f] sm:$0xff] }
 0x1ab   : > { %v2374_v35 = vmul.f32 %v8575_v26, %v2366_v15 }
 0x1ad   : > { %v2378_v55 = vpack.c.bf16 %v2374_v35, %v2373_v6 }
 0x1b1   : > { %7597 = vmatmul.mubr.msk.bf16.vlgmr.msra.gmra.mrb[8].mxu1 %vm562_vm1, %v2132_v44  ;;  %v8378_v44 = vld [vmem:[%s10239_s1 + $0x118] sm:$0xff]  }
 0x1b2   : > { %7600 = vmatprep.mubr.msk.bf16.mxu1 %vm562_vm1, %v2133_v53  ;;  %7605 = vmatpush3.bf16.msra.mxu1 %v8371_v60  ;;  %v8376_v60 = vld [vmem:[%s10239_s1 + $0x108] sm:$0xff]  }
 0x1b3   : > { %7606 = vmatprep.subr.bf16.mxu1 %v8372_v50 }
 0x1b6   : > { %7607 = vmatpush3.bf16.msra.mxu1 %v8372_v50  ;;  %v2604_v50 = vmul.f32 %v8579_v28, %v8990_v58  ;;  %v2605_v58 = vmul.f32 %v8581_v29, %v9000_v42  ;;  %v8380_v42 = vld [vmem:[%s10239_s1 + $0x138] sm:$0xff]  }
 0x1b7   : > { %7616 = vmatprep.subr.bf16.mxu1 %v8373_v14 }
 0x1b8   : > { %v2611_v53 = vpack.c.bf16 %v2604_v50, %v2603_v40  ;;  %v2749_v40 = vld [vmem:[#allocation3 + $0x7] sm:$0xff] }
 0x1b9   : > { %7601 = vmatmul.mubr.msk.bf16.gmra.mrb[12].mxu1 %vm562_vm1, %v2134_v56 }
 0x1ba   : > { %7608 = vmatprep.mubr.msk.bf16.mxu1 %vm562_vm1, %v2253_v61 }
 0x1c1   : > { %7609 = vmatmul.mubr.msk.bf16.vlgmr.msra.gmra.mrb[8].mxu1 %vm562_vm1, %v2254_v52 }
 0x1c2   : > { %7612 = vmatprep.mubr.msk.bf16.mxu1 %vm562_vm1, %v2255_v13  ;;  %7617 = vmatpush3.bf16.msra.mxu1 %v8373_v14 }
 0x1c3   : > { %7618 = vmatprep.subr.bf16.mxu1 %v8374_v62 }
 0x1c6   : > { %7619 = vmatpush3.bf16.msra.mxu1 %v8374_v62 }
 0x1c7   : > { %7628 = vmatprep.subr.bf16.mxu1 %v8375_v7 }
 0x1c9   : > { %7613 = vmatmul.mubr.msk.bf16.gmra.mrb[12].mxu1 %vm562_vm1, %v2256_v49 }
 0x1ca   : > { %7620 = vmatprep.mubr.msk.bf16.mxu1 %vm562_vm1, %v2375_v39 }
 0x1d1   : > { %7621 = vmatmul.mubr.msk.bf16.vlgmr.msra.gmra.mrb[8].mxu1 %vm562_vm1, %v2376_v41 }
 0x1d2   : > { %7624 = vmatprep.mubr.msk.bf16.mxu1 %vm562_vm1, %v2377_v43  ;;  %7629 = vmatpush3.bf16.msra.mxu1 %v8375_v7 }
 0x1d3   : > { %7630 = vmatprep.subr.bf16.mxu1 %v8376_v60 }
 0x1d6   : > { %7631 = vmatpush3.bf16.msra.mxu1 %v8376_v60 }
 0x1d7   : > { %7640 = vmatprep.subr.bf16.mxu1 %v8377_v51 }
 0x1d9   : > { %7625 = vmatmul.mubr.msk.bf16.gmra.mrb[12].mxu1 %vm562_vm1, %v2378_v55 }
 0x1da   : > { %7632 = vmatprep.mubr.msk.bf16.mxu1 %vm562_vm1, %v8915_v48  ;;  %v2492_v48 = vpack.c.bf16 %v8853_v36, %v9066_v46  ;;  %v2609_v36 = vmul.f32 %v8589_v33, %v2244_v17 }
 0x1dc   : > { %v2614_v54 = vpack.c.bf16 %v8879_v11, %v2609_v36  ;;  %v6844_v11 = vld [vmem:[%s10240_s2 + $0x1] ss:$0 sm:$0xff] }
 0x1e1   : > { %7633 = vmatmul.mubr.msk.bf16.vlgmr.msra.gmra.mrb[8].mxu1 %vm562_vm1, %v8935_v59  ;;  %v2606_v59 = vmul.f32 %v8583_v30, %v8993_v9  ;;  %v8379_v9 = vld [vmem:[%s10239_s1 + $0x130] sm:$0xff]  }
 0x1e2   : > { %7636 = vmatprep.mubr.msk.bf16.mxu1 %vm562_vm1, %v8945_v45  ;;  %7641 = vmatpush3.bf16.msra.mxu1 %v8377_v51  ;;  %v2607_v45 = vmul.f32 %v8585_v31, %v9009_v57  ;;  %v8381_v57 = vld [vmem:[%s10239_s1 + $0x120] sm:$0xff]  }
 0x1e3   : > { %7642 = vmatprep.subr.bf16.mxu1 %v8378_v44  ;;  %v2612_v14 = vpack.c.bf16 %v2606_v59, %v2605_v58  ;;  %7652 = vmatprep.subr.bf16.mxu0 %v8379_v9 }
 0x1e4   : > { %v2613_v47 = vpack.c.bf16 %v2608_v37, %v2607_v45  ;;  %7653 = vmatpush3.bf16.msra.mxu0 %v8379_v9  ;;  %v2757_v45 = vmul.f32 %v8561_v19, %v2749_v40  ;;  %v8386_v40 = vld [vmem:[%s10239_s1 + $0x158] sm:$0xff]  }
 0x1e5   : > { %7654 = vmatprep.subr.bf16.mxu0 %v8380_v42 }
 0x1e6   : > { %7643 = vmatpush3.bf16.msra.mxu1 %v8378_v44  ;;  %v8382_v44 = vld [vmem:[%s10239_s1 + $0x128] sm:$0xff]  }
 0x1e8   : > { %7655 = vmatpush3.bf16.msra.mxu0 %v8380_v42 }
 0x1e9   : > { %7637 = vmatmul.mubr.msk.bf16.gmra.mrb[12].mxu1 %vm562_vm1, %v2492_v48  ;;  %7664 = vmatprep.subr.bf16.mxu0 %v8381_v57  ;;  %v8383_v48 = vld [vmem:[%s10239_s1 + $0x140] sm:$0xff]  }
 0x1ea   : > { %7644 = vmatprep.mubr.msk.bf16.mxu1 %vm562_vm1, %v2611_v53 }
 0x1f1   : > { %7645 = vmatmul.mubr.msk.bf16.vlgmr.msra.gmra.mrb[8].mxu1 %vm562_vm1, %v2612_v14 }
 0x1f2   : > { %7648 = vmatprep.mubr.msk.bf16.mxu1 %vm562_vm1, %v2613_v47 }
 0x1f9   : > { %7649 = vmatmul.mubr.msk.bf16.gmra.mrb[12].mxu1 %vm562_vm1, %v2614_v54 }
 0x2c4   : > { %v7646_v3 = vpop.f32.mrb[8].mxu1 }
 0x2c5   : > { %v2727_v56 = vadd.f32 %v7646_v3, %v6844_v11  ;;  %v2678_v61 = vpop.f32.mrb[9].mxu1 }
 0x2c6   : > { %v2725_v63 = vadd.f32 %v6844_v11, %v2678_v61  ;;  %v7647_v12 = vpop.f32.mrb[10].mxu1 }
 0x2c7   : > { %v2735_v0 = vmax.f32 %v2727_v56, 0.0  ;;  %v2728_v38 = vadd.f32 %v7647_v12, %v6844_v11  ;;  %v2681_v52 = vpop.f32.mrb[11].mxu1 }
 0x2c8   : > { %v2733_v62 = vmax.f32 %v2725_v63, 0.0  ;;  %v2726_v13 = vadd.f32 %v6844_v11, %v2681_v52 }
 0x2c9   : > { %2743 = vst.msk [vmem:[#allocation3 + $0x20] sm:$0xff] %vm562_vm1, %v2735_v0  ;;  %v2736_v17 = vmax.f32 %v2728_v38, 0.0  ;;  %v8384_v0 = vld [vmem:[%s10239_s1 + $0x148] sm:$0xff]  }
 0x2ca   : > { %2741 = vst.msk [vmem:[#allocation3 + $0x10] sm:$0xff] %vm562_vm1, %v2733_v62  ;;  %v2734_v18 = vmax.f32 %v2726_v13, 0.0 }
 0x2cb   : > { %2744 = vst.msk [vmem:[#allocation3 + $0x28] sm:$0xff] %vm562_vm1, %v2736_v17 }
 0x2cc   : > { %2742 = vst.msk [vmem:[#allocation3 + $0x18] sm:$0xff] %vm562_vm1, %v2734_v18  ;;  %v7650_v1 = vpop.f32.mrb[12].mxu1 }
 0x2cd   : > { %v2731_v7 = vadd.f32 %v7650_v1, %v6844_v11  ;;  %v2694_v8 = vpop.f32.mrb[13].mxu1 }
 0x2ce   : > { %v2729_v16 = vadd.f32 %v6844_v11, %v2694_v8  ;;  %v7651_v49 = vpop.f32.mrb[14].mxu1 }
 0x2cf   : > { %v2739_v39 = vmax.f32 %v2731_v7, 0.0  ;;  %v2732_v2 = vadd.f32 %v7651_v49, %v6844_v11  ;;  %v2697_v10 = vpop.f32.mrb[15].mxu1  ;;  %v8385_v7 = vld [vmem:[%s10239_s1 + $0x150] sm:$0xff]  }
 0x2d0   : > { %v2737_v5 = vmax.f32 %v2729_v16, 0.0  ;;  %v2730_v41 = vadd.f32 %v6844_v11, %v2697_v10  ;;  %v9175_v51 = vld [vmem:[#allocation3 + $0x20] sm:$0xff] }
 0x2d1   : > { %2747 = vst.msk [vmem:[#allocation3 + $0x40] sm:$0xff] %vm562_vm1, %v2739_v39  ;;  %v2740_v60 = vmax.f32 %v2732_v2, 0.0  ;;  %v9168_v43 = vld [vmem:[#allocation3 + $0x10] sm:$0xff] }
 0x2d2   : > { %2745 = vst.msk [vmem:[#allocation3 + $0x30] sm:$0xff] %vm562_vm1, %v2737_v5  ;;  %v2738_v15 = vmax.f32 %v2730_v41, 0.0  ;;  %v2782_v6 = vpack.c.bf16 %v9168_v43, %v2774_v4  ;;  %v9188_v50 = vld [vmem:[#allocation3 + $0xf] sm:$0xff]  ;;  %v9227_v56 = vld [vmem:[#allocation3 + $0x27] sm:$0xff] }
 0x2d3   : > { %2748 = vst.msk [vmem:[#allocation3 + $0x48] sm:$0xff] %vm562_vm1, %v2740_v60  ;;  %v9173_v35 = vld [vmem:[#allocation3 + $0x18] sm:$0xff]  ;;  %v9193_v53 = vld [vmem:[#allocation3 + $0x28] sm:$0xff]  ;;  %v2758_v37 = vmul.f32 %v8563_v20, %v9188_v50  ;;  %v2761_v63 = vmul.f32 %v8569_v23, %v9227_v56 }
 0x2d4   : > { %2746 = vst.msk [vmem:[#allocation3 + $0x38] sm:$0xff] %vm562_vm1, %v2738_v15  ;;  %7656 = vmatprep.mubr.msk.bf16.mxu0 %vm562_vm1, %v2782_v6  ;;  %v9181_v55 = vpack.c.bf16 %v9175_v51, %v9173_v35  ;;  %v9214_v9 = vld [vmem:[#allocation3 + $0x17] sm:$0xff]  ;;  %v9216_v42 = vld [vmem:[#allocation3 + $0x1f] sm:$0xff]  ;;  %v2969_v1 = vld [vmem:[#allocation3 + $0x9] sm:$0xff] }
 0x2d5   : > { %v2765_v54 = vpack.c.bf16 %v2758_v37, %v2757_v45  ;;  %v2759_v11 = vmul.f32 %v8565_v21, %v9214_v9  ;;  %v2760_v3 = vmul.f32 %v8567_v22, %v9216_v42  ;;  %v9241_v13 = vld [vmem:[#allocation3 + $0x11] sm:$0xff]  ;;  %v2977_v16 = vmul.f32 %v8577_v27, %v2969_v1  ;;  %v9254_v2 = vld [vmem:[#allocation3 + $0x19] sm:$0xff]  ;;  %v9256_v10 = vld [vmem:[#allocation3 + $0x21] sm:$0xff] }
 0x2d6   : > { %7657 = vmatmul.mubr.msk.bf16.vlgmr.msra.gmra.mrb[8].mxu0 %vm562_vm1, %v9181_v55  ;;  %v2978_v8 = vmul.f32 %v8579_v28, %v9241_v13  ;;  %v2979_v5 = vmul.f32 %v8581_v29, %v9254_v2  ;;  %v2980_v41 = vmul.f32 %v8583_v30, %v9256_v10 }
 0x2d7   : > { %7665 = vmatpush3.bf16.msra.mxu0 %v8381_v57  ;;  %v2766_v12 = vpack.c.bf16 %v2760_v3, %v2759_v11  ;;  %v8387_v3 = vld [vmem:[%s10239_s1 + $0x160] sm:$0xff]  }
 0x2d8   : > { %7666 = vmatprep.subr.bf16.mxu0 %v8382_v44  ;;  %v9206_v47 = vld [vmem:[#allocation3 + $0x40] sm:$0xff]  ;;  %v2985_v39 = vpack.c.bf16 %v2978_v8, %v2977_v16 }
 0x2d9   : > { %v9195_v59 = vld [vmem:[#allocation3 + $0x30] sm:$0xff] }
 0x2da   : > { %v9202_v58 = vpack.c.bf16 %v9195_v59, %v9193_v53  ;;  %v9220_v57 = vld [vmem:[#allocation3 + $0x2f] sm:$0xff]  ;;  %v9277_v37 = vld [vmem:[#allocation3 + $0x41] sm:$0xff] }
 0x2db   : > { %v9204_v14 = vld [vmem:[#allocation3 + $0x38] sm:$0xff]  ;;  %7667 = vmatpush3.bf16.msra.mxu0 %v8382_v44  ;;  %v2762_v61 = vmul.f32 %v8571_v24, %v9220_v57  ;;  %v9266_v60 = vld [vmem:[#allocation3 + $0x29] sm:$0xff]  ;;  %v2986_v44 = vpack.c.bf16 %v2980_v41, %v2979_v5  ;;  %v2984_v11 = vmul.f32 %v8591_v34, %v9277_v37  ;;  %v3103_v1 = vmul.f32 %v8569_v23, %v9220_v57 }
 0x2dc   : > { %7660 = vmatprep.mubr.msk.bf16.mxu0 %vm562_vm1, %v9202_v58  ;;  %v9212_v36 = vpack.c.bf16 %v9206_v47, %v9204_v14  ;;  %7676 = vmatprep.subr.bf16.mxu0 %v8383_v48  ;;  %v9236_v52 = vld [vmem:[#allocation3 + $0x37] sm:$0xff]  ;;  %v9238_v62 = vld [vmem:[#allocation3 + $0x3f] sm:$0xff]  ;;  %v2981_v6 = vmul.f32 %v8585_v31, %v9266_v60  ;;  %v9305_v16 = vld [vmem:[#allocation3 + $0x47] sm:$0xff] }
 0x2dd   : > { %v2767_v38 = vpack.c.bf16 %v2762_v61, %v2761_v63  ;;  %v2763_v17 = vmul.f32 %v8573_v25, %v9236_v52  ;;  %v2764_v18 = vmul.f32 %v8575_v26, %v9238_v62  ;;  %v9259_v4 = vld [vmem:[#allocation3 + $0x31] sm:$0xff]  ;;  %v9275_v45 = vld [vmem:[#allocation3 + $0x39] sm:$0xff]  ;;  %v3100_v61 = vmul.f32 %v8563_v20, %v9214_v9 }
 0x2de   : > { %7661 = vmatmul.mubr.msk.bf16.gmra.mrb[12].mxu0 %vm562_vm1, %v9212_v36  ;;  %v2982_v15 = vmul.f32 %v8587_v32, %v9259_v4  ;;  %v3099_v63 = vmul.f32 %v8561_v19, %v9188_v50  ;;  %v8389_v5 = vld [vmem:[%s10239_s1 + $0x170] sm:$0xff]  }
 0x2df   : > { %7668 = vmatprep.mubr.msk.bf16.mxu0 %vm562_vm1, %v2765_v54  ;;  %v2768_v49 = vpack.c.bf16 %v2764_v18, %v2763_v17  ;;  %v2983_v54 = vmul.f32 %v8589_v33, %v9275_v45  ;;  %v3102_v17 = vmul.f32 %v8567_v22, %v9227_v56  ;;  %v3104_v18 = vmul.f32 %v8571_v24, %v9236_v52 }
 0x2e1   : > { %v3109_v8 = vpack.c.bf16 %v3104_v18, %v3103_v1  ;;  %v3458_v18 = vmul.f32 %v8563_v20, %v9216_v42 }
 0x2e6   : > { %7669 = vmatmul.mubr.msk.bf16.vlgmr.msra.gmra.mrb[8].mxu0 %vm562_vm1, %v2766_v12  ;;  %v2988_v12 = vpack.c.bf16 %v2984_v11, %v2983_v54  ;;  %v3339_v54 = vmul.f32 %v8585_v31, %v9259_v4  ;;  %v3337_v11 = vmul.f32 %v8581_v29, %v9256_v10 }
 0x2e7   : > { %7672 = vmatprep.mubr.msk.bf16.mxu0 %vm562_vm1, %v2767_v38  ;;  %7677 = vmatpush3.bf16.msra.mxu0 %v8383_v48  ;;  %v2987_v48 = vpack.c.bf16 %v2982_v15, %v2981_v6  ;;  %v3101_v38 = vmul.f32 %v8565_v21, %v9216_v42  ;;  %v3221_v15 = vpack.c.bf16 %v9173_v35, %v9168_v43  ;;  %v8391_v43 = vld [vmem:[%s10239_s1 + $0x180] sm:$0xff]   ;;  %v9332_v35 = vld [vmem:[#allocation3 + $0x48] sm:$0xff] }
 0x2e8   : > { %7678 = vmatprep.subr.bf16.mxu0 %v8384_v0  ;;  %v3222_v6 = vpack.c.bf16 %v9193_v53, %v9175_v51  ;;  %v3335_v51 = vmul.f32 %v8577_v27, %v9241_v13  ;;  %v3336_v53 = vmul.f32 %v8579_v28, %v9254_v2  ;;  %v3340_v13 = vmul.f32 %v8587_v32, %v9275_v45 }
 0x2e9   : > { %v3108_v50 = vpack.c.bf16 %v3102_v17, %v3101_v38  ;;  %v8393_v38 = vld [vmem:[%s10239_s1 + $0x190] sm:$0xff]   ;;  %v3457_v17 = vmul.f32 %v8561_v19, %v9214_v9  ;;  %v3462_v9 = vmul.f32 %v8571_v24, %v9238_v62  ;;  %v3459_v42 = vmul.f32 %v8565_v21, %v9227_v56  ;;  %v8395_v56 = vld [vmem:[%s10239_s1 + $0x1a0] sm:$0xff]  }
 0x2eb   : > { %7679 = vmatpush3.bf16.msra.mxu0 %v8384_v0  ;;  %v3107_v0 = vpack.c.bf16 %v3100_v61, %v3099_v63  ;;  %v3345_v61 = vpack.c.bf16 %v3340_v13, %v3339_v54  ;;  %v3334_v63 = vld [vmem:[#allocation3 + $0x49] sm:$0xff] }
 0x2ec   : > { %7688 = vmatprep.subr.bf16.mxu0 %v8385_v7 }
 0x2ee   : > { %7673 = vmatmul.mubr.msk.bf16.gmra.mrb[12].mxu0 %vm562_vm1, %v2768_v49  ;;  %v3105_v49 = vmul.f32 %v8573_v25, %v9238_v62 }
 0x2ef   : > { %7680 = vmatprep.mubr.msk.bf16.mxu0 %vm562_vm1, %v2985_v39  ;;  %v3106_v39 = vmul.f32 %v8575_v26, %v9305_v16 }
 0x2f1   : > { %v3110_v41 = vpack.c.bf16 %v3106_v39, %v3105_v49  ;;  %v8394_v39 = vld [vmem:[%s10239_s1 + $0x198] sm:$0xff]  }
 0x2f6   : > { %7681 = vmatmul.mubr.msk.bf16.vlgmr.msra.gmra.mrb[8].mxu0 %vm562_vm1, %v2986_v44  ;;  %v8390_v44 = vld [vmem:[%s10239_s1 + $0x178] sm:$0xff]  }
 0x2f7   : > { %7684 = vmatprep.mubr.msk.bf16.mxu0 %vm562_vm1, %v2987_v48  ;;  %7689 = vmatpush3.bf16.msra.mxu0 %v8385_v7  ;;  %v8388_v7 = vld [vmem:[%s10239_s1 + $0x168] sm:$0xff]   ;;  %v3338_v48 = vmul.f32 %v8583_v30, %v9266_v60 }
 0x2f8   : > { %7690 = vmatprep.subr.bf16.mxu0 %v8386_v40 }
 0x2fb   : > { %7691 = vmatpush3.bf16.msra.mxu0 %v8386_v40  ;;  %v3223_v40 = vpack.c.bf16 %v9204_v14, %v9195_v59  ;;  %v3224_v59 = vpack.c.bf16 %v9332_v35, %v9206_v47  ;;  %v3343_v14 = vpack.c.bf16 %v3336_v53, %v3335_v51  ;;  %v8392_v47 = vld [vmem:[%s10239_s1 + $0x188] sm:$0xff]   ;;  %v3699_v53 = vmul.f32 %v8589_v33, %v3334_v63 }
 0x2fc   : > { %7700 = vmatprep.subr.bf16.mxu0 %v8387_v3 }
 0x2fe   : > { %7685 = vmatmul.mubr.msk.bf16.gmra.mrb[12].mxu0 %vm562_vm1, %v2988_v12  ;;  %v3341_v12 = vmul.f32 %v8589_v33, %v9277_v37 }
 0x2ff   : > { %7692 = vmatprep.mubr.msk.bf16.mxu0 %vm562_vm1, %v3107_v0  ;;  %v3342_v0 = vmul.f32 %v8591_v34, %v3334_v63 }
 0x301   : > { %v3346_v1 = vpack.c.bf16 %v3342_v0, %v3341_v12  ;;  %v3833_v12 = vld [vmem:[#allocation2 + $0x20] sm:$0xff] }
 0x306   : > { %7693 = vmatmul.mubr.msk.bf16.vlgmr.msra.gmra.mrb[8].mxu0 %vm562_vm1, %v3108_v50  ;;  %v3465_v50 = vpack.c.bf16 %v3458_v18, %v3457_v17  ;;  %v3831_v18 = vld [vmem:[#allocation2 + $0x10] sm:$0xff] }
 0x307   : > { %7696 = vmatprep.mubr.msk.bf16.mxu0 %vm562_vm1, %v3109_v8  ;;  %7701 = vmatpush3.bf16.msra.mxu0 %v8387_v3  ;;  %v3344_v3 = vpack.c.bf16 %v3338_v48, %v3337_v11  ;;  %v3461_v8 = vmul.f32 %v8569_v23, %v9236_v52 }
 0x308   : > { %7702 = vmatprep.subr.bf16.mxu0 %v8388_v7 }
 0x30b   : > { %7703 = vmatpush3.bf16.msra.mxu0 %v8388_v7  ;;  %v3460_v7 = vmul.f32 %v8567_v22, %v9220_v57  ;;  %v3463_v57 = vmul.f32 %v8573_v25, %v9305_v16  ;;  %v3578_v16 = vld [vmem:[#allocation3 + $0x50] sm:$0xff] }
 0x30c   : > { %7712 = vmatprep.subr.bf16.mxu0 %v8389_v5 }
 0x30d   : > { %v3466_v49 = vpack.c.bf16 %v3460_v7, %v3459_v42  ;;  %v3834_v7 = vld [vmem:[#allocation2 + $0x28] sm:$0xff]  ;;  %v3832_v42 = vld [vmem:[#allocation2 + $0x18] sm:$0xff] }
 0x30e   : > { %7697 = vmatmul.mubr.msk.bf16.gmra.mrb[12].mxu0 %vm562_vm1, %v3110_v41  ;;  %v3456_v41 = vld [vmem:[#allocation3 + $0x4f] sm:$0xff] }
 0x30f   : > { %7704 = vmatprep.mubr.msk.bf16.mxu0 %vm562_vm1, %v3221_v15  ;;  %v3464_v52 = vmul.f32 %v8575_v26, %v3456_v41  ;;  %v8396_v15 = vld [vmem:[%s10239_s1 + $0x1a8] sm:$0xff]  }
 0x311   : > { %v3468_v62 = vpack.c.bf16 %v3464_v52, %v3463_v57 }
 0x316   : > { %7705 = vmatmul.mubr.msk.bf16.vlgmr.msra.gmra.mrb[8].mxu0 %vm562_vm1, %v3222_v6  ;;  %v3693_v6 = vmul.f32 %v8577_v27, %v9254_v2  ;;  %v3698_v2 = vmul.f32 %v8587_v32, %v9277_v37  ;;  %v8399_v37 = vld [vmem:[%s10239_s1 + $0x1b0] sm:$0xff]  }
 0x317   : > { %7708 = vmatprep.mubr.msk.bf16.mxu0 %vm562_vm1, %v3223_v40  ;;  %7713 = vmatpush3.bf16.msra.mxu0 %v8389_v5  ;;  %v3467_v5 = vpack.c.bf16 %v3462_v9, %v3461_v8 }
 0x318   : > { %7714 = vmatprep.subr.bf16.mxu0 %v8390_v44 }
 0x31b   : > { %7715 = vmatpush3.bf16.msra.mxu0 %v8390_v44  ;;  %v3694_v44 = vmul.f32 %v8579_v28, %v9256_v10  ;;  %v3695_v10 = vmul.f32 %v8581_v29, %v9266_v60  ;;  %v8398_v60 = vld [vmem:[%s10239_s1 + $0x1c8] sm:$0xff]  }
 0x31c   : > { %7724 = vmatprep.subr.bf16.mxu0 %v8391_v43 }
 0x31d   : > { %v3701_v40 = vpack.c.bf16 %v3694_v44, %v3693_v6 }
 0x31e   : > { %7709 = vmatmul.mubr.msk.bf16.gmra.mrb[12].mxu0 %vm562_vm1, %v3224_v59 }
 0x31f   : > { %7716 = vmatprep.mubr.msk.bf16.mxu0 %vm562_vm1, %v3343_v14  ;;  %v6936_v14 = vld [vmem:[%s10240_s2 + $0x2] ss:$0 sm:$0xff] }
 0x326   : > { %7717 = vmatmul.mubr.msk.bf16.vlgmr.msra.gmra.mrb[8].mxu0 %vm562_vm1, %v3344_v3 }
 0x327   : > { %7720 = vmatprep.mubr.msk.bf16.mxu0 %vm562_vm1, %v3345_v61  ;;  %7725 = vmatpush3.bf16.msra.mxu0 %v8391_v43 }
 0x328   : > { %7726 = vmatprep.subr.bf16.mxu0 %v8392_v47 }
 0x32b   : > { %7727 = vmatpush3.bf16.msra.mxu0 %v8392_v47 }
 0x32c   : > { %7736 = vmatprep.subr.bf16.mxu0 %v8393_v38 }
 0x32e   : > { %7721 = vmatmul.mubr.msk.bf16.gmra.mrb[12].mxu0 %vm562_vm1, %v3346_v1 }
 0x32f   : > { %7728 = vmatprep.mubr.msk.bf16.mxu0 %vm562_vm1, %v3465_v50 }
 0x336   : > { %7729 = vmatmul.mubr.msk.bf16.vlgmr.msra.gmra.mrb[8].mxu0 %vm562_vm1, %v3466_v49 }
 0x337   : > { %7732 = vmatprep.mubr.msk.bf16.mxu0 %vm562_vm1, %v3467_v5  ;;  %7737 = vmatpush3.bf16.msra.mxu0 %v8393_v38 }
 0x338   : > { %7738 = vmatprep.subr.bf16.mxu0 %v8394_v39 }
 0x33b   : > { %7739 = vmatpush3.bf16.msra.mxu0 %v8394_v39 }
 0x33c   : > { %7748 = vmatprep.subr.bf16.mxu0 %v8395_v56 }
 0x33e   : > { %7733 = vmatmul.mubr.msk.bf16.gmra.mrb[12].mxu0 %vm562_vm1, %v3468_v62 }
 0x33f   : > { %7740 = vmatprep.mubr.msk.bf16.mxu0 %vm562_vm1, %v9181_v55  ;;  %v3582_v55 = vpack.c.bf16 %v3578_v16, %v9332_v35  ;;  %v3692_v35 = vld [vmem:[#allocation3 + $0x51] sm:$0xff]  ;;  %v3837_v16 = vld [vmem:[#allocation2 + $0x40] sm:$0xff] }
 0x346   : > { %7741 = vmatmul.mubr.msk.bf16.vlgmr.msra.gmra.mrb[8].mxu0 %vm562_vm1, %v9202_v58  ;;  %v3696_v58 = vmul.f32 %v8583_v30, %v9259_v4  ;;  %v3700_v4 = vmul.f32 %v8591_v34, %v3692_v35 }
 0x347   : > { %7744 = vmatprep.mubr.msk.bf16.mxu0 %vm562_vm1, %v9212_v36  ;;  %7749 = vmatpush3.bf16.msra.mxu0 %v8395_v56  ;;  %v3697_v36 = vmul.f32 %v8585_v31, %v9275_v45  ;;  %v8397_v45 = vld [vmem:[%s10239_s1 + $0x1c0] sm:$0xff]  }
 0x348   : > { %7750 = vmatprep.subr.bf16.mxu0 %v8396_v15  ;;  %v3702_v43 = vpack.c.bf16 %v3696_v58, %v3695_v10  ;;  %v3704_v59 = vpack.c.bf16 %v3700_v4, %v3699_v53  ;;  %7760 = vmatprep.subr.bf16.mxu1 %v8397_v45 }
 0x349   : > { %v3703_v51 = vpack.c.bf16 %v3698_v2, %v3697_v36  ;;  %7761 = vmatpush3.bf16.msra.mxu1 %v8397_v45  ;;  %v3880_v36 = vld [vmem:[#allocation2 + $0x8] sm:$0xff] }
 0x34a   : > { %7762 = vmatprep.subr.bf16.mxu1 %v8398_v60 }
 0x34b   : > { %7751 = vmatpush3.bf16.msra.mxu0 %v8396_v15 }
 0x34d   : > { %7763 = vmatpush3.bf16.msra.mxu1 %v8398_v60  ;;  %v8400_v60 = vld [vmem:[%s10239_s1 + $0x1b8] sm:$0xff]  }
 0x34e   : > { %7745 = vmatmul.mubr.msk.bf16.gmra.mrb[12].mxu0 %vm562_vm1, %v3582_v55  ;;  %7772 = vmatprep.subr.bf16.mxu1 %v8399_v37 }
 0x34f   : > { %7752 = vmatprep.mubr.msk.bf16.mxu0 %vm562_vm1, %v3701_v40  ;;  %v3835_v40 = vld [vmem:[#allocation2 + $0x30] sm:$0xff] }
 0x356   : > { %7753 = vmatmul.mubr.msk.bf16.vlgmr.msra.gmra.mrb[8].mxu0 %vm562_vm1, %v3702_v43 }
 0x357   : > { %7756 = vmatprep.mubr.msk.bf16.mxu0 %vm562_vm1, %v3703_v51  ;;  %v3836_v51 = vld [vmem:[#allocation2 + $0x38] sm:$0xff] }
 0x35e   : > { %7757 = vmatmul.mubr.msk.bf16.gmra.mrb[12].mxu0 %vm562_vm1, %v3704_v59 }
 0x429   : > { %v7754_v48 = vpop.f32.mrb[8].mxu0 }
 0x42a   : > { %v3817_v54 = vadd.f32 %v7754_v48, %v6936_v14  ;;  %v3768_v13 = vpop.f32.mrb[9].mxu0 }
 0x42b   : > { %v3815_v11 = vadd.f32 %v6936_v14, %v3768_v13  ;;  %v7755_v3 = vpop.f32.mrb[10].mxu0 }
 0x42c   : > { %v3825_v47 = vmax.f32 %v3817_v54, 0.0  ;;  %v3818_v61 = vadd.f32 %v7755_v3, %v6936_v14  ;;  %v3771_v63 = vpop.f32.mrb[11].mxu0  ;;  %v8401_v54 = vld [vmem:[%s10239_s1 + $0x1d0] sm:$0xff]  }
 0x42d   : > { %v3823_v0 = vmax.f32 %v3815_v11, 0.0  ;;  %v3816_v38 = vadd.f32 %v6936_v14, %v3771_v63 }
 0x42e   : > { %v3841_v17 = vadd.f32 %v3833_v12, %v3825_v47  ;;  %v3826_v1 = vmax.f32 %v3818_v61, 0.0 }
 0x42f   : > { %v3839_v50 = vadd.f32 %v3831_v18, %v3823_v0  ;;  %v3824_v8 = vmax.f32 %v3816_v38, 0.0 }
 0x430   : > { %3849 = vst.msk [vmem:[#allocation2 + $0x20] sm:$0xff] %vm562_vm1, %v3841_v17  ;;  %v3842_v9 = vadd.f32 %v3834_v7, %v3826_v1 }
 0x431   : > { %3847 = vst.msk [vmem:[#allocation2 + $0x10] sm:$0xff] %vm562_vm1, %v3839_v50  ;;  %v3840_v49 = vadd.f32 %v3832_v42, %v3824_v8  ;;  %v7758_v39 = vpop.f32.mrb[12].mxu0 }
 0x432   : > { %3850 = vst.msk [vmem:[#allocation2 + $0x28] sm:$0xff] %vm562_vm1, %v3842_v9  ;;  %v3821_v5 = vadd.f32 %v7758_v39, %v6936_v14  ;;  %v3784_v41 = vpop.f32.mrb[13].mxu0 }
 0x433   : > { %3848 = vst.msk [vmem:[#allocation2 + $0x18] sm:$0xff] %vm562_vm1, %v3840_v49  ;;  %v3819_v57 = vadd.f32 %v6936_v14, %v3784_v41  ;;  %v7759_v52 = vpop.f32.mrb[14].mxu0  ;;  %v8402_v49 = vld [vmem:[%s10239_s1 + $0x1d8] sm:$0xff]  }
 0x434   : > { %v3829_v56 = vmax.f32 %v3821_v5, 0.0  ;;  %v3822_v62 = vadd.f32 %v7759_v52, %v6936_v14  ;;  %v3787_v15 = vpop.f32.mrb[15].mxu0 }
 0x435   : > { %v3827_v6 = vmax.f32 %v3819_v57, 0.0  ;;  %v3820_v44 = vadd.f32 %v6936_v14, %v3787_v15  ;;  %v3855_v14 = vld [vmem:[#allocation2 + $0x7] sm:$0xff] }
 0x436   : > { %v3845_v55 = vadd.f32 %v3837_v16, %v3829_v56  ;;  %v3830_v58 = vmax.f32 %v3822_v62, 0.0  ;;  %v3863_v3 = vmul.f32 %v8561_v19, %v3855_v14  ;;  %v8403_v15 = vld [vmem:[%s10239_s1 + $0x1e0] sm:$0xff]  }
 0x437   : > { %v3843_v2 = vadd.f32 %v3835_v40, %v3827_v6  ;;  %v3828_v10 = vmax.f32 %v3820_v44, 0.0  ;;  %v9441_v45 = vld [vmem:[#allocation2 + $0x20] sm:$0xff] }
 0x438   : > { %3853 = vst.msk [vmem:[#allocation2 + $0x40] sm:$0xff] %vm562_vm1, %v3845_v55  ;;  %v3846_v43 = vadd.f32 %v3830_v58, %v9066_v46  ;;  %v9434_v35 = vld [vmem:[#allocation2 + $0x10] sm:$0xff] }
 0x439   : > { %3851 = vst.msk [vmem:[#allocation2 + $0x30] sm:$0xff] %vm562_vm1, %v3843_v2  ;;  %v3844_v53 = vadd.f32 %v3836_v51, %v3828_v10  ;;  %v3888_v4 = vpack.c.bf16 %v9434_v35, %v3880_v36  ;;  %v9454_v48 = vld [vmem:[#allocation2 + $0xf] sm:$0xff]  ;;  %v9493_v7 = vld [vmem:[#allocation2 + $0x27] sm:$0xff] }
 0x43a   : > { %3854 = vst.msk [vmem:[#allocation2 + $0x48] sm:$0xff] %vm562_vm1, %v3846_v43  ;;  %v9439_v59 = vld [vmem:[#allocation2 + $0x18] sm:$0xff]  ;;  %v9459_v13 = vld [vmem:[#allocation2 + $0x28] sm:$0xff]  ;;  %v3864_v47 = vmul.f32 %v8563_v20, %v9454_v48  ;;  %v3867_v9 = vmul.f32 %v8569_v23, %v9493_v7 }
 0x43b   : > { %3852 = vst.msk [vmem:[#allocation2 + $0x38] sm:$0xff] %vm562_vm1, %v3844_v53  ;;  %7764 = vmatprep.mubr.msk.bf16.mxu1 %vm562_vm1, %v3888_v4  ;;  %v9447_v46 = vpack.c.bf16 %v9441_v45, %v9439_v59  ;;  %v9480_v38 = vld [vmem:[#allocation2 + $0x17] sm:$0xff]  ;;  %v9482_v17 = vld [vmem:[#allocation2 + $0x1f] sm:$0xff]  ;;  %v4075_v62 = vld [vmem:[#allocation2 + $0x9] sm:$0xff] }
 0x43c   : > { %v3871_v0 = vpack.c.bf16 %v3864_v47, %v3863_v3  ;;  %v3865_v1 = vmul.f32 %v8565_v21, %v9480_v38  ;;  %v3866_v50 = vmul.f32 %v8567_v22, %v9482_v17  ;;  %v9507_v57 = vld [vmem:[#allocation2 + $0x11] sm:$0xff]  ;;  %v4083_v6 = vmul.f32 %v8577_v27, %v4075_v62  ;;  %v9520_v40 = vld [vmem:[#allocation2 + $0x19] sm:$0xff]  ;;  %v9522_v58 = vld [vmem:[#allocation2 + $0x21] sm:$0xff] }
 0x43d   : > { %7765 = vmatmul.mubr.msk.bf16.vlgmr.msra.gmra.mrb[16].mxu1 %vm562_vm1, %v9447_v46  ;;  %v4084_v16 = vmul.f32 %v8579_v28, %v9507_v57  ;;  %v4085_v2 = vmul.f32 %v8581_v29, %v9520_v40  ;;  %v4086_v10 = vmul.f32 %v8583_v30, %v9522_v58  ;;  %v8406_v62 = vld [vmem:[%s10239_s1 + $0x1f8] sm:$0xff]  }
 0x43e   : > { %7773 = vmatpush3.bf16.msra.mxu1 %v8399_v37  ;;  %v3872_v42 = vpack.c.bf16 %v3866_v50, %v3865_v1  ;;  %v8405_v1 = vld [vmem:[%s10239_s1 + $0x1f0] sm:$0xff]   ;;  %v4206_v50 = vmul.f32 %v8563_v20, %v9480_v38 }
 0x43f   : > { %7774 = vmatprep.subr.bf16.mxu1 %v8400_v60  ;;  %v9472_v37 = vld [vmem:[#allocation2 + $0x40] sm:$0xff]  ;;  %v4091_v55 = vpack.c.bf16 %v4084_v16, %v4083_v6  ;;  %v4092_v4 = vpack.c.bf16 %v4086_v10, %v4085_v2  ;;  %v4327_v10 = vpack.c.bf16 %v9439_v59, %v9434_v35  ;;  %v8409_v35 = vld [vmem:[%s10239_s1 + $0x210] sm:$0xff]  }
 0x440   : > { %v9461_v11 = vld [vmem:[#allocation2 + $0x30] sm:$0xff] }
 0x441   : > { %v9468_v61 = vpack.c.bf16 %v9461_v11, %v9459_v13  ;;  %v9486_v18 = vld [vmem:[#allocation2 + $0x2f] sm:$0xff]  ;;  %v9543_v3 = vld [vmem:[#allocation2 + $0x41] sm:$0xff] }
 0x442   : > { %v9470_v63 = vld [vmem:[#allocation2 + $0x38] sm:$0xff]  ;;  %7775 = vmatpush3.bf16.msra.mxu1 %v8400_v60  ;;  %v3868_v8 = vmul.f32 %v8571_v24, %v9486_v18  ;;  %v9532_v43 = vld [vmem:[#allocation2 + $0x29] sm:$0xff] }
 0x443   : > { %7768 = vmatprep.mubr.msk.bf16.mxu1 %vm562_vm1, %v9468_v61  ;;  %v9478_v12 = vpack.c.bf16 %v9472_v37, %v9470_v63  ;;  %7784 = vmatprep.subr.bf16.mxu1 %v8401_v54  ;;  %v9502_v5 = vld [vmem:[#allocation2 + $0x37] sm:$0xff]  ;;  %v9504_v41 = vld [vmem:[#allocation2 + $0x3f] sm:$0xff]  ;;  %v4087_v53 = vmul.f32 %v8585_v31, %v9532_v43  ;;  %v8404_v60 = vld [vmem:[%s10239_s1 + $0x1e8] sm:$0xff]  }
 0x444   : > { %v3873_v39 = vpack.c.bf16 %v3868_v8, %v3867_v9  ;;  %v3869_v52 = vmul.f32 %v8573_v25, %v9502_v5  ;;  %v3870_v56 = vmul.f32 %v8575_v26, %v9504_v41  ;;  %v9525_v36 = vld [vmem:[#allocation2 + $0x31] sm:$0xff]  ;;  %v4205_v8 = vmul.f32 %v8561_v19, %v9454_v48  ;;  %v9571_v16 = vld [vmem:[#allocation2 + $0x47] sm:$0xff] }
 0x445   : > { %7769 = vmatmul.mubr.msk.bf16.gmra.mrb[20].mxu1 %vm562_vm1, %v9478_v12  ;;  %v4088_v51 = vmul.f32 %v8587_v32, %v9525_v36  ;;  %v4211_v6 = vmul.f32 %v8573_v25, %v9504_v41  ;;  %v9598_v59 = vld [vmem:[#allocation2 + $0x48] sm:$0xff] }
 0x446   : > { %7776 = vmatprep.mubr.msk.bf16.mxu1 %vm562_vm1, %v3871_v0  ;;  %v3874_v44 = vpack.c.bf16 %v3870_v56, %v3869_v52  ;;  %v4090_v0 = vmul.f32 %v8591_v34, %v9543_v3  ;;  %v4210_v52 = vmul.f32 %v8571_v24, %v9502_v5  ;;  %v4209_v56 = vmul.f32 %v8569_v23, %v9486_v18 }
 0x447   : > { %v4093_v14 = vpack.c.bf16 %v4088_v51, %v4087_v53  ;;  %v4328_v51 = vpack.c.bf16 %v9459_v13, %v9441_v45  ;;  %v8408_v53 = vld [vmem:[%s10239_s1 + $0x208] sm:$0xff]   ;;  %10250 = vst [vmem:[#allocation5_spill] sm:$0xff] %v9598_v59  ;;  %v4441_v45 = vmul.f32 %v8577_v27, %v9507_v57  ;;  %v4442_v13 = vmul.f32 %v8579_v28, %v9520_v40 }
 0x44d   : > { %7777 = vmatmul.mubr.msk.bf16.vlgmr.msra.gmra.mrb[16].mxu1 %vm562_vm1, %v3872_v42  ;;  %v4213_v42 = vpack.c.bf16 %v4206_v50, %v4205_v8  ;;  %v4440_v50 = vld [vmem:[#allocation2 + $0x49] sm:$0xff]  ;;  %v4447_v8 = vmul.f32 %v8589_v33, %v9543_v3 }
 0x44e   : > { %7780 = vmatprep.mubr.msk.bf16.mxu1 %vm562_vm1, %v3873_v39  ;;  %7785 = vmatpush3.bf16.msra.mxu1 %v8401_v54  ;;  %v9541_v54 = vld [vmem:[#allocation2 + $0x39] sm:$0xff]  ;;  %v4208_v39 = vmul.f32 %v8567_v22, %v9493_v7 }
 0x44f   : > { %7786 = vmatprep.subr.bf16.mxu1 %v8402_v49  ;;  %v4089_v47 = vmul.f32 %v8589_v33, %v9541_v54  ;;  %v4446_v57 = vmul.f32 %v8587_v32, %v9541_v54 }
 0x451   : > { %v4094_v9 = vpack.c.bf16 %v4090_v0, %v4089_v47  ;;  %v4443_v47 = vmul.f32 %v8581_v29, %v9522_v58 }
 0x452   : > { %7787 = vmatpush3.bf16.msra.mxu1 %v8402_v49  ;;  %v4207_v49 = vmul.f32 %v8565_v21, %v9482_v17 }
 0x453   : > { %7796 = vmatprep.subr.bf16.mxu1 %v8403_v15 }
 0x454   : > { %v4214_v48 = vpack.c.bf16 %v4208_v39, %v4207_v49  ;;  %v4563_v49 = vmul.f32 %v8561_v19, %v9480_v38  ;;  %v4564_v39 = vmul.f32 %v8563_v20, %v9482_v17  ;;  %v4568_v38 = vmul.f32 %v8571_v24, %v9504_v41 }
 0x455   : > { %7781 = vmatmul.mubr.msk.bf16.gmra.mrb[20].mxu1 %vm562_vm1, %v3874_v44  ;;  %v4212_v44 = vmul.f32 %v8575_v26, %v9571_v16  ;;  %v4565_v17 = vmul.f32 %v8565_v21, %v9493_v7  ;;  %v8413_v7 = vld [vmem:[%s10239_s1 + $0x230] sm:$0xff]  }
 0x456   : > { %7788 = vmatprep.mubr.msk.bf16.mxu1 %vm562_vm1, %v4091_v55  ;;  %v8407_v55 = vld [vmem:[%s10239_s1 + $0x200] sm:$0xff]  }
 0x457   : > { %v4216_v2 = vpack.c.bf16 %v4212_v44, %v4211_v6  ;;  %v8412_v6 = vld [vmem:[%s10239_s1 + $0x228] sm:$0xff]  }
 0x45d   : > { %7789 = vmatmul.mubr.msk.bf16.vlgmr.msra.gmra.mrb[16].mxu1 %vm562_vm1, %v4092_v4  ;;  %v4329_v4 = vpack.c.bf16 %v9470_v63, %v9461_v11  ;;  %v4330_v11 = vpack.c.bf16 %v9598_v59, %v9472_v37  ;;  %v4449_v63 = vpack.c.bf16 %v4442_v13, %v4441_v45  ;;  %v8410_v37 = vld [vmem:[%s10239_s1 + $0x218] sm:$0xff]   ;;  %v4805_v13 = vmul.f32 %v8589_v33, %v4440_v50 }
 0x45e   : > { %7792 = vmatprep.mubr.msk.bf16.mxu1 %vm562_vm1, %v4093_v14  ;;  %7797 = vmatpush3.bf16.msra.mxu1 %v8403_v15  ;;  %v4215_v15 = vpack.c.bf16 %v4210_v52, %v4209_v56  ;;  %v4445_v14 = vmul.f32 %v8585_v31, %v9525_v36  ;;  %v4571_v56 = vpack.c.bf16 %v4564_v39, %v4563_v49  ;;  %v4798_v45 = vld [vmem:[#allocation2 + $0x51] sm:$0xff] }
 0x45f   : > { %7798 = vmatprep.subr.bf16.mxu1 %v8404_v60 }
 0x462   : > { %7799 = vmatpush3.bf16.msra.mxu1 %v8404_v60  ;;  %v4444_v60 = vmul.f32 %v8583_v30, %v9532_v43 }
 0x463   : > { %7808 = vmatprep.subr.bf16.mxu1 %v8405_v1 }
 0x464   : > { %v4450_v0 = vpack.c.bf16 %v4444_v60, %v4443_v47 }
 0x465   : > { %7793 = vmatmul.mubr.msk.bf16.gmra.mrb[20].mxu1 %vm562_vm1, %v4094_v9  ;;  %v4448_v9 = vmul.f32 %v8591_v34, %v4440_v50 }
 0x466   : > { %7800 = vmatprep.mubr.msk.bf16.mxu1 %vm562_vm1, %v4213_v42  ;;  %v8411_v42 = vld [vmem:[%s10239_s1 + $0x220] sm:$0xff]  }
 0x467   : > { %v4452_v52 = vpack.c.bf16 %v4448_v9, %v4447_v8 }
 0x46d   : > { %7801 = vmatmul.mubr.msk.bf16.vlgmr.msra.gmra.mrb[16].mxu1 %vm562_vm1, %v4214_v48  ;;  %v4566_v48 = vmul.f32 %v8567_v22, %v9486_v18  ;;  %v4569_v18 = vmul.f32 %v8573_v25, %v9571_v16  ;;  %v4684_v16 = vld [vmem:[#allocation2 + $0x50] sm:$0xff] }
 0x46e   : > { %7804 = vmatprep.mubr.msk.bf16.mxu1 %vm562_vm1, %v4215_v15  ;;  %7809 = vmatpush3.bf16.msra.mxu1 %v8405_v1  ;;  %v4451_v1 = vpack.c.bf16 %v4446_v57, %v4445_v14 }
 0x46f   : > { %7810 = vmatprep.subr.bf16.mxu1 %v8406_v62  ;;  %v4572_v15 = vpack.c.bf16 %v4566_v48, %v4565_v17 }
 0x472   : > { %7811 = vmatpush3.bf16.msra.mxu1 %v8406_v62  ;;  %v4567_v62 = vmul.f32 %v8569_v23, %v9502_v5 }
 0x473   : > { %7820 = vmatprep.subr.bf16.mxu1 %v8407_v55 }
 0x474   : > { %v4573_v44 = vpack.c.bf16 %v4568_v38, %v4567_v62 }
 0x475   : > { %7805 = vmatmul.mubr.msk.bf16.gmra.mrb[20].mxu1 %vm562_vm1, %v4216_v2  ;;  %v8414_v2 = vld [vmem:[%s10239_s1 + $0x238] sm:$0xff]  }
 0x476   : > { %7812 = vmatprep.mubr.msk.bf16.mxu1 %vm562_vm1, %v4327_v10  ;;  %v4799_v10 = vmul.f32 %v8577_v27, %v9520_v40  ;;  %v4804_v40 = vmul.f32 %v8587_v32, %v9543_v3  ;;  %v8417_v3 = vld [vmem:[%s10239_s1 + $0x240] sm:$0xff]  }
 0x47d   : > { %7813 = vmatmul.mubr.msk.bf16.vlgmr.msra.gmra.mrb[16].mxu1 %vm562_vm1, %v4328_v51  ;;  %v4800_v51 = vmul.f32 %v8579_v28, %v9522_v58  ;;  %v4801_v58 = vmul.f32 %v8581_v29, %v9532_v43  ;;  %v8416_v43 = vld [vmem:[%s10239_s1 + $0x258] sm:$0xff]  }
 0x47e   : > { %7816 = vmatprep.mubr.msk.bf16.mxu1 %vm562_vm1, %v4329_v4  ;;  %7821 = vmatpush3.bf16.msra.mxu1 %v8407_v55  ;;  %v4562_v55 = vld [vmem:[#allocation2 + $0x4f] sm:$0xff] }
 0x47f   : > { %7822 = vmatprep.subr.bf16.mxu1 %v8408_v53  ;;  %v4570_v5 = vmul.f32 %v8575_v26, %v4562_v55 }
 0x481   : > { %v4574_v41 = vpack.c.bf16 %v4570_v5, %v4569_v18 }
 0x482   : > { %7823 = vmatpush3.bf16.msra.mxu1 %v8408_v53  ;;  %v4807_v53 = vpack.c.bf16 %v4800_v51, %v4799_v10  ;;  %v8418_v51 = vld [vmem:[%s10239_s1 + $0x248] sm:$0xff]  }
 0x483   : > { %7832 = vmatprep.subr.bf16.mxu1 %v8409_v35 }
 0x485   : > { %7817 = vmatmul.mubr.msk.bf16.gmra.mrb[20].mxu1 %vm562_vm1, %v4330_v11 }
 0x486   : > { %7824 = vmatprep.mubr.msk.bf16.mxu1 %vm562_vm1, %v4449_v63  ;;  %v7028_v63 = vld [vmem:[%s10240_s2 + $0x3] ss:$0 sm:$0xff] }
 0x48d   : > { %7825 = vmatmul.mubr.msk.bf16.vlgmr.msra.gmra.mrb[16].mxu1 %vm562_vm1, %v4450_v0 }
 0x48e   : > { %7828 = vmatprep.mubr.msk.bf16.mxu1 %vm562_vm1, %v4451_v1  ;;  %7833 = vmatpush3.bf16.msra.mxu1 %v8409_v35 }
 0x48f   : > { %7834 = vmatprep.subr.bf16.mxu1 %v8410_v37 }
 0x492   : > { %7835 = vmatpush3.bf16.msra.mxu1 %v8410_v37 }
 0x493   : > { %7844 = vmatprep.subr.bf16.mxu1 %v8411_v42 }
 0x495   : > { %7829 = vmatmul.mubr.msk.bf16.gmra.mrb[20].mxu1 %vm562_vm1, %v4452_v52 }
 0x496   : > { %7836 = vmatprep.mubr.msk.bf16.mxu1 %vm562_vm1, %v4571_v56 }
 0x49d   : > { %7837 = vmatmul.mubr.msk.bf16.vlgmr.msra.gmra.mrb[16].mxu1 %vm562_vm1, %v4572_v15 }
 0x49e   : > { %7840 = vmatprep.mubr.msk.bf16.mxu1 %vm562_vm1, %v4573_v44  ;;  %7845 = vmatpush3.bf16.msra.mxu1 %v8411_v42 }
 0x49f   : > { %7846 = vmatprep.subr.bf16.mxu1 %v8412_v6 }
 0x4a2   : > { %7847 = vmatpush3.bf16.msra.mxu1 %v8412_v6  ;;  %v4970_v6 = vld [vmem:[#allocation3 + $0x8] sm:$0xff] }
 0x4a3   : > { %7856 = vmatprep.subr.bf16.mxu1 %v8413_v7 }
 0x4a5   : > { %7841 = vmatmul.mubr.msk.bf16.gmra.mrb[20].mxu1 %vm562_vm1, %v4574_v41 }
 0x4a6   : > { %7848 = vmatprep.mubr.msk.bf16.mxu1 %vm562_vm1, %v9447_v46  ;;  %v4688_v46 = vpack.c.bf16 %v4684_v16, %v9598_v59 }
 0x4ad   : > { %7849 = vmatmul.mubr.msk.bf16.vlgmr.msra.gmra.mrb[16].mxu1 %vm562_vm1, %v9468_v61  ;;  %v4802_v61 = vmul.f32 %v8583_v30, %v9525_v36  ;;  %v4806_v36 = vmul.f32 %v8591_v34, %v4798_v45 }
 0x4ae   : > { %7852 = vmatprep.mubr.msk.bf16.mxu1 %vm562_vm1, %v9478_v12  ;;  %7857 = vmatpush3.bf16.msra.mxu1 %v8413_v7  ;;  %v4803_v12 = vmul.f32 %v8585_v31, %v9541_v54  ;;  %v8415_v54 = vld [vmem:[%s10239_s1 + $0x250] sm:$0xff]  }
 0x4af   : > { %7858 = vmatprep.subr.bf16.mxu1 %v8414_v2  ;;  %v4808_v4 = vpack.c.bf16 %v4802_v61, %v4801_v58  ;;  %v4810_v11 = vpack.c.bf16 %v4806_v36, %v4805_v13  ;;  %7868 = vmatprep.subr.bf16.mxu0 %v8415_v54  ;;  %v8419_v61 = vld [vmem:[%s10239_s1 + $0x260] sm:$0xff]  }
 0x4b0   : > { %v4809_v35 = vpack.c.bf16 %v4804_v40, %v4803_v12  ;;  %7869 = vmatpush3.bf16.msra.mxu0 %v8415_v54 }
 0x4b1   : > { %7870 = vmatprep.subr.bf16.mxu0 %v8416_v43 }
 0x4b2   : > { %7859 = vmatpush3.bf16.msra.mxu1 %v8414_v2 }
 0x4b4   : > { %7871 = vmatpush3.bf16.msra.mxu0 %v8416_v43 }
 0x4b5   : > { %7853 = vmatmul.mubr.msk.bf16.gmra.mrb[20].mxu1 %vm562_vm1, %v4688_v46  ;;  %7880 = vmatprep.subr.bf16.mxu0 %v8417_v3  ;;  %v4945_v46 = vld [vmem:[#allocation3 + $0x7] sm:$0xff] }
 0x4b6   : > { %7860 = vmatprep.mubr.msk.bf16.mxu1 %vm562_vm1, %v4807_v53  ;;  %v4953_v58 = vmul.f32 %v8561_v19, %v4945_v46 }
 0x4bd   : > { %7861 = vmatmul.mubr.msk.bf16.vlgmr.msra.gmra.mrb[16].mxu1 %vm562_vm1, %v4808_v4 }
 0x4be   : > { %7864 = vmatprep.mubr.msk.bf16.mxu1 %vm562_vm1, %v4809_v35 }
 0x4c5   : > { %7865 = vmatmul.mubr.msk.bf16.gmra.mrb[20].mxu1 %vm562_vm1, %v4810_v11 }
 0x590   : > { %v7862_v60 = vpop.f32.mrb[16].mxu1 }
 0x591   : > { %v4923_v14 = vadd.f32 %v7862_v60, %v7028_v63  ;;  %v4874_v57 = vpop.f32.mrb[17].mxu1 }
 0x592   : > { %v4921_v47 = vadd.f32 %v7028_v63, %v4874_v57  ;;  %v7863_v0 = vpop.f32.mrb[18].mxu1 }
 0x593   : > { %v4931_v37 = vmax.f32 %v4923_v14, 0.0  ;;  %v4924_v1 = vadd.f32 %v7863_v0, %v7028_v63  ;;  %v4877_v50 = vpop.f32.mrb[19].mxu1 }
 0x594   : > { %v4929_v8 = vmax.f32 %v4921_v47, 0.0  ;;  %v4922_v9 = vadd.f32 %v7028_v63, %v4877_v50 }
 0x595   : > { %4939 = vst.msk [vmem:[#allocation3 + $0x20] sm:$0xff] %vm562_vm1, %v4931_v37  ;;  %v4932_v42 = vmax.f32 %v4924_v1, 0.0 }
 0x596   : > { %4937 = vst.msk [vmem:[#allocation3 + $0x10] sm:$0xff] %vm562_vm1, %v4929_v8  ;;  %v4930_v49 = vmax.f32 %v4922_v9, 0.0 }
 0x597   : > { %4940 = vst.msk [vmem:[#allocation3 + $0x28] sm:$0xff] %vm562_vm1, %v4932_v42 }
 0x598   : > { %4938 = vst.msk [vmem:[#allocation3 + $0x18] sm:$0xff] %vm562_vm1, %v4930_v49  ;;  %v7866_v39 = vpop.f32.mrb[20].mxu1 }
 0x599   : > { %v4927_v52 = vadd.f32 %v7866_v39, %v7028_v63  ;;  %v4890_v56 = vpop.f32.mrb[21].mxu1 }
 0x59a   : > { %v4925_v48 = vadd.f32 %v7028_v63, %v4890_v56  ;;  %v7867_v62 = vpop.f32.mrb[22].mxu1 }
 0x59b   : > { %v4935_v38 = vmax.f32 %v4927_v52, 0.0  ;;  %v4928_v17 = vadd.f32 %v7867_v62, %v7028_v63  ;;  %v4893_v15 = vpop.f32.mrb[23].mxu1 }
 0x59c   : > { %v4933_v44 = vmax.f32 %v4925_v48, 0.0  ;;  %v4926_v55 = vadd.f32 %v7028_v63, %v4893_v15  ;;  %v9706_v16 = vld [vmem:[#allocation3 + $0x20] sm:$0xff] }
 0x59d   : > { %4943 = vst.msk [vmem:[#allocation3 + $0x40] sm:$0xff] %vm562_vm1, %v4935_v38  ;;  %v4936_v18 = vmax.f32 %v4928_v17, 0.0  ;;  %v9699_v5 = vld [vmem:[#allocation3 + $0x10] sm:$0xff] }
 0x59e   : > { %4941 = vst.msk [vmem:[#allocation3 + $0x30] sm:$0xff] %vm562_vm1, %v4933_v44  ;;  %v4934_v7 = vmax.f32 %v4926_v55, 0.0  ;;  %v4978_v41 = vpack.c.bf16 %v9699_v5, %v4970_v6  ;;  %v9719_v53 = vld [vmem:[#allocation3 + $0xf] sm:$0xff]  ;;  %v9753_v60 = vld [vmem:[#allocation3 + $0x27] sm:$0xff] }
 0x59f   : > { %4944 = vst.msk [vmem:[#allocation3 + $0x48] sm:$0xff] %vm562_vm1, %v4936_v18  ;;  %v9704_v2 = vld [vmem:[#allocation3 + $0x18] sm:$0xff]  ;;  %v9724_v12 = vld [vmem:[#allocation3 + $0x28] sm:$0xff]  ;;  %v4954_v4 = vmul.f32 %v8563_v20, %v9719_v53  ;;  %v9786_v42 = vmul.f32 %v8565_v21, %v9753_v60  ;;  %v4957_v6 = vmul.f32 %v8569_v23, %v9753_v60 }
 0x5a0   : > { %4942 = vst.msk [vmem:[#allocation3 + $0x38] sm:$0xff] %vm562_vm1, %v4934_v7  ;;  %7872 = vmatprep.mubr.msk.bf16.mxu0 %vm562_vm1, %v4978_v41  ;;  %v9712_v10 = vpack.c.bf16 %v9706_v16, %v9704_v2  ;;  %v9735_v45 = vld [vmem:[#allocation3 + $0x17] sm:$0xff]  ;;  %v9737_v13 = vld [vmem:[#allocation3 + $0x1f] sm:$0xff]  ;;  %v8420_v7 = vld [vmem:[%s10239_s1 + $0x268] sm:$0xff]  }
 0x5a1   : > { %v9749_v43 = vld [vmem:[#allocation3 + $0x19] sm:$0xff]  ;;  %v4961_v63 = vpack.c.bf16 %v4954_v4, %v4953_v58  ;;  %v9757_v14 = vmul.f32 %v8561_v19, %v9735_v45  ;;  %v9761_v57 = vmul.f32 %v8563_v20, %v9737_v13  ;;  %v4955_v8 = vmul.f32 %v8565_v21, %v9735_v45  ;;  %v5165_v41 = vld [vmem:[#allocation3 + $0x9] sm:$0xff] }
 0x5a2   : > { %7873 = vmatmul.mubr.msk.bf16.vlgmr.msra.gmra.mrb[16].mxu0 %vm562_vm1, %v9712_v10  ;;  %v9774_v1 = vmul.f32 %v8577_v27, %v9749_v43  ;;  %v4956_v9 = vmul.f32 %v8567_v22, %v9737_v13  ;;  %v5175_v44 = vmul.f32 %v8581_v29, %v9749_v43 }
 0x5a3   : > { %7881 = vmatpush3.bf16.msra.mxu0 %v8417_v3  ;;  %v9751_v3 = vld [vmem:[#allocation3 + $0x21] sm:$0xff] }
 0x5a4   : > { %7882 = vmatprep.subr.bf16.mxu0 %v8418_v51  ;;  %v9741_v11 = vld [vmem:[#allocation3 + $0x40] sm:$0xff]  ;;  %v9778_v50 = vmul.f32 %v8579_v28, %v9751_v3  ;;  %v4962_v18 = vpack.c.bf16 %v4956_v9, %v4955_v8  ;;  %v9840_v8 = vld [vmem:[#allocation3 + $0x11] sm:$0xff]  ;;  %v5176_v56 = vmul.f32 %v8583_v30, %v9751_v3 }
 0x5a5   : > { %v9726_v40 = vld [vmem:[#allocation3 + $0x30] sm:$0xff]  ;;  %v5174_v9 = vmul.f32 %v8579_v28, %v9840_v8 }
 0x5a6   : > { %v9733_v35 = vpack.c.bf16 %v9726_v40, %v9724_v12  ;;  %v9765_v47 = vld [vmem:[#allocation3 + $0x2f] sm:$0xff]  ;;  %v9806_v17 = vld [vmem:[#allocation3 + $0x41] sm:$0xff] }
 0x5a7   : > { %v9739_v36 = vld [vmem:[#allocation3 + $0x38] sm:$0xff]  ;;  %7883 = vmatpush3.bf16.msra.mxu0 %v8418_v51  ;;  %v4958_v49 = vmul.f32 %v8571_v24, %v9765_v47  ;;  %v9790_v39 = vld [vmem:[#allocation3 + $0x29] sm:$0xff]  ;;  %v9798_v48 = vmul.f32 %v8567_v22, %v9765_v47 }
 0x5a8   : > { %7876 = vmatprep.mubr.msk.bf16.mxu0 %vm562_vm1, %v9733_v35  ;;  %v9747_v54 = vpack.c.bf16 %v9741_v11, %v9739_v36  ;;  %7892 = vmatprep.subr.bf16.mxu0 %v8419_v61  ;;  %v9767_v0 = vld [vmem:[#allocation3 + $0x37] sm:$0xff]  ;;  %v9770_v37 = vld [vmem:[#allocation3 + $0x3f] sm:$0xff]  ;;  %v9825_v51 = vmul.f32 %v8581_v29, %v9790_v39 }
 0x5a9   : > { %v9792_v52 = vld [vmem:[#allocation3 + $0x31] sm:$0xff]  ;;  %v9802_v62 = vmul.f32 %v8569_v23, %v9767_v0  ;;  %v9804_v38 = vld [vmem:[#allocation3 + $0x39] sm:$0xff]  ;;  %v9810_v15 = vmul.f32 %v8571_v24, %v9770_v37  ;;  %v4963_v58 = vpack.c.bf16 %v4958_v49, %v4957_v6  ;;  %v4959_v6 = vmul.f32 %v8573_v25, %v9767_v0 }
 0x5aa   : > { %7877 = vmatmul.mubr.msk.bf16.gmra.mrb[20].mxu0 %vm562_vm1, %v9747_v54  ;;  %v9829_v46 = vmul.f32 %v8583_v30, %v9792_v52  ;;  %v9833_v4 = vmul.f32 %v8585_v31, %v9804_v38  ;;  %v4960_v55 = vmul.f32 %v8575_v26, %v9770_v37  ;;  %v5178_v59 = vmul.f32 %v8587_v32, %v9792_v52 }
 0x5ab   : > { %7884 = vmatprep.mubr.msk.bf16.mxu0 %vm562_vm1, %v4961_v63  ;;  %v9837_v63 = vmul.f32 %v8587_v32, %v9806_v17 }
 0x5b2   : > { %7885 = vmatmul.mubr.msk.bf16.vlgmr.msra.gmra.mrb[16].mxu0 %vm562_vm1, %v4962_v18  ;;  %v8421_v18 = vld [vmem:[%s10239_s1 + $0x270] sm:$0xff]  }
 0x5b3   : > { %7888 = vmatprep.mubr.msk.bf16.mxu0 %vm562_vm1, %v4963_v58  ;;  %7893 = vmatpush3.bf16.msra.mxu0 %v8419_v61  ;;  %v5173_v61 = vmul.f32 %v8577_v27, %v5165_v41  ;;  %v4964_v58 = vpack.c.bf16 %v4960_v55, %v4959_v6  ;;  %v5182_v41 = vpack.c.bf16 %v5176_v56, %v5175_v44  ;;  %v8422_v55 = vld [vmem:[%s10239_s1 + $0x278] sm:$0xff]   ;;  %v8423_v56 = vld [vmem:[%s10239_s1 + $0x280] sm:$0xff]  }
 0x5b4   : > { %7894 = vmatprep.subr.bf16.mxu0 %v8420_v7  ;;  %v5180_v6 = vmul.f32 %v8591_v34, %v9806_v17  ;;  %v5296_v44 = vmul.f32 %v8563_v20, %v9735_v45  ;;  %v5300_v20 = vmul.f32 %v8571_v24, %v9767_v0  ;;  %v5299_v45 = vmul.f32 %v8569_v23, %v9765_v47  ;;  %v8425_v23 = vld [vmem:[%s10239_s1 + $0x290] sm:$0xff]   ;;  %v8426_v47 = vld [vmem:[%s10239_s1 + $0x298] sm:$0xff]  }
 0x5b5   : > { %v5181_v49 = vpack.c.bf16 %v5174_v9, %v5173_v61  ;;  %v5419_v0 = vpack.c.bf16 %v9739_v36, %v9726_v40 }
 0x5b7   : > { %7895 = vmatpush3.bf16.msra.mxu0 %v8420_v7  ;;  %v5177_v7 = vmul.f32 %v8585_v31, %v9790_v39 }
 0x5b8   : > { %7904 = vmatprep.subr.bf16.mxu0 %v8421_v18 }
 0x5b9   : > { %v5183_v9 = vpack.c.bf16 %v5178_v59, %v5177_v7  ;;  %v5295_v59 = vmul.f32 %v8561_v19, %v9719_v53  ;;  %v5298_v7 = vmul.f32 %v8567_v22, %v9753_v60  ;;  %v8424_v53 = vld [vmem:[%s10239_s1 + $0x288] sm:$0xff]   ;;  %v5418_v60 = vpack.c.bf16 %v9724_v12, %v9706_v16 }
 0x5ba   : > { %7889 = vmatmul.mubr.msk.bf16.gmra.mrb[20].mxu0 %vm562_vm1, %v4964_v58  ;;  %v5297_v58 = vmul.f32 %v8565_v21, %v9737_v13  ;;  %v5301_v21 = vmul.f32 %v8573_v25, %v9770_v37  ;;  %v5417_v13 = vpack.c.bf16 %v9704_v2, %v9699_v5  ;;  %v8427_v5 = vld [vmem:[%s10239_s1 + $0x2a0] sm:$0xff]   ;;  %v5416_v2 = vld [vmem:[#allocation3 + $0x48] sm:$0xff]  ;;  %v5531_v16 = vmul.f32 %v8577_v27, %v9840_v8 }
 0x5bb   : > { %7896 = vmatprep.mubr.msk.bf16.mxu0 %vm562_vm1, %v5181_v49  ;;  %v5179_v49 = vmul.f32 %v8589_v33, %v9804_v38  ;;  %v5532_v12 = vmul.f32 %v8579_v28, %v9749_v43  ;;  %v5420_v40 = vpack.c.bf16 %v5416_v2, %v9741_v11  ;;  %v5534_v37 = vmul.f32 %v8583_v30, %v9790_v39  ;;  %v8428_v11 = vld [vmem:[%s10239_s1 + $0x2a8] sm:$0xff]   ;;  %v8430_v39 = vld [vmem:[%s10239_s1 + $0x2b8] sm:$0xff]  }
 0x5bc   : > { %v5304_v19 = vpack.c.bf16 %v5298_v7, %v5297_v58  ;;  %v5536_v27 = vmul.f32 %v8587_v32, %v9804_v38  ;;  %v5533_v28 = vmul.f32 %v8581_v29, %v9751_v3  ;;  %v5537_v30 = vmul.f32 %v8589_v33, %v9806_v17  ;;  %v8429_v29 = vld [vmem:[%s10239_s1 + $0x2b0] sm:$0xff]   ;;  %v6029_v58 = vld [vmem:[#allocation2 + $0x20] sm:$0xff] }
 0x5bd   : > { %v5184_v61 = vpack.c.bf16 %v5180_v6, %v5179_v49  ;;  %v5539_v36 = vpack.c.bf16 %v5532_v12, %v5531_v16  ;;  %v5530_v49 = vld [vmem:[#allocation3 + $0x49] sm:$0xff]  ;;  %v10251_v3 = vpack.c.bf16 %v9761_v57, %v9757_v14  ;;  %v10252_v38 = vpack.c.bf16 %v9798_v48, %v9786_v42  ;;  %v8431_v6 = vld [vmem:[%s10239_s1 + $0x2c0] sm:$0xff]   ;;  %v5888_v48 = vld [vmem:[#allocation3 + $0x51] sm:$0xff] }
 0x5be   : > { %v5540_v43 = vpack.c.bf16 %v5534_v37, %v5533_v28  ;;  %v10253_v17 = vpack.c.bf16 %v9810_v15, %v9802_v62  ;;  %v8432_v42 = vld [vmem:[%s10239_s1 + $0x2c8] sm:$0xff]   ;;  %v10255_v62 = vpack.c.bf16 %v9829_v46, %v9825_v51  ;;  %v5896_v15 = vmul.f32 %v8591_v34, %v5888_v48 }
 0x5c2   : > { %7897 = vmatmul.mubr.msk.bf16.vlgmr.msra.gmra.mrb[16].mxu0 %vm562_vm1, %v5182_v41  ;;  %v5305_v41 = vpack.c.bf16 %v5300_v20, %v5299_v45 }
 0x5c3   : > { %7900 = vmatprep.mubr.msk.bf16.mxu0 %vm562_vm1, %v5183_v9  ;;  %7905 = vmatpush3.bf16.msra.mxu0 %v8421_v18  ;;  %v5303_v18 = vpack.c.bf16 %v5296_v44, %v5295_v59  ;;  %v5535_v9 = vmul.f32 %v8585_v31, %v9792_v52  ;;  %v5538_v31 = vmul.f32 %v8591_v34, %v5530_v49  ;;  %v5652_v52 = vld [vmem:[#allocation3 + $0x4f] sm:$0xff] }
 0x5c4   : > { %7906 = vmatprep.subr.bf16.mxu0 %v8422_v55  ;;  %v5660_v57 = vmul.f32 %v8575_v26, %v5652_v52 }
 0x5c5   : > { %v5541_v8 = vpack.c.bf16 %v5536_v27, %v5535_v9  ;;  %v5542_v32 = vpack.c.bf16 %v5538_v31, %v5537_v30  ;;  %v6031_v27 = vld [vmem:[#allocation2 + $0x30] sm:$0xff]  ;;  %v6032_v30 = vld [vmem:[#allocation2 + $0x38] sm:$0xff] }
 0x5c7   : > { %7907 = vmatpush3.bf16.msra.mxu0 %v8422_v55  ;;  %v5294_v55 = vld [vmem:[#allocation3 + $0x47] sm:$0xff] }
 0x5c8   : > { %7916 = vmatprep.subr.bf16.mxu0 %v8423_v56  ;;  %v5302_v22 = vmul.f32 %v8575_v26, %v5294_v55  ;;  %v5659_v14 = vmul.f32 %v8573_v25, %v5294_v55  ;;  %v5774_v25 = vld [vmem:[#allocation3 + $0x50] sm:$0xff]  ;;  %v6030_v55 = vld [vmem:[#allocation2 + $0x28] sm:$0xff] }
 0x5c9   : > { %v5778_v26 = vpack.c.bf16 %v5774_v25, %v5416_v2  ;;  %v7121_v25 = vld [vmem:[%s10242_s4] ss:$0 sm:$0xff] }
 0x5ca   : > { %7901 = vmatmul.mubr.msk.bf16.gmra.mrb[20].mxu0 %vm562_vm1, %v5184_v61  ;;  %v5306_v24 = vpack.c.bf16 %v5302_v22, %v5301_v21 }
 0x5cb   : > { %7908 = vmatprep.mubr.msk.bf16.mxu0 %vm562_vm1, %v5303_v18 }
 0x5d2   : > { %7909 = vmatmul.mubr.msk.bf16.vlgmr.msra.gmra.mrb[16].mxu0 %vm562_vm1, %v5304_v19  ;;  %v6027_v19 = vld [vmem:[#allocation2 + $0x10] sm:$0xff] }
 0x5d3   : > { %7912 = vmatprep.mubr.msk.bf16.mxu0 %vm562_vm1, %v5305_v41  ;;  %7917 = vmatpush3.bf16.msra.mxu0 %v8423_v56  ;;  %v5664_v56 = vpack.c.bf16 %v5660_v57, %v5659_v14 }
 0x5d4   : > { %7918 = vmatprep.subr.bf16.mxu0 %v8424_v53 }
 0x5d7   : > { %7919 = vmatpush3.bf16.msra.mxu0 %v8424_v53 }
 0x5d8   : > { %7928 = vmatprep.subr.bf16.mxu0 %v8425_v23 }
 0x5da   : > { %7913 = vmatmul.mubr.msk.bf16.gmra.mrb[20].mxu0 %vm562_vm1, %v5306_v24 }
 0x5db   : > { %7920 = vmatprep.mubr.msk.bf16.mxu0 %vm562_vm1, %v5417_v13 }
 0x5e2   : > { %7921 = vmatmul.mubr.msk.bf16.vlgmr.msra.gmra.mrb[16].mxu0 %vm562_vm1, %v5418_v60 }
 0x5e3   : > { %7924 = vmatprep.mubr.msk.bf16.mxu0 %vm562_vm1, %v5419_v0  ;;  %7929 = vmatpush3.bf16.msra.mxu0 %v8425_v23  ;;  %v6028_v23 = vld [vmem:[#allocation2 + $0x18] sm:$0xff] }
 0x5e4   : > { %7930 = vmatprep.subr.bf16.mxu0 %v8426_v47 }
 0x5e7   : > { %7931 = vmatpush3.bf16.msra.mxu0 %v8426_v47 }
 0x5e8   : > { %7940 = vmatprep.subr.bf16.mxu0 %v8427_v5 }
 0x5ea   : > { %7925 = vmatmul.mubr.msk.bf16.gmra.mrb[20].mxu0 %vm562_vm1, %v5420_v40  ;;  %v6033_v40 = vld [vmem:[#allocation2 + $0x40] sm:$0xff] }
 0x5eb   : > { %7932 = vmatprep.mubr.msk.bf16.mxu0 %vm562_vm1, %v5539_v36 }
 0x5f2   : > { %7933 = vmatmul.mubr.msk.bf16.vlgmr.msra.gmra.mrb[16].mxu0 %vm562_vm1, %v5540_v43 }
 0x5f3   : > { %7936 = vmatprep.mubr.msk.bf16.mxu0 %vm562_vm1, %v5541_v8  ;;  %7941 = vmatpush3.bf16.msra.mxu0 %v8427_v5  ;;  %v10257_v8 = vld [vmem:[#allocation5_spill] sm:$0xff] }
 0x5f4   : > { %7942 = vmatprep.subr.bf16.mxu0 %v8428_v11 }
 0x5f7   : > { %7943 = vmatpush3.bf16.msra.mxu0 %v8428_v11 }
 0x5f8   : > { %7952 = vmatprep.subr.bf16.mxu0 %v8429_v29 }
 0x5fa   : > { %7937 = vmatmul.mubr.msk.bf16.gmra.mrb[20].mxu0 %vm562_vm1, %v5542_v32 }
 0x5fb   : > { %7944 = vmatprep.mubr.msk.bf16.mxu0 %vm562_vm1, %v10251_v3 }
 0x602   : > { %7945 = vmatmul.mubr.msk.bf16.vlgmr.msra.gmra.mrb[16].mxu0 %vm562_vm1, %v10252_v38 }
 0x603   : > { %7948 = vmatprep.mubr.msk.bf16.mxu0 %vm562_vm1, %v10253_v17  ;;  %7953 = vmatpush3.bf16.msra.mxu0 %v8429_v29 }
 0x604   : > { %7954 = vmatprep.subr.bf16.mxu0 %v8430_v39 }
 0x607   : > { %7955 = vmatpush3.bf16.msra.mxu0 %v8430_v39 }
 0x608   : > { %7964 = vmatprep.subr.bf16.mxu0 %v8431_v6 }
 0x60a   : > { %7949 = vmatmul.mubr.msk.bf16.gmra.mrb[20].mxu0 %vm562_vm1, %v5664_v56 }
 0x60b   : > { %7956 = vmatprep.mubr.msk.bf16.mxu0 %vm562_vm1, %v9712_v10  ;;  %v10254_v10 = vpack.c.bf16 %v9778_v50, %v9774_v1  ;;  %v8433_v1 = vld [vmem:[%s10241_s3] sm:$0xff]   ;;  %v8434_v50 = vld [vmem:[%s10241_s3 + $0x8] sm:$0xff]  }
 0x60c   : > { %7976 = vmatprep.subr.bf16.mxu1 %v8433_v1 }
 0x60d   : > { %7977 = vmatpush3.bf16.msra.mxu1 %v8433_v1 }
 0x60e   : > { %7978 = vmatprep.subr.bf16.mxu1 %v8434_v50 }
 0x611   : > { %7979 = vmatpush3.bf16.msra.mxu1 %v8434_v50 }
 0x612   : > { %7957 = vmatmul.mubr.msk.bf16.vlgmr.msra.gmra.mrb[16].mxu0 %vm562_vm1, %v9733_v35  ;;  %v10256_v35 = vpack.c.bf16 %v9837_v63, %v9833_v4 }
 0x613   : > { %7960 = vmatprep.mubr.msk.bf16.mxu0 %vm562_vm1, %v9747_v54  ;;  %7965 = vmatpush3.bf16.msra.mxu0 %v8431_v6  ;;  %v5895_v54 = vmul.f32 %v8589_v33, %v5530_v49  ;;  %v7120_v33 = vld [vmem:[%s10240_s2 + $0x4] ss:$0 sm:$0xff] }
 0x614   : > { %7966 = vmatprep.subr.bf16.mxu0 %v8432_v42 }
 0x615   : > { %v5900_v44 = vpack.c.bf16 %v5896_v15, %v5895_v54 }
 0x617   : > { %7967 = vmatpush3.bf16.msra.mxu0 %v8432_v42 }
 0x61a   : > { %7961 = vmatmul.mubr.msk.bf16.gmra.mrb[20].mxu0 %vm562_vm1, %v5778_v26 }
 0x61b   : > { %7968 = vmatprep.mubr.msk.bf16.mxu0 %vm562_vm1, %v10254_v10 }
 0x622   : > { %7969 = vmatmul.mubr.msk.bf16.vlgmr.msra.gmra.mrb[16].mxu0 %vm562_vm1, %v10255_v62 }
 0x623   : > { %7972 = vmatprep.mubr.msk.bf16.mxu0 %vm562_vm1, %v10256_v35 }
 0x62a   : > { %7973 = vmatmul.mubr.msk.bf16.gmra.mrb[20].mxu0 %vm562_vm1, %v5900_v44 }
 0x6f5   : > { %v7970_v34 = vpop.f32.mrb[16].mxu0 }
 0x6f6   : > { %v6013_v51 = vadd.f32 %v7970_v34, %v7120_v33  ;;  %v5964_v46 = vpop.f32.mrb[17].mxu0 }
 0x6f7   : > { %v6011_v4 = vadd.f32 %v7120_v33, %v5964_v46  ;;  %v7971_v63 = vpop.f32.mrb[18].mxu0 }
 0x6f8   : > { %v6021_v59 = vmax.f32 %v6013_v51, 0.0  ;;  %v6014_v61 = vadd.f32 %v7971_v63, %v7120_v33  ;;  %v5967_v18 = vpop.f32.mrb[19].mxu0 }
 0x6f9   : > { %v6019_v7 = vmax.f32 %v6011_v4, 0.0  ;;  %v6012_v20 = vadd.f32 %v7120_v33, %v5967_v18 }
 0x6fa   : > { %v6037_v45 = vadd.f32 %v6029_v58, %v6021_v59  ;;  %v6022_v53 = vmax.f32 %v6014_v61, 0.0  ;;  %v8435_v58 = vld [vmem:[%s10243_s5] sm:$0xff]  }
 0x6fb   : > { %v6035_v41 = vadd.f32 %v6027_v19, %v6019_v7  ;;  %v6020_v21 = vmax.f32 %v6012_v20, 0.0 }
 0x6fc   : > { %6045 = vst.msk [vmem:[#allocation2 + $0x20] sm:$0xff] %vm562_vm1, %v6037_v45  ;;  %v6038_v22 = vadd.f32 %v6030_v55, %v6022_v53 }
 0x6fd   : > { %6043 = vst.msk [vmem:[#allocation2 + $0x10] sm:$0xff] %vm562_vm1, %v6035_v41  ;;  %v6036_v24 = vadd.f32 %v6028_v23, %v6020_v21  ;;  %v7974_v13 = vpop.f32.mrb[20].mxu0 }
 0x6fe   : > { %6046 = vst.msk [vmem:[#allocation2 + $0x28] sm:$0xff] %vm562_vm1, %v6038_v22  ;;  %v6017_v60 = vadd.f32 %v7974_v13, %v7120_v33  ;;  %v5980_v47 = vpop.f32.mrb[21].mxu0 }
 0x6ff   : > { %6044 = vst.msk [vmem:[#allocation2 + $0x18] sm:$0xff] %vm562_vm1, %v6036_v24  ;;  %v6015_v0 = vadd.f32 %v7120_v33, %v5980_v47  ;;  %v7975_v5 = vpop.f32.mrb[22].mxu0 }
 0x700   : > { %v6025_v2 = vmax.f32 %v6017_v60, 0.0  ;;  %v6018_v16 = vadd.f32 %v7975_v5, %v7120_v33  ;;  %v5983_v12 = vpop.f32.mrb[23].mxu0 }
 0x701   : > { %v6023_v36 = vmax.f32 %v6015_v0, 0.0  ;;  %v6016_v37 = vadd.f32 %v7120_v33, %v5983_v12 }
 0x702   : > { %v6041_v9 = vadd.f32 %v6033_v40, %v6025_v2  ;;  %v6026_v28 = vmax.f32 %v6018_v16, 0.0 }
 0x703   : > { %v6039_v43 = vadd.f32 %v6031_v27, %v6023_v36  ;;  %v6024_v11 = vmax.f32 %v6016_v37, 0.0  ;;  %v6053_v52 = vld [vmem:[#allocation2 + $0x20] sm:$0xff] }
 0x704   : > { %6049 = vst.msk [vmem:[#allocation2 + $0x40] sm:$0xff] %vm562_vm1, %v6041_v9  ;;  %v6042_v49 = vadd.f32 %v6026_v28, %v10257_v8  ;;  %v6051_v32 = vld [vmem:[#allocation2 + $0x10] sm:$0xff] }
 0x705   : > { %6047 = vst.msk [vmem:[#allocation2 + $0x30] sm:$0xff] %vm562_vm1, %v6039_v43  ;;  %v6040_v31 = vadd.f32 %v6032_v30, %v6024_v11  ;;  %v6054_v29 = vld [vmem:[#allocation2 + $0x28] sm:$0xff] }
 0x706   : > { %6050 = vst.msk [vmem:[#allocation2 + $0x48] sm:$0xff] %vm562_vm1, %v6042_v49  ;;  %v6052_v3 = vld [vmem:[#allocation2 + $0x18] sm:$0xff]  ;;  %v6060_v38 = vpack.c.bf16 %v6054_v29, %v6053_v52 }
 0x707   : > { %6048 = vst.msk [vmem:[#allocation2 + $0x38] sm:$0xff] %vm562_vm1, %v6040_v31  ;;  %v6059_v39 = vpack.c.bf16 %v6052_v3, %v6051_v32 }
 0x709   : > { %7980 = vmatprep.mubr.msk.bf16.mxu1 %vm562_vm1, %v6059_v39 }
 0x70a   : > { %7981 = vmatmul.mubr.msk.bf16.vlgmr.msra.gmra.mrb[24].mxu1 %vm562_vm1, %v6060_v38 }
 0x70b   : > { %v6057_v56 = vld [vmem:[#allocation2 + $0x40] sm:$0xff] }
 0x70c   : > { %v6055_v14 = vld [vmem:[#allocation2 + $0x30] sm:$0xff] }
 0x70d   : > { %v6058_v17 = vld [vmem:[#allocation2 + $0x48] sm:$0xff] }
 0x70e   : > { %v6056_v57 = vld [vmem:[#allocation2 + $0x38] sm:$0xff]  ;;  %v6062_v42 = vpack.c.bf16 %v6058_v17, %v6057_v56 }
 0x70f   : > { %v6061_v6 = vpack.c.bf16 %v6056_v57, %v6055_v14 }
 0x711   : > { %7984 = vmatprep.mubr.msk.bf16.mxu1 %vm562_vm1, %v6061_v6 }
 0x712   : > { %7985 = vmatmul.mubr.msk.bf16.gmra.mrb[28].mxu1 %vm562_vm1, %v6062_v42 }
 0x713   : > { %7996 = vmatprep.mubr.msk.bf16.mxu1 %vm6348_vm3, %v8435_v58 }
 0x7dd   : > { %v7982_v26 = vpop.f32.mrb[24].mxu1 }
 0x7de   : > { %v6141_v10 = vadd.f32 %v7982_v26, %v7121_v25  ;;  %v6132_v48 = vpop.f32.mrb[25].mxu1 }
 0x7df   : > { %v6133_v62 = vadd.f32 %v7121_v25, %v6132_v48  ;;  %v7983_v35 = vpop.f32.mrb[26].mxu1 }
 0x7e0   : > { %v6144_v54 = vadd.f32 %v7983_v35, %v7121_v25  ;;  %v6135_v15 = vpop.f32.mrb[27].mxu1  ;;  %v6165_v1 = vmax.f32 %v6141_v10, 0.0 }
 0x7e1   : > { %v6136_v44 = vadd.f32 %v7121_v25, %v6135_v15  ;;  %v6163_v33 = vmax.f32 %v6133_v62, 0.0 }
 0x7e2   : > { %v6166_v50 = vmax.f32 %v6144_v54, 0.0  ;;  %v6174_v41 = vsel %vm6171_vm2, %v6165_v1, -inf }
 0x7e3   : > { %v6164_v34 = vmax.f32 %v6136_v44, 0.0  ;;  %v6172_v22 = vsel %vm6171_vm2, %v6163_v33, -inf }
 0x7e4   : > { %v6273_v51 = vpack.c.bf16 %v6166_v50, %v6165_v1  ;;  %v6175_v60 = vsel %vm6171_vm2, %v6166_v50, -inf }
 0x7e5   : > { %v7986_v46 = vpop.f32.mrb[28].mxu1  ;;  %v6272_v4 = vpack.c.bf16 %v6164_v34, %v6163_v33  ;;  %v6173_v2 = vsel %vm6171_vm2, %v6164_v34, -inf }
 0x7e6   : > { %v6157_v63 = vadd.f32 %v7986_v46, %v7121_v25  ;;  %v6148_v59 = vpop.f32.mrb[29].mxu1 }
 0x7e7   : > { %v6149_v61 = vadd.f32 %v7121_v25, %v6148_v59  ;;  %6336 = vrot.lane.b32.xlu0 %v6272_v4, %s8473_s17  ;;  %v7987_v18 = vpop.f32.mrb[30].mxu1 }
 0x7e8   : > { %v6169_v7 = vmax.f32 %v6157_v63, 0.0  ;;  %v6160_v20 = vadd.f32 %v7987_v18, %v7121_v25  ;;  %v6151_v45 = vpop.f32.mrb[31].mxu1 }
 0x7e9   : > { %v6167_v19 = vmax.f32 %v6149_v61, 0.0  ;;  %v6152_v53 = vadd.f32 %v7121_v25, %v6151_v45 }
 0x7ea   : > { %v6180_v55 = vsel %vm6171_vm2, %v6169_v7, -inf  ;;  %v6170_v21 = vmax.f32 %v6160_v20, 0.0 }
 0x7eb   : > { %v6181_v23 = vmax.f32 %v6174_v41, %v6180_v55  ;;  %v6176_v24 = vsel %vm6171_vm2, %v6167_v19, -inf  ;;  %v6168_v13 = vmax.f32 %v6152_v53, 0.0  ;;  %6338 = vrot.lane.b32.xlu0 %v6273_v51, %s8473_s17 }
 0x7ec   : > { %v6177_v47 = vmax.f32 %v6172_v22, %v6176_v24  ;;  %v6182_v0 = vsel %vm6171_vm2, %v6170_v21, -inf  ;;  %v6275_v5 = vpack.c.bf16 %v6170_v21, %v6169_v7 }
 0x7ed   : > { %v6183_v16 = vmax.f32 %v6175_v60, %v6182_v0  ;;  %v6178_v12 = vsel %vm6171_vm2, %v6168_v13, -inf  ;;  %v6274_v40 = vpack.c.bf16 %v6168_v13, %v6167_v19 }
 0x7ee   : > { %v6179_v36 = vmax.f32 %v6173_v2, %v6178_v12 }
 0x7ef   : > { %v6185_v37 = vmax.f32 %v6181_v23, %v6183_v16  ;;  %6340 = vrot.lane.b32.xlu1 %v6274_v40, %s8473_s17 }
 0x7f0   : > { %v6184_v9 = vmax.f32 %v6177_v47, %v6179_v36 }
 0x7f2   : > { %v6186_v27 = vmax.f32 %v6184_v9, %v6185_v37 }
 0x7f3   : > { %6342 = vrot.lane.b32.xlu1 %v6275_v5, %s8473_s17 }
 0x7f4   : > { %v6187_v28 = vrot.slane %v6186_v27, 4 }
 0x7f6   : > { %v6188_v43 = vmax.f32 %v6186_v27, %v6187_v28 }
 0x7f8   : > { %v6189_v11 = vrot.slane %v6188_v43, 2 }
 0x7fa   : > { %v6190_v8 = vmax.f32 %v6188_v43, %v6189_v11  ;;  %v8436_v43 = vld [vmem:[%s10243_s5 + $0x8] sm:$0xff]   ;;  %v8437_v11 = vld [vmem:[%s10243_s5 + $0x10] sm:$0xff]  }
 0x7fc   : > { %v6191_v49 = vrot.slane %v6190_v8, 1 }
 0x7fe   : > { %v6192_v30 = vmax.f32 %v6190_v8, %v6191_v49  ;;  %v8438_v8 = vld [vmem:[%s10243_s5 + $0x18] sm:$0xff]   ;;  %v8439_v49 = vld [vmem:[%s10243_s5 + $0x20] sm:$0xff]  }
 0x800   : > { %v10034_v31 = vsub.f32 %v6163_v33, %v6192_v30  ;;  %v10036_v29 = vsub.f32 %v6164_v34, %v6192_v30  ;;  %v10038_v32 = vsub.f32 %v6165_v1, %v6192_v30  ;;  %v10040_v3 = vsub.f32 %v6166_v50, %v6192_v30 }
 0x801   : > { %v10042_v39 = vsub.f32 %v6167_v19, %v6192_v30  ;;  %v10044_v52 = vsub.f32 %v6168_v13, %v6192_v30  ;;  %v10046_v38 = vsub.f32 %v6169_v7, %v6192_v30  ;;  %v10048_v17 = vsub.f32 %v6170_v21, %v6192_v30  ;;  %v8440_v30 = vld [vmem:[%s10243_s5 + $0x28] sm:$0xff]  }
 0x802   : > { %v6201_v14 = vmul.f32 1.442695, %v10034_v31  ;;  %v6203_v57 = vmul.f32 1.442695, %v10036_v29  ;;  %v6205_v6 = vmul.f32 1.442695, %v10038_v32 }
 0x803   : > { %v6207_v56 = vmul.f32 1.442695, %v10040_v3  ;;  %v6209_v42 = vmul.f32 1.442695, %v10042_v39  ;;  %v6211_v25 = vmul.f32 1.442695, %v10044_v52 }
 0x804   : > { %8443 = vpow2.f32 %v6201_v14  ;;  %v6213_v26 = vmul.f32 1.442695, %v10046_v38  ;;  %v6215_v10 = vmul.f32 1.442695, %v10048_v17  ;;  %v6277_v14 = vld [vmem:[%s10244_s6 + $0x8] sm:$0xff] }
 0x805   : > { %8445 = vpow2.f32 %v6203_v57 }
 0x806   : > { %8447 = vpow2.f32 %v6205_v6 }
 0x807   : > { %8449 = vpow2.f32 %v6207_v56  ;;  %v6486_v56 = vld [vmem:[%s10245_s7] sm:$0xff] }
 0x808   : > { %8451 = vpow2.f32 %v6209_v42 }
 0x809   : > { %8453 = vpow2.f32 %v6211_v25 }
 0x80a   : > { %8455 = vpow2.f32 %v6213_v26 }
 0x80b   : > { %8457 = vpow2.f32 %v6215_v10 }
 0x80e   : > { %v8444_v48 = vpop.eup %8443 }
 0x80f   : > { %v8446_v62 = vpop.eup %8445  ;;  %v6217_v35 = vsel %vm6171_vm2, %v8444_v48, 0.0 }
 0x810   : > { %v8448_v54 = vpop.eup %8447  ;;  %v6218_v15 = vsel %vm6171_vm2, %v8446_v62, 0.0  ;;  %v6488_v62 = vld [vmem:[%s10245_s7 + $0x10] sm:$0xff] }
 0x811   : > { %v8450_v44 = vpop.eup %8449  ;;  %v6219_v1 = vadd.f32 %v6218_v15, %v6217_v35  ;;  %v6220_v50 = vsel %vm6171_vm2, %v8448_v54, 0.0  ;;  %v6487_v35 = vld [vmem:[%s10245_s7 + $0x8] sm:$0xff] }
 0x812   : > { %v8452_v33 = vpop.eup %8451  ;;  %v6222_v51 = vsel %vm6171_vm2, %v8450_v44, 0.0 }
 0x813   : > { %v6221_v34 = vadd.f32 %v6220_v50, %v6219_v1  ;;  %v8454_v46 = vpop.eup %8453  ;;  %v6224_v63 = vsel %vm6171_vm2, %v8452_v33, 0.0  ;;  %v6282_v1 = vld [vmem:[%s10244_s6 + $0x30] sm:$0xff]  ;;  %v6489_v50 = vld [vmem:[%s10245_s7 + $0x18] sm:$0xff]  ;;  %v6280_v33 = vld [vmem:[%s10244_s6 + $0x20] sm:$0xff] }
 0x814   : > { %v8456_v59 = vpop.eup %8455  ;;  %v6226_v18 = vsel %vm6171_vm2, %v8454_v46, 0.0 }
 0x815   : > { %v6223_v4 = vadd.f32 %v6222_v51, %v6221_v34  ;;  %v8458_v58 = vpop.eup %8457  ;;  %v6228_v20 = vsel %vm6171_vm2, %v8456_v59, 0.0 }
 0x816   : > { %v6230_v19 = vsel %vm6171_vm2, %v8458_v58, 0.0 }
 0x817   : > { %v6225_v61 = vadd.f32 %v6224_v63, %v6223_v4  ;;  %v6283_v4 = vld [vmem:[%s10244_s6 + $0x38] sm:$0xff] }
 0x819   : > { %v6227_v7 = vadd.f32 %v6226_v18, %v6225_v61  ;;  %v6281_v61 = vld [vmem:[%s10244_s6 + $0x28] sm:$0xff] }
 0x81b   : > { %v6229_v45 = vadd.f32 %v6228_v20, %v6227_v7 }
 0x81d   : > { %v6231_v53 = vadd.f32 %v6230_v19, %v6229_v45 }
 0x81f   : > { %v6232_v41 = vrot.slane %v6231_v53, 4 }
 0x821   : > { %v6233_v55 = vadd.f32 %v6232_v41, %v6231_v53  ;;  %v6490_v53 = vld [vmem:[%s10245_s7 + $0x20] sm:$0xff] }
 0x823   : > { %v6234_v21 = vrot.slane %v6233_v55, 2 }
 0x825   : > { %v6235_v22 = vadd.f32 %v6234_v21, %v6233_v55 }
 0x827   : > { %v6236_v23 = vrot.slane %v6235_v22, 1 }
 0x829   : > { %v6237_v24 = vadd.f32 %v6236_v23, %v6235_v22 }
 0x82b   : > { %8459 = vlog2.f32 %v6237_v24 }
 0x835   : > { %v8460_v13 = vpop.eup %8459 }
 0x836   : > { %v6239_v60 = vmul.f32 0.6931472, %v8460_v13 }
 0x838   : > { %v6240_v47 = vsub.f32 %v10034_v31, %v6239_v60  ;;  %v6241_v0 = vsub.f32 %v10036_v29, %v6239_v60  ;;  %v6242_v5 = vsub.f32 %v10038_v32, %v6239_v60  ;;  %v6243_v2 = vsub.f32 %v10040_v3, %v6239_v60  ;;  %v8441_v31 = vld [vmem:[%s10243_s5 + $0x30] sm:$0xff]   ;;  %v8442_v29 = vld [vmem:[%s10243_s5 + $0x38] sm:$0xff]   ;;  %v6276_v3 = vld [vmem:[%s10244_s6] sm:$0xff] }
 0x839   : > { %v6244_v16 = vsub.f32 %v10042_v39, %v6239_v60  ;;  %v6245_v12 = vsub.f32 %v10044_v52, %v6239_v60  ;;  %v6246_v40 = vsub.f32 %v10046_v38, %v6239_v60  ;;  %v6247_v36 = vsub.f32 %v10048_v17, %v6239_v60  ;;  %v6278_v32 = vld [vmem:[%s10244_s6 + $0x10] sm:$0xff]  ;;  %v6279_v52 = vld [vmem:[%s10244_s6 + $0x18] sm:$0xff] }
 0x83a   : > { %6248 = vst.msk [vmem:[%s8559_s26] sm:$0xff] %vm6171_vm2, %v6240_v47  ;;  %6249 = vst.msk [vmem:[%s8559_s26 + $0x8] sm:$0xff] %vm6171_vm2, %v6241_v0  ;;  %v6492_v60 = vld [vmem:[%s10245_s7 + $0x30] sm:$0xff]  ;;  %v6491_v47 = vld [vmem:[%s10245_s7 + $0x28] sm:$0xff] }
 0x83b   : > { %6250 = vst.msk [vmem:[%s8559_s26 + $0x10] sm:$0xff] %vm6171_vm2, %v6242_v5  ;;  %6251 = vst.msk [vmem:[%s8559_s26 + $0x18] sm:$0xff] %vm6171_vm2, %v6243_v2 }
 0x83c   : > { %6252 = vst.msk [vmem:[%s8559_s26 + $0x20] sm:$0xff] %vm6171_vm2, %v6244_v16  ;;  %6253 = vst.msk [vmem:[%s8559_s26 + $0x28] sm:$0xff] %vm6171_vm2, %v6245_v12  ;;  %v6286_v12 = vld [vmem:[%s10244_s6 + $0x50] sm:$0xff] }
 0x83d   : > { %6254 = vst.msk [vmem:[%s8559_s26 + $0x30] sm:$0xff] %vm6171_vm2, %v6246_v40  ;;  %6255 = vst.msk [vmem:[%s8559_s26 + $0x38] sm:$0xff] %vm6171_vm2, %v6247_v36  ;;  %v6493_v36 = vld [vmem:[%s10245_s7 + $0x38] sm:$0xff] }
 0x859   : > { %v6337_v37 = vpop.permute.xlu0 %6336 }
 0x85a   : > { %7988 = vmatprep.subr.bf16.mxu1 %v6337_v37 }
 0x85b   : > { %7989 = vmatpush3.bf16.msra.mxu1 %v6337_v37  ;;  %v6284_v37 = vld [vmem:[%s10244_s6 + $0x40] sm:$0xff] }
 0x85d   : > { %v6339_v9 = vpop.permute.xlu0 %6338 }
 0x85e   : > { %7990 = vmatprep.subr.bf16.mxu1 %v6339_v9 }
 0x85f   : > { %7991 = vmatpush3.bf16.msra.mxu1 %v6339_v9 }
 0x861   : > { %v6341_v27 = vpop.permute.xlu1 %6340 }
 0x862   : > { %7992 = vmatprep.subr.bf16.mxu1 %v6341_v27 }
 0x863   : > { %7993 = vmatpush3.bf16.msra.mxu1 %v6341_v27 }
 0x865   : > { %v6343_v28 = vpop.permute.xlu1 %6342 }
 0x866   : > { %7994 = vmatprep.subr.bf16.mxu1 %v6343_v28 }
 0x867   : > { %7995 = vmatpush3.bf16.msra.mxu1 %v6343_v28 }
 0x86a   : > { %7997 = vmatmul.mubr.msk.bf16.vlgmr.msra.gmra.mrb[32].mxu1 %vm6348_vm3, %v8436_v43 }
 0x86b   : > { %8000 = vmatprep.mubr.msk.bf16.mxu1 %vm6348_vm3, %v8437_v11  ;;  %v6287_v11 = vld [vmem:[%s10244_s6 + $0x58] sm:$0xff] }
 0x872   : > { %8001 = vmatmul.mubr.msk.bf16.gmra.mrb[36].mxu1 %vm6348_vm3, %v8438_v8 }
 0x873   : > { %8004 = vmatprep.mubr.msk.bf16.mxu1 %vm6348_vm3, %v8439_v49 }
 0x87a   : > { %8005 = vmatmul.mubr.msk.bf16.gmra.mrb[40].mxu1 %vm6348_vm3, %v8440_v30 }
 0x87b   : > { %8008 = vmatprep.mubr.msk.bf16.mxu1 %vm6348_vm3, %v8441_v31  ;;  %v6285_v31 = vld [vmem:[%s10244_s6 + $0x48] sm:$0xff] }
 0x882   : > { %8009 = vmatmul.mubr.msk.bf16.gmra.mrb[44].mxu1 %vm6348_vm3, %v8442_v29 }
 0x93d   : > { %v7998_v39 = vpop.f32.mrb[32].mxu1 }
 0x93e   : > { %v6416_v38 = vadd.f32 %v7998_v39, %v6278_v32  ;;  %v6407_v17 = vpop.f32.mrb[33].mxu1 }
 0x93f   : > { %v6408_v57 = vadd.f32 %v6407_v17, %v6276_v3  ;;  %v7999_v6 = vpop.f32.mrb[34].mxu1 }
 0x940   : > { %v6419_v42 = vadd.f32 %v7999_v6, %v6279_v52  ;;  %v6410_v25 = vpop.f32.mrb[35].mxu1  ;;  %v6472_v26 = vmax.f32 %v6416_v38, 0.0  ;;  %v6494_v38 = vld [vmem:[%s10245_s7 + $0x40] sm:$0xff] }
 0x941   : > { %v6470_v10 = vmax.f32 %v6408_v57, 0.0  ;;  %v6411_v48 = vadd.f32 %v6410_v25, %v6277_v14 }
 0x942   : > { %v6473_v15 = vmax.f32 %v6419_v42, 0.0  ;;  %v6504_v34 = vmul.f32 %v6488_v62, %v6472_v26  ;;  %v6496_v26 = vld [vmem:[%s10245_s7 + $0x50] sm:$0xff] }
 0x943   : > { %v6502_v54 = vmul.f32 %v6486_v56, %v6470_v10  ;;  %v6471_v44 = vmax.f32 %v6411_v48, 0.0  ;;  %v6495_v10 = vld [vmem:[%s10245_s7 + $0x48] sm:$0xff] }
 0x944   : > { %v6505_v58 = vmul.f32 %v6489_v50, %v6473_v15  ;;  %v6521_v21 = vsel %vm6171_vm2, %v6504_v34, 0.0  ;;  %v6290_v15 = vld [vmem:[%s10244_s6 + $0x70] sm:$0xff]  ;;  %v6288_v50 = vld [vmem:[%s10244_s6 + $0x60] sm:$0xff] }
 0x945   : > { %v6503_v51 = vmul.f32 %v6487_v35, %v6471_v44  ;;  %v8002_v46 = vpop.f32.mrb[36].mxu1  ;;  %v6518_v18 = vsel %vm6171_vm2, %v6502_v54, 0.0 }
 0x946   : > { %v6432_v63 = vadd.f32 %v8002_v46, %v6282_v1  ;;  %v6423_v59 = vpop.f32.mrb[37].mxu1  ;;  %v6523_v0 = vsel %vm6171_vm2, %v6505_v58, 0.0  ;;  %v6497_v1 = vld [vmem:[%s10245_s7 + $0x58] sm:$0xff] }
 0x947   : > { %v6519_v7 = vsel %vm6171_vm2, %v6503_v51, 0.0  ;;  %v6424_v20 = vadd.f32 %v6423_v59, %v6280_v33  ;;  %v8003_v45 = vpop.f32.mrb[38].mxu1 }
 0x948   : > { %v6520_v19 = vadd.f32 %v6519_v7, %v6518_v18  ;;  %v6435_v41 = vadd.f32 %v8003_v45, %v6283_v4  ;;  %v6426_v55 = vpop.f32.mrb[39].mxu1  ;;  %v6476_v22 = vmax.f32 %v6432_v63, 0.0  ;;  %v6291_v4 = vld [vmem:[%s10244_s6 + $0x78] sm:$0xff]  ;;  %v6289_v18 = vld [vmem:[%s10244_s6 + $0x68] sm:$0xff] }
 0x949   : > { %v6474_v23 = vmax.f32 %v6424_v20, 0.0  ;;  %v6427_v24 = vadd.f32 %v6426_v55, %v6281_v61 }
 0x94a   : > { %v6522_v13 = vadd.f32 %v6521_v21, %v6520_v19  ;;  %v6477_v2 = vmax.f32 %v6435_v41, 0.0  ;;  %v6508_v9 = vmul.f32 %v6492_v60, %v6476_v22  ;;  %v6500_v60 = vld [vmem:[%s10245_s7 + $0x70] sm:$0xff] }
 0x94b   : > { %v6506_v5 = vmul.f32 %v6490_v53, %v6474_v23  ;;  %v6475_v16 = vmax.f32 %v6427_v24, 0.0  ;;  %v6498_v53 = vld [vmem:[%s10245_s7 + $0x60] sm:$0xff] }
 0x94c   : > { %v6524_v40 = vadd.f32 %v6523_v0, %v6522_v13  ;;  %v6509_v29 = vmul.f32 %v6493_v36, %v6477_v2  ;;  %v6529_v57 = vsel %vm6171_vm2, %v6508_v9, 0.0 }
 0x94d   : > { %v6525_v27 = vsel %vm6171_vm2, %v6506_v5, 0.0  ;;  %v6507_v28 = vmul.f32 %v6491_v47, %v6475_v16  ;;  %v8006_v43 = vpop.f32.mrb[40].mxu1  ;;  %v6499_v47 = vld [vmem:[%s10245_s7 + $0x68] sm:$0xff] }
 0x94e   : > { %v6526_v8 = vadd.f32 %v6525_v27, %v6524_v40  ;;  %v6448_v49 = vadd.f32 %v8006_v43, %v6286_v12  ;;  %v6439_v30 = vpop.f32.mrb[41].mxu1  ;;  %v6531_v48 = vsel %vm6171_vm2, %v6509_v29, 0.0  ;;  %v6501_v40 = vld [vmem:[%s10245_s7 + $0x78] sm:$0xff] }
 0x94f   : > { %v6527_v32 = vsel %vm6171_vm2, %v6507_v28, 0.0  ;;  %v6440_v3 = vadd.f32 %v6439_v30, %v6284_v37  ;;  %v8007_v39 = vpop.f32.mrb[42].mxu1 }
 0x950   : > { %v6528_v52 = vadd.f32 %v6527_v32, %v6526_v8  ;;  %v6451_v17 = vadd.f32 %v8007_v39, %v6287_v11  ;;  %v6442_v14 = vpop.f32.mrb[43].mxu1  ;;  %v6480_v6 = vmax.f32 %v6448_v49, 0.0 }
 0x951   : > { %v6478_v56 = vmax.f32 %v6440_v3, 0.0  ;;  %v6443_v42 = vadd.f32 %v6442_v14, %v6285_v31 }
 0x952   : > { %v6530_v25 = vadd.f32 %v6529_v57, %v6528_v52  ;;  %v6481_v35 = vmax.f32 %v6451_v17, 0.0  ;;  %v6512_v33 = vmul.f32 %v6496_v26, %v6480_v6 }
 0x953   : > { %v6510_v62 = vmul.f32 %v6494_v38, %v6478_v56  ;;  %v6479_v54 = vmax.f32 %v6443_v42, 0.0  ;;  %v6555_v38 = vld [vmem:[#allocation4] sm:$0x1] }
 0x954   : > { %v6532_v44 = vadd.f32 %v6531_v48, %v6530_v25  ;;  %v6513_v58 = vmul.f32 %v6497_v1, %v6481_v35  ;;  %v6537_v21 = vsel %vm6171_vm2, %v6512_v33, 0.0 }
 0x955   : > { %v6533_v34 = vsel %vm6171_vm2, %v6510_v62, 0.0  ;;  %v6511_v51 = vmul.f32 %v6495_v10, %v6479_v54  ;;  %v8010_v46 = vpop.f32.mrb[44].mxu1 }
 0x956   : > { %v6534_v63 = vadd.f32 %v6533_v34, %v6532_v44  ;;  %v6464_v59 = vadd.f32 %v8010_v46, %v6290_v15  ;;  %v6455_v61 = vpop.f32.mrb[45].mxu1  ;;  %v6539_v0 = vsel %vm6171_vm2, %v6513_v58, 0.0 }
 0x957   : > { %v6535_v7 = vsel %vm6171_vm2, %v6511_v51, 0.0  ;;  %v6456_v20 = vadd.f32 %v6455_v61, %v6288_v50  ;;  %v8011_v45 = vpop.f32.mrb[46].mxu1 }
 0x958   : > { %v6536_v19 = vadd.f32 %v6535_v7, %v6534_v63  ;;  %v6467_v41 = vadd.f32 %v8011_v45, %v6291_v4  ;;  %v6458_v55 = vpop.f32.mrb[47].mxu1  ;;  %v6484_v22 = vmax.f32 %v6464_v59, 0.0 }
 0x959   : > { %v6482_v23 = vmax.f32 %v6456_v20, 0.0  ;;  %v6459_v24 = vadd.f32 %v6458_v55, %v6289_v18 }
 0x95a   : > { %v6538_v13 = vadd.f32 %v6537_v21, %v6536_v19  ;;  %v6485_v2 = vmax.f32 %v6467_v41, 0.0  ;;  %v6516_v36 = vmul.f32 %v6500_v60, %v6484_v22 }
 0x95b   : > { %v6514_v5 = vmul.f32 %v6498_v53, %v6482_v23  ;;  %v6483_v16 = vmax.f32 %v6459_v24, 0.0 }
 0x95c   : > { %v6540_v12 = vadd.f32 %v6539_v0, %v6538_v13  ;;  %v6517_v28 = vmul.f32 %v6501_v40, %v6485_v2  ;;  %v6545_v8 = vsel %vm6171_vm2, %v6516_v36, 0.0 }
 0x95d   : > { %v6541_v37 = vsel %vm6171_vm2, %v6514_v5, 0.0  ;;  %v6515_v9 = vmul.f32 %v6499_v47, %v6483_v16 }
 0x95e   : > { %v6542_v27 = vadd.f32 %v6541_v37, %v6540_v12  ;;  %v6547_v30 = vsel %vm6171_vm2, %v6517_v28, 0.0 }
 0x95f   : > { %v6543_v43 = vsel %vm6171_vm2, %v6515_v9, 0.0 }
 0x960   : > { %v6544_v11 = vadd.f32 %v6543_v43, %v6542_v27 }
 0x962   : > { %v6546_v49 = vadd.f32 %v6545_v8, %v6544_v11 }
 0x964   : > { %v6548_v31 = vadd.f32 %v6547_v30, %v6546_v49 }
 0x966   : > { %v6549_v29 = vrot.slane %v6548_v31, 4 }
 0x968   : > { %v6550_v32 = vadd.f32 %v6549_v29, %v6548_v31 }
 0x96a   : > { %v6551_v3 = vrot.slane %v6550_v32, 2 }
 0x96c   : > { %v6552_v39 = vadd.f32 %v6551_v3, %v6550_v32 }
 0x96e   : > { %v6553_v52 = vrot.slane %v6552_v39, 1 }
 0x970   : > { %v6554_v17 = vadd.f32 %v6553_v52, %v6552_v39 }
 0x972   : > { %v6556_v14 = vadd.f32 %v6555_v38, %v6554_v17 }
 0x974   : > { %8461 = vtanh.f32 %v6556_v14 }
 0x97e   : > { %v8462_v57 = vpop.eup %8461 }
 0x97f   : > { %6559 = vst.msk [vmem:[%s370_s20] sm:$0x1] %vm6558_vm4, %v8462_v57 }
 0x980 PF: > { %s23_s15 = sadd.s32 1, %s8469_s15  }
 0x981   : > { %p20_p5 = scmp.ge.s32.totalorder %s23_s15, 4  }
 0x983   :  { %22 = sbr.rel (!%p20_p5) target bundleno = 3 (0x3), region = 150 }

</bundles_post_ra>
